<compile_context>
chip_gen: v7x
topology: tpu7x:2x2x1
jax: 0.10.0
libtpu: 0.0.40
codegen_flags: <defaults>
</compile_context>

<pallas_src>
import functools

import jax
import jax.numpy as jnp
from jax.experimental import pallas as pl
from jax.experimental.pallas import tpu as pltpu

NEG_SLOPE = 0.2               # nn.LeakyReLU(0.2)
IN_EPS = 1e-5                 # nn.InstanceNorm2d default eps
VMEM_LIMIT = 48 * 1024 * 1024  # v7x(64 MiB)-safe; fine on v5e/v6e (128 MiB)


def _round_up(x, m):
    return ((x + m - 1) // m) * m


# ---------------------------------------------------------------------------
# Fused conv (+bias) [+InstanceNorm] [+LeakyReLU] kernel.  One grid step = one
# sample; all operands for that sample are VMEM-resident.
# ---------------------------------------------------------------------------
def _fused_conv_kernel(x_ref, w_ref, b_ref, o_ref, *, kh, kw_taps, stride,
                       ho, wo, apply_inorm, apply_lrelu, neg_slope, eps):
    # x_ref: (Hp, Wr, Ce)            bf16  padded (W-folded if stride 2) input
    # w_ref: (kh*kw_taps, Ce, Co)    bf16  packed weights (resident)
    # b_ref: (1, Co)                 f32   bias (zeros if the layer has none)
    # o_ref: (Ho, Wo, Co)            bf16/f32 per-sample output block
    co = w_ref.shape[-1]
    bias = b_ref[...].astype(jnp.float32)              # (1, Co)

    def row_body(r, carry):
        acc = jnp.zeros((wo, co), jnp.float32)
        base = stride * r
        for i in range(kh):                             # static, unrolled
            row = x_ref[base + i]                       # (Wr, Ce) bf16
            for j in range(kw_taps):                    # static, unrolled
                tap = row[j:j + wo, :]                  # (Wo, Ce) bf16
                acc = acc + jnp.dot(tap, w_ref[i * kw_taps + j],
                                    preferred_element_type=jnp.float32)
        acc = acc + bias
        if apply_lrelu and not apply_inorm:             # layer 1: act per row
            acc = jnp.where(acc >= 0.0, acc, neg_slope * acc)
        o_ref[r] = acc.astype(o_ref.dtype)
        return carry

    jax.lax.fori_loop(0, ho, row_body, 0)

    if apply_inorm:
        # InstanceNorm2d(affine=False) + LeakyReLU on the resident output.
        y = o_ref[...].astype(jnp.float32)              # (Ho, Wo, Co)
        inv_s = 1.0 / (ho * wo)
        mean = jnp.sum(jnp.sum(y, axis=1, keepdims=True),
                       axis=0, keepdims=True) * inv_s
        cen = y - mean
        var = jnp.sum(jnp.sum(cen * cen, axis=1, keepdims=True),
                      axis=0, keepdims=True) * inv_s    # two-pass (stable)
        yn = cen * jax.lax.rsqrt(var + eps)
        if apply_lrelu:
            yn = jnp.where(yn >= 0.0, yn, neg_slope * yn)
        o_ref[...] = yn.astype(o_ref.dtype)


def fused_conv_layer(x, w_packed, b_packed, cfg, out_dtype):
    """x: (N, H, W, Cin) bf16 NHWC -> (N, Ho, Wo, Cout_padded) out_dtype."""
    n, h, w, cin = x.shape
    kh, kw = 4, 4
    s = cfg["stride"]
    ph, pw = cfg["pad"]
    ho = (h + 2 * ph - kh) // s + 1
    wo = (w + 2 * pw - kw) // s + 1

    xp = jnp.pad(x, ((0, 0), (ph, ph), (pw, pw), (0, 0)))
    wp = w + 2 * pw
    if s == 2:
        # Fold the W-stride into channels (free reshape): a 4x4 stride-(2,2)
        # conv becomes a 4x2-tap stride-(2,1) conv over 2*Cin channels.
        if wp % 2:
            xp = jnp.pad(xp, ((0, 0), (0, 0), (0, 1), (0, 0)))
            wp += 1
        xr = xp.reshape(n, h + 2 * ph, wp // 2, 2 * cin)
        kw_taps = kw // 2
    else:
        xr = xp
        kw_taps = kw
    _, hp_r, wr, ce = xr.shape
    taps, ce_w, co_p = w_packed.shape
    assert taps == kh * kw_taps and ce_w == ce

    kern = functools.partial(
        _fused_conv_kernel, kh=kh, kw_taps=kw_taps, stride=s, ho=ho, wo=wo,
        apply_inorm=cfg["inorm"], apply_lrelu=cfg["lrelu"],
        neg_slope=NEG_SLOPE, eps=IN_EPS)

    out = pl.pallas_call(
        kern,
        out_shape=jax.ShapeDtypeStruct((n, ho, wo, co_p), out_dtype),
        grid=(n,),
        in_specs=[
            pl.BlockSpec((None, hp_r, wr, ce), lambda b: (b, 0, 0, 0)),
            pl.BlockSpec((taps, ce, co_p), lambda b: (0, 0, 0)),
            pl.BlockSpec((1, co_p), lambda b: (0, 0)),
        ],
        out_specs=pl.BlockSpec((None, ho, wo, co_p), lambda b: (b, 0, 0, 0)),
        compiler_params=pltpu.CompilerParams(
            dimension_semantics=("parallel",),
            vmem_limit_bytes=VMEM_LIMIT,
        ),
        cost_estimate=pl.CostEstimate(
            flops=2 * n * ho * wo * kh * kw * cin * co_p,
            transcendentals=n * co_p if cfg["inorm"] else 0,
            bytes_accessed=(xr.size * xr.dtype.itemsize
                            + w_packed.size * 2 + b_packed.size * 4
                            + n * ho * wo * co_p * jnp.dtype(out_dtype).itemsize),
        ),
    )(xr, w_packed, b_packed)
    return out


# ---------------------------------------------------------------------------
# Parameters: PyTorch-style init + one-time packing (outside the jitted path).
# ---------------------------------------------------------------------------
def layer_configs(dim):
    return [
        dict(cout=dim,     stride=2, pad=(1, 1), inorm=False, lrelu=True),
        dict(cout=dim * 2, stride=2, pad=(1, 1), inorm=True,  lrelu=True),
        dict(cout=dim * 4, stride=2, pad=(1, 1), inorm=True,  lrelu=True),
        dict(cout=dim * 8, stride=1, pad=(1, 2), inorm=True,  lrelu=True),
        dict(cout=1,       stride=1, pad=(2, 1), inorm=False, lrelu=False),
    ]


def init_params(key, dim):
    """Deterministic Conv2d-style init (uniform in +/- 1/sqrt(fan_in))."""
    def conv_w(k, cout, cin):
        bound = 1.0 / (cin * 16) ** 0.5
        return jax.random.uniform(k, (cout, cin, 4, 4), jnp.float32, -bound, bound)

    def conv_b(k, cout, cin):
        bound = 1.0 / (cin * 16) ** 0.5
        return jax.random.uniform(k, (cout,), jnp.float32, -bound, bound)

    ks = jax.random.split(key, 7)
    return {
        "w1": conv_w(ks[0], dim, 3), "b1": conv_b(ks[1], dim, 3),
        "w2": conv_w(ks[2], dim * 2, dim),
        "w3": conv_w(ks[3], dim * 4, dim * 2),
        "w4": conv_w(ks[4], dim * 8, dim * 4),
        "w5": conv_w(ks[5], 1, dim * 8), "b5": conv_b(ks[6], 1, dim * 8),
    }


def pack_params(params, dim):
    """Pack once: (Cout,Cin,KH,KW) -> (taps, Cin_eff, Cout_pad) bf16, fold the
    W-stride for stride-2 layers, pad Cout to a sublane multiple, prep bias."""
    cfgs = layer_configs(dim)
    names = [("w1", "b1"), ("w2", None), ("w3", None), ("w4", None), ("w5", "b5")]
    packed = []
    for cfg, (wn, bn) in zip(cfgs, names):
        w_pt = params[wn]
        o, c, khh, kww = w_pt.shape
        wt = jnp.transpose(w_pt, (2, 3, 1, 0))               # (KH, KW, C, O)
        if cfg["stride"] == 2:
            wt = wt.reshape(khh, kww // 2, 2 * c, o)          # (i, jj, b*C+c, o)
            taps, ce = khh * (kww // 2), 2 * c
        else:
            taps, ce = khh * kww, c
        wt = wt.reshape(taps, ce, o)
        o_p = max(_round_up(o, 8), 8)
        if o_p != o:
            wt = jnp.pad(wt, ((0, 0), (0, 0), (0, o_p - o)))
        b = params[bn] if bn is not None else jnp.zeros((o,), jnp.float32)
        b = b.astype(jnp.float32)
        if o_p != o:
            b = jnp.pad(b, (0, o_p - o))
        packed.append({"w": wt.astype(jnp.bfloat16), "b": b.reshape(1, o_p)})
    return packed, cfgs


def discriminator_forward(weights, x_nchw, cfgs):
    """weights: list of {'w','b'} arrays (pytree); cfgs: static layer configs."""
    x = jnp.transpose(x_nchw, (0, 2, 3, 1)).astype(jnp.bfloat16)   # NCHW->NHWC
    n_layers = len(cfgs)
    for li, (lw, cfg) in enumerate(zip(weights, cfgs)):
        last = li == n_layers - 1
        out_dtype = jnp.float32 if last else jnp.bfloat16
        x = fused_conv_layer(x, lw["w"], lw["b"], cfg, out_dtype)
        if x.shape[-1] != cfg["cout"]:                  # strip Cout padding
            x = x[..., :cfg["cout"]]
    return jnp.transpose(x, (0, 3, 1, 2))                          # NHWC->NCHW


if __name__ == "__main__":
    DIM = 8                                  # small `dim` for the example
    key = jax.random.PRNGKey(0)
    k_param, k_x = jax.random.split(key)
    params = init_params(k_param, DIM)
    packed, cfgs = pack_params(params, DIM)  # one-time weight packing
    x = jax.random.normal(k_x, (2, 3, 32, 32), jnp.float32)  # NCHW like torch

    fwd = jax.jit(functools.partial(discriminator_forward, cfgs=cfgs))
    out = jax.block_until_ready(fwd(packed, x))
    assert out.shape == (2, 1, 4, 4), out.shape
    assert jnp.all(jnp.isfinite(out))
    print("KERNEL_OK")
</pallas_src>

<mosaic_0001>
module attributes {stable_mosaic.version = 11 : i64} {
  func.func @_fused_conv_kernel(%arg0: i32, %arg1: memref<1x34x17x6xbf16, #tpu.memory_space<vmem>>, %arg2: memref<8x6x8xbf16, #tpu.memory_space<vmem>>, %arg3: memref<1x8xf32, #tpu.memory_space<vmem>>, %arg4: memref<1x16x16x8xbf16, #tpu.memory_space<vmem>>) attributes {dimension_semantics = [#tpu.dimension_semantics<parallel>], iteration_bounds = array<i64: 2>, scalar_prefetch = 0 : i64, scratch_operands = 0 : i64, tpu.core_type = #tpu.core_type<tc>, window_params = [{transform_indices = @transform_0, window_bounds = array<i64: 1, 34, 17, 6>}, {pipeline_mode = #tpu.pipeline_mode<synchronous>, transform_indices = @transform_1, window_bounds = array<i64: 8, 6, 8>}, {pipeline_mode = #tpu.pipeline_mode<synchronous>, transform_indices = @transform_2, window_bounds = array<i64: 1, 8>}, {transform_indices = @transform_3, window_bounds = array<i64: 1, 16, 16, 8>}]} {
    %c0 = arith.constant 0 : index
    %c0_0 = arith.constant 0 : index
    %0 = vector.load %arg3[%c0, %c0_0] : memref<1x8xf32, #tpu.memory_space<vmem>>, vector<1x8xf32>
    %c0_i32 = arith.constant 0 : i32
    %c16_i32 = arith.constant 16 : i32
    %1 = arith.addi %c0_i32, %c16_i32 : i32
    %c1_i32 = arith.constant 1 : i32
    scf.for %arg5 = %c0_i32 to %1 step %c1_i32  : i32 {
      %cst = arith.constant 0.000000e+00 : f32
      %2 = vector.broadcast %cst : f32 to vector<16x8xf32>
      %c2_i32 = arith.constant 2 : i32
      %3 = arith.muli %c2_i32, %arg5 : i32
      %c0_i32_2 = arith.constant 0 : i32
      %4 = arith.addi %3, %c0_i32_2 : i32
      %c0_3 = arith.constant 0 : index
      %5 = arith.index_cast %4 : i32 to index
      %c0_4 = arith.constant 0 : index
      %c0_5 = arith.constant 0 : index
      %6 = vector.load %arg1[%c0_3, %5, %c0_4, %c0_5] : memref<1x34x17x6xbf16, #tpu.memory_space<vmem>>, vector<1x1x17x6xbf16>
      %7 = vector.shape_cast %6 : vector<1x1x17x6xbf16> to vector<17x6xbf16>
      %8 = vector.extract_strided_slice %7 {offsets = [0, 0], sizes = [16, 6], strides = [1, 1]} : vector<17x6xbf16> to vector<16x6xbf16>
      %c0_6 = arith.constant 0 : index
      %c0_7 = arith.constant 0 : index
      %c0_8 = arith.constant 0 : index
      %9 = vector.load %arg2[%c0_6, %c0_7, %c0_8] : memref<8x6x8xbf16, #tpu.memory_space<vmem>>, vector<1x6x8xbf16>
      %10 = vector.shape_cast %9 : vector<1x6x8xbf16> to vector<6x8xbf16>
      %cst_9 = arith.constant dense<0.000000e+00> : vector<16x8xf32>
      %11 = tpu.matmul %8, %10, %cst_9 {dimension_numbers = #tpu.dot_dimension_numbers<[1], [0], [0], [1], [0, 0, 1, 1], [], []>} : vector<16x6xbf16>, vector<6x8xbf16>, vector<16x8xf32> -> vector<16x8xf32>
      %12 = arith.addf %2, %11 : vector<16x8xf32>
      %13 = vector.extract_strided_slice %7 {offsets = [1, 0], sizes = [16, 6], strides = [1, 1]} : vector<17x6xbf16> to vector<16x6xbf16>
      %c1 = arith.constant 1 : index
      %c0_10 = arith.constant 0 : index
      %c0_11 = arith.constant 0 : index
      %14 = vector.load %arg2[%c1, %c0_10, %c0_11] : memref<8x6x8xbf16, #tpu.memory_space<vmem>>, vector<1x6x8xbf16>
      %15 = vector.shape_cast %14 : vector<1x6x8xbf16> to vector<6x8xbf16>
      %cst_12 = arith.constant dense<0.000000e+00> : vector<16x8xf32>
      %16 = tpu.matmul %13, %15, %cst_12 {dimension_numbers = #tpu.dot_dimension_numbers<[1], [0], [0], [1], [0, 0, 1, 1], [], []>} : vector<16x6xbf16>, vector<6x8xbf16>, vector<16x8xf32> -> vector<16x8xf32>
      %17 = arith.addf %12, %16 : vector<16x8xf32>
      %c1_i32_13 = arith.constant 1 : i32
      %18 = arith.addi %3, %c1_i32_13 : i32
      %c0_14 = arith.constant 0 : index
      %19 = arith.index_cast %18 : i32 to index
      %c0_15 = arith.constant 0 : index
      %c0_16 = arith.constant 0 : index
      %20 = vector.load %arg1[%c0_14, %19, %c0_15, %c0_16] : memref<1x34x17x6xbf16, #tpu.memory_space<vmem>>, vector<1x1x17x6xbf16>
      %21 = vector.shape_cast %20 : vector<1x1x17x6xbf16> to vector<17x6xbf16>
      %22 = vector.extract_strided_slice %21 {offsets = [0, 0], sizes = [16, 6], strides = [1, 1]} : vector<17x6xbf16> to vector<16x6xbf16>
      %c2 = arith.constant 2 : index
      %c0_17 = arith.constant 0 : index
      %c0_18 = arith.constant 0 : index
      %23 = vector.load %arg2[%c2, %c0_17, %c0_18] : memref<8x6x8xbf16, #tpu.memory_space<vmem>>, vector<1x6x8xbf16>
      %24 = vector.shape_cast %23 : vector<1x6x8xbf16> to vector<6x8xbf16>
      %cst_19 = arith.constant dense<0.000000e+00> : vector<16x8xf32>
      %25 = tpu.matmul %22, %24, %cst_19 {dimension_numbers = #tpu.dot_dimension_numbers<[1], [0], [0], [1], [0, 0, 1, 1], [], []>} : vector<16x6xbf16>, vector<6x8xbf16>, vector<16x8xf32> -> vector<16x8xf32>
      %26 = arith.addf %17, %25 : vector<16x8xf32>
      %27 = vector.extract_strided_slice %21 {offsets = [1, 0], sizes = [16, 6], strides = [1, 1]} : vector<17x6xbf16> to vector<16x6xbf16>
      %c3 = arith.constant 3 : index
      %c0_20 = arith.constant 0 : index
      %c0_21 = arith.constant 0 : index
      %28 = vector.load %arg2[%c3, %c0_20, %c0_21] : memref<8x6x8xbf16, #tpu.memory_space<vmem>>, vector<1x6x8xbf16>
      %29 = vector.shape_cast %28 : vector<1x6x8xbf16> to vector<6x8xbf16>
      %cst_22 = arith.constant dense<0.000000e+00> : vector<16x8xf32>
      %30 = tpu.matmul %27, %29, %cst_22 {dimension_numbers = #tpu.dot_dimension_numbers<[1], [0], [0], [1], [0, 0, 1, 1], [], []>} : vector<16x6xbf16>, vector<6x8xbf16>, vector<16x8xf32> -> vector<16x8xf32>
      %31 = arith.addf %26, %30 : vector<16x8xf32>
      %c2_i32_23 = arith.constant 2 : i32
      %32 = arith.addi %3, %c2_i32_23 : i32
      %c0_24 = arith.constant 0 : index
      %33 = arith.index_cast %32 : i32 to index
      %c0_25 = arith.constant 0 : index
      %c0_26 = arith.constant 0 : index
      %34 = vector.load %arg1[%c0_24, %33, %c0_25, %c0_26] : memref<1x34x17x6xbf16, #tpu.memory_space<vmem>>, vector<1x1x17x6xbf16>
      %35 = vector.shape_cast %34 : vector<1x1x17x6xbf16> to vector<17x6xbf16>
      %36 = vector.extract_strided_slice %35 {offsets = [0, 0], sizes = [16, 6], strides = [1, 1]} : vector<17x6xbf16> to vector<16x6xbf16>
      %c4 = arith.constant 4 : index
      %c0_27 = arith.constant 0 : index
      %c0_28 = arith.constant 0 : index
      %37 = vector.load %arg2[%c4, %c0_27, %c0_28] : memref<8x6x8xbf16, #tpu.memory_space<vmem>>, vector<1x6x8xbf16>
      %38 = vector.shape_cast %37 : vector<1x6x8xbf16> to vector<6x8xbf16>
      %cst_29 = arith.constant dense<0.000000e+00> : vector<16x8xf32>
      %39 = tpu.matmul %36, %38, %cst_29 {dimension_numbers = #tpu.dot_dimension_numbers<[1], [0], [0], [1], [0, 0, 1, 1], [], []>} : vector<16x6xbf16>, vector<6x8xbf16>, vector<16x8xf32> -> vector<16x8xf32>
      %40 = arith.addf %31, %39 : vector<16x8xf32>
      %41 = vector.extract_strided_slice %35 {offsets = [1, 0], sizes = [16, 6], strides = [1, 1]} : vector<17x6xbf16> to vector<16x6xbf16>
      %c5 = arith.constant 5 : index
      %c0_30 = arith.constant 0 : index
      %c0_31 = arith.constant 0 : index
      %42 = vector.load %arg2[%c5, %c0_30, %c0_31] : memref<8x6x8xbf16, #tpu.memory_space<vmem>>, vector<1x6x8xbf16>
      %43 = vector.shape_cast %42 : vector<1x6x8xbf16> to vector<6x8xbf16>
      %cst_32 = arith.constant dense<0.000000e+00> : vector<16x8xf32>
      %44 = tpu.matmul %41, %43, %cst_32 {dimension_numbers = #tpu.dot_dimension_numbers<[1], [0], [0], [1], [0, 0, 1, 1], [], []>} : vector<16x6xbf16>, vector<6x8xbf16>, vector<16x8xf32> -> vector<16x8xf32>
      %45 = arith.addf %40, %44 : vector<16x8xf32>
      %c3_i32 = arith.constant 3 : i32
      %46 = arith.addi %3, %c3_i32 : i32
      %c0_33 = arith.constant 0 : index
      %47 = arith.index_cast %46 : i32 to index
      %c0_34 = arith.constant 0 : index
      %c0_35 = arith.constant 0 : index
      %48 = vector.load %arg1[%c0_33, %47, %c0_34, %c0_35] : memref<1x34x17x6xbf16, #tpu.memory_space<vmem>>, vector<1x1x17x6xbf16>
      %49 = vector.shape_cast %48 : vector<1x1x17x6xbf16> to vector<17x6xbf16>
      %50 = vector.extract_strided_slice %49 {offsets = [0, 0], sizes = [16, 6], strides = [1, 1]} : vector<17x6xbf16> to vector<16x6xbf16>
      %c6 = arith.constant 6 : index
      %c0_36 = arith.constant 0 : index
      %c0_37 = arith.constant 0 : index
      %51 = vector.load %arg2[%c6, %c0_36, %c0_37] : memref<8x6x8xbf16, #tpu.memory_space<vmem>>, vector<1x6x8xbf16>
      %52 = vector.shape_cast %51 : vector<1x6x8xbf16> to vector<6x8xbf16>
      %cst_38 = arith.constant dense<0.000000e+00> : vector<16x8xf32>
      %53 = tpu.matmul %50, %52, %cst_38 {dimension_numbers = #tpu.dot_dimension_numbers<[1], [0], [0], [1], [0, 0, 1, 1], [], []>} : vector<16x6xbf16>, vector<6x8xbf16>, vector<16x8xf32> -> vector<16x8xf32>
      %54 = arith.addf %45, %53 : vector<16x8xf32>
      %55 = vector.extract_strided_slice %49 {offsets = [1, 0], sizes = [16, 6], strides = [1, 1]} : vector<17x6xbf16> to vector<16x6xbf16>
      %c7 = arith.constant 7 : index
      %c0_39 = arith.constant 0 : index
      %c0_40 = arith.constant 0 : index
      %56 = vector.load %arg2[%c7, %c0_39, %c0_40] : memref<8x6x8xbf16, #tpu.memory_space<vmem>>, vector<1x6x8xbf16>
      %57 = vector.shape_cast %56 : vector<1x6x8xbf16> to vector<6x8xbf16>
      %cst_41 = arith.constant dense<0.000000e+00> : vector<16x8xf32>
      %58 = tpu.matmul %55, %57, %cst_41 {dimension_numbers = #tpu.dot_dimension_numbers<[1], [0], [0], [1], [0, 0, 1, 1], [], []>} : vector<16x6xbf16>, vector<6x8xbf16>, vector<16x8xf32> -> vector<16x8xf32>
      %59 = arith.addf %54, %58 : vector<16x8xf32>
      %60 = vector.broadcast %0 : vector<1x8xf32> to vector<16x8xf32>
      %61 = arith.addf %59, %60 : vector<16x8xf32>
      %cst_42 = arith.constant 0.000000e+00 : f32
      %62 = vector.broadcast %cst_42 : f32 to vector<16x8xf32>
      %63 = arith.cmpf oge, %61, %62 : vector<16x8xf32>
      %cst_43 = arith.constant 2.000000e-01 : f32
      %64 = vector.broadcast %cst_43 : f32 to vector<16x8xf32>
      %65 = arith.mulf %64, %61 : vector<16x8xf32>
      %66 = arith.select %63, %61, %65 : vector<16x8xi1>, vector<16x8xf32>
      %67 = arith.truncf %66 : vector<16x8xf32> to vector<16x8xbf16>
      %c0_44 = arith.constant 0 : index
      %68 = arith.index_cast %arg5 : i32 to index
      %c0_45 = arith.constant 0 : index
      %c0_46 = arith.constant 0 : index
      %69 = vector.load %arg4[%c0_44, %68, %c0_45, %c0_46] : memref<1x16x16x8xbf16, #tpu.memory_space<vmem>>, vector<1x1x16x8xbf16>
      %70 = vector.shape_cast %69 : vector<1x1x16x8xbf16> to vector<16x8xbf16>
      %71 = vector.shape_cast %67 : vector<16x8xbf16> to vector<1x1x16x8xbf16>
      tpu.vector_store %arg4[%c0_44, %68, %c0_45, %c0_46], %71 {strides = array<i32>} : memref<1x16x16x8xbf16, #tpu.memory_space<vmem>>, vector<1x1x16x8xbf16>,
    }
    %c16_i32_1 = arith.constant 16 : i32
    return
  }
  func.func @transform_0(%arg0: i32) -> (i32, i32, i32, i32) {
    %c0_i32 = arith.constant 0 : i32
    %c0_i32_0 = arith.constant 0 : i32
    %c0_i32_1 = arith.constant 0 : i32
    %c0_i32_2 = arith.constant 0 : i32
    return %arg0, %c0_i32, %c0_i32_0, %c0_i32_1 : i32, i32, i32, i32
  }
  func.func @transform_1(%arg0: i32) -> (i32, i32, i32) {
    %c0_i32 = arith.constant 0 : i32
    %c0_i32_0 = arith.constant 0 : i32
    %c0_i32_1 = arith.constant 0 : i32
    %c0_i32_2 = arith.constant 0 : i32
    return %c0_i32, %c0_i32_0, %c0_i32_1 : i32, i32, i32
  }
  func.func @transform_2(%arg0: i32) -> (i32, i32) {
    %c0_i32 = arith.constant 0 : i32
    %c0_i32_0 = arith.constant 0 : i32
    %c0_i32_1 = arith.constant 0 : i32
    return %c0_i32, %c0_i32_0 : i32, i32
  }
  func.func @transform_3(%arg0: i32) -> (i32, i32, i32, i32) {
    %c0_i32 = arith.constant 0 : i32
    %c0_i32_0 = arith.constant 0 : i32
    %c0_i32_1 = arith.constant 0 : i32
    %c0_i32_2 = arith.constant 0 : i32
    return %arg0, %c0_i32, %c0_i32_0, %c0_i32_1 : i32, i32, i32, i32
  }
}

module attributes {stable_mosaic.version = 11 : i64} {
  func.func @_fused_conv_kernel(%arg0: i32, %arg1: memref<1x18x9x16xbf16, #tpu.memory_space<vmem>>, %arg2: memref<8x16x16xbf16, #tpu.memory_space<vmem>>, %arg3: memref<1x16xf32, #tpu.memory_space<vmem>>, %arg4: memref<1x8x8x16xbf16, #tpu.memory_space<vmem>>) attributes {dimension_semantics = [#tpu.dimension_semantics<parallel>], iteration_bounds = array<i64: 2>, scalar_prefetch = 0 : i64, scratch_operands = 0 : i64, tpu.core_type = #tpu.core_type<tc>, window_params = [{transform_indices = @transform_0, window_bounds = array<i64: 1, 18, 9, 16>}, {pipeline_mode = #tpu.pipeline_mode<synchronous>, transform_indices = @transform_1, window_bounds = array<i64: 8, 16, 16>}, {pipeline_mode = #tpu.pipeline_mode<synchronous>, transform_indices = @transform_2, window_bounds = array<i64: 1, 16>}, {transform_indices = @transform_3, window_bounds = array<i64: 1, 8, 8, 16>}]} {
    %c0 = arith.constant 0 : index
    %c0_0 = arith.constant 0 : index
    %0 = vector.load %arg3[%c0, %c0_0] : memref<1x16xf32, #tpu.memory_space<vmem>>, vector<1x16xf32>
    %c0_i32 = arith.constant 0 : i32
    %c8_i32 = arith.constant 8 : i32
    %1 = arith.addi %c0_i32, %c8_i32 : i32
    %c1_i32 = arith.constant 1 : i32
    scf.for %arg5 = %c0_i32 to %1 step %c1_i32  : i32 {
      %cst_18 = arith.constant 0.000000e+00 : f32
      %34 = vector.broadcast %cst_18 : f32 to vector<8x16xf32>
      %c2_i32 = arith.constant 2 : i32
      %35 = arith.muli %c2_i32, %arg5 : i32
      %c0_i32_19 = arith.constant 0 : i32
      %36 = arith.addi %35, %c0_i32_19 : i32
      %c0_20 = arith.constant 0 : index
      %37 = arith.index_cast %36 : i32 to index
      %c0_21 = arith.constant 0 : index
      %c0_22 = arith.constant 0 : index
      %38 = vector.load %arg1[%c0_20, %37, %c0_21, %c0_22] : memref<1x18x9x16xbf16, #tpu.memory_space<vmem>>, vector<1x1x9x16xbf16>
      %39 = vector.shape_cast %38 : vector<1x1x9x16xbf16> to vector<9x16xbf16>
      %40 = vector.extract_strided_slice %39 {offsets = [0, 0], sizes = [8, 16], strides = [1, 1]} : vector<9x16xbf16> to vector<8x16xbf16>
      %c0_23 = arith.constant 0 : index
      %c0_24 = arith.constant 0 : index
      %c0_25 = arith.constant 0 : index
      %41 = vector.load %arg2[%c0_23, %c0_24, %c0_25] : memref<8x16x16xbf16, #tpu.memory_space<vmem>>, vector<1x16x16xbf16>
      %42 = vector.shape_cast %41 : vector<1x16x16xbf16> to vector<16x16xbf16>
      %cst_26 = arith.constant dense<0.000000e+00> : vector<8x16xf32>
      %43 = tpu.matmul %40, %42, %cst_26 {dimension_numbers = #tpu.dot_dimension_numbers<[1], [0], [0], [1], [0, 0, 1, 1], [], []>} : vector<8x16xbf16>, vector<16x16xbf16>, vector<8x16xf32> -> vector<8x16xf32>
      %44 = arith.addf %34, %43 : vector<8x16xf32>
      %45 = vector.extract_strided_slice %39 {offsets = [1, 0], sizes = [8, 16], strides = [1, 1]} : vector<9x16xbf16> to vector<8x16xbf16>
      %c1 = arith.constant 1 : index
      %c0_27 = arith.constant 0 : index
      %c0_28 = arith.constant 0 : index
      %46 = vector.load %arg2[%c1, %c0_27, %c0_28] : memref<8x16x16xbf16, #tpu.memory_space<vmem>>, vector<1x16x16xbf16>
      %47 = vector.shape_cast %46 : vector<1x16x16xbf16> to vector<16x16xbf16>
      %cst_29 = arith.constant dense<0.000000e+00> : vector<8x16xf32>
      %48 = tpu.matmul %45, %47, %cst_29 {dimension_numbers = #tpu.dot_dimension_numbers<[1], [0], [0], [1], [0, 0, 1, 1], [], []>} : vector<8x16xbf16>, vector<16x16xbf16>, vector<8x16xf32> -> vector<8x16xf32>
      %49 = arith.addf %44, %48 : vector<8x16xf32>
      %c1_i32_30 = arith.constant 1 : i32
      %50 = arith.addi %35, %c1_i32_30 : i32
      %c0_31 = arith.constant 0 : index
      %51 = arith.index_cast %50 : i32 to index
      %c0_32 = arith.constant 0 : index
      %c0_33 = arith.constant 0 : index
      %52 = vector.load %arg1[%c0_31, %51, %c0_32, %c0_33] : memref<1x18x9x16xbf16, #tpu.memory_space<vmem>>, vector<1x1x9x16xbf16>
      %53 = vector.shape_cast %52 : vector<1x1x9x16xbf16> to vector<9x16xbf16>
      %54 = vector.extract_strided_slice %53 {offsets = [0, 0], sizes = [8, 16], strides = [1, 1]} : vector<9x16xbf16> to vector<8x16xbf16>
      %c2 = arith.constant 2 : index
      %c0_34 = arith.constant 0 : index
      %c0_35 = arith.constant 0 : index
      %55 = vector.load %arg2[%c2, %c0_34, %c0_35] : memref<8x16x16xbf16, #tpu.memory_space<vmem>>, vector<1x16x16xbf16>
      %56 = vector.shape_cast %55 : vector<1x16x16xbf16> to vector<16x16xbf16>
      %cst_36 = arith.constant dense<0.000000e+00> : vector<8x16xf32>
      %57 = tpu.matmul %54, %56, %cst_36 {dimension_numbers = #tpu.dot_dimension_numbers<[1], [0], [0], [1], [0, 0, 1, 1], [], []>} : vector<8x16xbf16>, vector<16x16xbf16>, vector<8x16xf32> -> vector<8x16xf32>
      %58 = arith.addf %49, %57 : vector<8x16xf32>
      %59 = vector.extract_strided_slice %53 {offsets = [1, 0], sizes = [8, 16], strides = [1, 1]} : vector<9x16xbf16> to vector<8x16xbf16>
      %c3 = arith.constant 3 : index
      %c0_37 = arith.constant 0 : index
      %c0_38 = arith.constant 0 : index
      %60 = vector.load %arg2[%c3, %c0_37, %c0_38] : memref<8x16x16xbf16, #tpu.memory_space<vmem>>, vector<1x16x16xbf16>
      %61 = vector.shape_cast %60 : vector<1x16x16xbf16> to vector<16x16xbf16>
      %cst_39 = arith.constant dense<0.000000e+00> : vector<8x16xf32>
      %62 = tpu.matmul %59, %61, %cst_39 {dimension_numbers = #tpu.dot_dimension_numbers<[1], [0], [0], [1], [0, 0, 1, 1], [], []>} : vector<8x16xbf16>, vector<16x16xbf16>, vector<8x16xf32> -> vector<8x16xf32>
      %63 = arith.addf %58, %62 : vector<8x16xf32>
      %c2_i32_40 = arith.constant 2 : i32
      %64 = arith.addi %35, %c2_i32_40 : i32
      %c0_41 = arith.constant 0 : index
      %65 = arith.index_cast %64 : i32 to index
      %c0_42 = arith.constant 0 : index
      %c0_43 = arith.constant 0 : index
      %66 = vector.load %arg1[%c0_41, %65, %c0_42, %c0_43] : memref<1x18x9x16xbf16, #tpu.memory_space<vmem>>, vector<1x1x9x16xbf16>
      %67 = vector.shape_cast %66 : vector<1x1x9x16xbf16> to vector<9x16xbf16>
      %68 = vector.extract_strided_slice %67 {offsets = [0, 0], sizes = [8, 16], strides = [1, 1]} : vector<9x16xbf16> to vector<8x16xbf16>
      %c4 = arith.constant 4 : index
      %c0_44 = arith.constant 0 : index
      %c0_45 = arith.constant 0 : index
      %69 = vector.load %arg2[%c4, %c0_44, %c0_45] : memref<8x16x16xbf16, #tpu.memory_space<vmem>>, vector<1x16x16xbf16>
      %70 = vector.shape_cast %69 : vector<1x16x16xbf16> to vector<16x16xbf16>
      %cst_46 = arith.constant dense<0.000000e+00> : vector<8x16xf32>
      %71 = tpu.matmul %68, %70, %cst_46 {dimension_numbers = #tpu.dot_dimension_numbers<[1], [0], [0], [1], [0, 0, 1, 1], [], []>} : vector<8x16xbf16>, vector<16x16xbf16>, vector<8x16xf32> -> vector<8x16xf32>
      %72 = arith.addf %63, %71 : vector<8x16xf32>
      %73 = vector.extract_strided_slice %67 {offsets = [1, 0], sizes = [8, 16], strides = [1, 1]} : vector<9x16xbf16> to vector<8x16xbf16>
      %c5 = arith.constant 5 : index
      %c0_47 = arith.constant 0 : index
      %c0_48 = arith.constant 0 : index
      %74 = vector.load %arg2[%c5, %c0_47, %c0_48] : memref<8x16x16xbf16, #tpu.memory_space<vmem>>, vector<1x16x16xbf16>
      %75 = vector.shape_cast %74 : vector<1x16x16xbf16> to vector<16x16xbf16>
      %cst_49 = arith.constant dense<0.000000e+00> : vector<8x16xf32>
      %76 = tpu.matmul %73, %75, %cst_49 {dimension_numbers = #tpu.dot_dimension_numbers<[1], [0], [0], [1], [0, 0, 1, 1], [], []>} : vector<8x16xbf16>, vector<16x16xbf16>, vector<8x16xf32> -> vector<8x16xf32>
      %77 = arith.addf %72, %76 : vector<8x16xf32>
      %c3_i32 = arith.constant 3 : i32
      %78 = arith.addi %35, %c3_i32 : i32
      %c0_50 = arith.constant 0 : index
      %79 = arith.index_cast %78 : i32 to index
      %c0_51 = arith.constant 0 : index
      %c0_52 = arith.constant 0 : index
      %80 = vector.load %arg1[%c0_50, %79, %c0_51, %c0_52] : memref<1x18x9x16xbf16, #tpu.memory_space<vmem>>, vector<1x1x9x16xbf16>
      %81 = vector.shape_cast %80 : vector<1x1x9x16xbf16> to vector<9x16xbf16>
      %82 = vector.extract_strided_slice %81 {offsets = [0, 0], sizes = [8, 16], strides = [1, 1]} : vector<9x16xbf16> to vector<8x16xbf16>
      %c6 = arith.constant 6 : index
      %c0_53 = arith.constant 0 : index
      %c0_54 = arith.constant 0 : index
      %83 = vector.load %arg2[%c6, %c0_53, %c0_54] : memref<8x16x16xbf16, #tpu.memory_space<vmem>>, vector<1x16x16xbf16>
      %84 = vector.shape_cast %83 : vector<1x16x16xbf16> to vector<16x16xbf16>
      %cst_55 = arith.constant dense<0.000000e+00> : vector<8x16xf32>
      %85 = tpu.matmul %82, %84, %cst_55 {dimension_numbers = #tpu.dot_dimension_numbers<[1], [0], [0], [1], [0, 0, 1, 1], [], []>} : vector<8x16xbf16>, vector<16x16xbf16>, vector<8x16xf32> -> vector<8x16xf32>
      %86 = arith.addf %77, %85 : vector<8x16xf32>
      %87 = vector.extract_strided_slice %81 {offsets = [1, 0], sizes = [8, 16], strides = [1, 1]} : vector<9x16xbf16> to vector<8x16xbf16>
      %c7 = arith.constant 7 : index
      %c0_56 = arith.constant 0 : index
      %c0_57 = arith.constant 0 : index
      %88 = vector.load %arg2[%c7, %c0_56, %c0_57] : memref<8x16x16xbf16, #tpu.memory_space<vmem>>, vector<1x16x16xbf16>
      %89 = vector.shape_cast %88 : vector<1x16x16xbf16> to vector<16x16xbf16>
      %cst_58 = arith.constant dense<0.000000e+00> : vector<8x16xf32>
      %90 = tpu.matmul %87, %89, %cst_58 {dimension_numbers = #tpu.dot_dimension_numbers<[1], [0], [0], [1], [0, 0, 1, 1], [], []>} : vector<8x16xbf16>, vector<16x16xbf16>, vector<8x16xf32> -> vector<8x16xf32>
      %91 = arith.addf %86, %90 : vector<8x16xf32>
      %92 = vector.broadcast %0 : vector<1x16xf32> to vector<8x16xf32>
      %93 = arith.addf %91, %92 : vector<8x16xf32>
      %94 = arith.truncf %93 : vector<8x16xf32> to vector<8x16xbf16>
      %c0_59 = arith.constant 0 : index
      %95 = arith.index_cast %arg5 : i32 to index
      %c0_60 = arith.constant 0 : index
      %c0_61 = arith.constant 0 : index
      %96 = vector.load %arg4[%c0_59, %95, %c0_60, %c0_61] : memref<1x8x8x16xbf16, #tpu.memory_space<vmem>>, vector<1x1x8x16xbf16>
      %97 = vector.shape_cast %96 : vector<1x1x8x16xbf16> to vector<8x16xbf16>
      %98 = vector.shape_cast %94 : vector<8x16xbf16> to vector<1x1x8x16xbf16>
      tpu.vector_store %arg4[%c0_59, %95, %c0_60, %c0_61], %98 {strides = array<i32>} : memref<1x8x8x16xbf16, #tpu.memory_space<vmem>>, vector<1x1x8x16xbf16>,
    }
    %c8_i32_1 = arith.constant 8 : i32
    %c0_2 = arith.constant 0 : index
    %c0_3 = arith.constant 0 : index
    %c0_4 = arith.constant 0 : index
    %c0_5 = arith.constant 0 : index
    %2 = vector.load %arg4[%c0_2, %c0_3, %c0_4, %c0_5] : memref<1x8x8x16xbf16, #tpu.memory_space<vmem>>, vector<1x8x8x16xbf16>
    %3 = vector.shape_cast %2 : vector<1x8x8x16xbf16> to vector<8x8x16xbf16>
    %4 = arith.extf %3 : vector<8x8x16xbf16> to vector<8x8x16xf32>
    %cst = arith.constant dense<0.000000e+00> : vector<8x16xf32>
    %5 = vector.multi_reduction <add>, %4, %cst [1] : vector<8x8x16xf32> to vector<8x16xf32>
    %6 = vector.shape_cast %5 : vector<8x16xf32> to vector<8x1x16xf32>
    %cst_6 = arith.constant dense<0.000000e+00> : vector<1x16xf32>
    %7 = vector.multi_reduction <add>, %6, %cst_6 [0] : vector<8x1x16xf32> to vector<1x16xf32>
    %8 = vector.shape_cast %7 : vector<1x16xf32> to vector<1x1x16xf32>
    %cst_7 = arith.constant 1.562500e-02 : f32
    %9 = vector.broadcast %cst_7 : f32 to vector<1x1x16xf32>
    %10 = arith.mulf %8, %9 : vector<1x1x16xf32>
    %11 = vector.broadcast %10 : vector<1x1x16xf32> to vector<8x8x16xf32>
    %12 = arith.subf %4, %11 : vector<8x8x16xf32>
    %13 = arith.mulf %12, %12 : vector<8x8x16xf32>
    %cst_8 = arith.constant dense<0.000000e+00> : vector<8x16xf32>
    %14 = vector.multi_reduction <add>, %13, %cst_8 [1] : vector<8x8x16xf32> to vector<8x16xf32>
    %15 = vector.shape_cast %14 : vector<8x16xf32> to vector<8x1x16xf32>
    %cst_9 = arith.constant dense<0.000000e+00> : vector<1x16xf32>
    %16 = vector.multi_reduction <add>, %15, %cst_9 [0] : vector<8x1x16xf32> to vector<1x16xf32>
    %17 = vector.shape_cast %16 : vector<1x16xf32> to vector<1x1x16xf32>
    %cst_10 = arith.constant 1.562500e-02 : f32
    %18 = vector.broadcast %cst_10 : f32 to vector<1x1x16xf32>
    %19 = arith.mulf %17, %18 : vector<1x1x16xf32>
    %cst_11 = arith.constant 9.99999974E-6 : f32
    %20 = vector.broadcast %cst_11 : f32 to vector<1x1x16xf32>
    %21 = arith.addf %19, %20 : vector<1x1x16xf32>
    %22 = math.rsqrt %21 : vector<1x1x16xf32>
    %23 = vector.broadcast %22 : vector<1x1x16xf32> to vector<8x8x16xf32>
    %24 = arith.mulf %12, %23 : vector<8x8x16xf32>
    %cst_12 = arith.constant 0.000000e+00 : f32
    %25 = vector.broadcast %cst_12 : f32 to vector<8x8x16xf32>
    %26 = arith.cmpf oge, %24, %25 : vector<8x8x16xf32>
    %cst_13 = arith.constant 2.000000e-01 : f32
    %27 = vector.broadcast %cst_13 : f32 to vector<8x8x16xf32>
    %28 = arith.mulf %27, %24 : vector<8x8x16xf32>
    %29 = arith.select %26, %24, %28 : vector<8x8x16xi1>, vector<8x8x16xf32>
    %30 = arith.truncf %29 : vector<8x8x16xf32> to vector<8x8x16xbf16>
    %c0_14 = arith.constant 0 : index
    %c0_15 = arith.constant 0 : index
    %c0_16 = arith.constant 0 : index
    %c0_17 = arith.constant 0 : index
    %31 = vector.load %arg4[%c0_14, %c0_15, %c0_16, %c0_17] : memref<1x8x8x16xbf16, #tpu.memory_space<vmem>>, vector<1x8x8x16xbf16>
    %32 = vector.shape_cast %31 : vector<1x8x8x16xbf16> to vector<8x8x16xbf16>
    %33 = vector.shape_cast %30 : vector<8x8x16xbf16> to vector<1x8x8x16xbf16>
    tpu.vector_store %arg4[%c0_14, %c0_15, %c0_16, %c0_17], %33 {strides = array<i32>} : memref<1x8x8x16xbf16, #tpu.memory_space<vmem>>, vector<1x8x8x16xbf16>,
    return
  }
  func.func @transform_0(%arg0: i32) -> (i32, i32, i32, i32) {
    %c0_i32 = arith.constant 0 : i32
    %c0_i32_0 = arith.constant 0 : i32
    %c0_i32_1 = arith.constant 0 : i32
    %c0_i32_2 = arith.constant 0 : i32
    return %arg0, %c0_i32, %c0_i32_0, %c0_i32_1 : i32, i32, i32, i32
  }
  func.func @transform_1(%arg0: i32) -> (i32, i32, i32) {
    %c0_i32 = arith.constant 0 : i32
    %c0_i32_0 = arith.constant 0 : i32
    %c0_i32_1 = arith.constant 0 : i32
    %c0_i32_2 = arith.constant 0 : i32
    return %c0_i32, %c0_i32_0, %c0_i32_1 : i32, i32, i32
  }
  func.func @transform_2(%arg0: i32) -> (i32, i32) {
    %c0_i32 = arith.constant 0 : i32
    %c0_i32_0 = arith.constant 0 : i32
    %c0_i32_1 = arith.constant 0 : i32
    return %c0_i32, %c0_i32_0 : i32, i32
  }
  func.func @transform_3(%arg0: i32) -> (i32, i32, i32, i32) {
    %c0_i32 = arith.constant 0 : i32
    %c0_i32_0 = arith.constant 0 : i32
    %c0_i32_1 = arith.constant 0 : i32
    %c0_i32_2 = arith.constant 0 : i32
    return %arg0, %c0_i32, %c0_i32_0, %c0_i32_1 : i32, i32, i32, i32
  }
}

module attributes {stable_mosaic.version = 11 : i64} {
  func.func @_fused_conv_kernel(%arg0: i32, %arg1: memref<1x10x5x32xbf16, #tpu.memory_space<vmem>>, %arg2: memref<8x32x32xbf16, #tpu.memory_space<vmem>>, %arg3: memref<1x32xf32, #tpu.memory_space<vmem>>, %arg4: memref<1x4x4x32xbf16, #tpu.memory_space<vmem>>) attributes {dimension_semantics = [#tpu.dimension_semantics<parallel>], iteration_bounds = array<i64: 2>, scalar_prefetch = 0 : i64, scratch_operands = 0 : i64, tpu.core_type = #tpu.core_type<tc>, window_params = [{transform_indices = @transform_0, window_bounds = array<i64: 1, 10, 5, 32>}, {pipeline_mode = #tpu.pipeline_mode<synchronous>, transform_indices = @transform_1, window_bounds = array<i64: 8, 32, 32>}, {pipeline_mode = #tpu.pipeline_mode<synchronous>, transform_indices = @transform_2, window_bounds = array<i64: 1, 32>}, {transform_indices = @transform_3, window_bounds = array<i64: 1, 4, 4, 32>}]} {
    %c0 = arith.constant 0 : index
    %c0_0 = arith.constant 0 : index
    %0 = vector.load %arg3[%c0, %c0_0] : memref<1x32xf32, #tpu.memory_space<vmem>>, vector<1x32xf32>
    %c0_i32 = arith.constant 0 : i32
    %c4_i32 = arith.constant 4 : i32
    %1 = arith.addi %c0_i32, %c4_i32 : i32
    %c1_i32 = arith.constant 1 : i32
    scf.for %arg5 = %c0_i32 to %1 step %c1_i32  : i32 {
      %cst_18 = arith.constant 0.000000e+00 : f32
      %34 = vector.broadcast %cst_18 : f32 to vector<4x32xf32>
      %c2_i32 = arith.constant 2 : i32
      %35 = arith.muli %c2_i32, %arg5 : i32
      %c0_i32_19 = arith.constant 0 : i32
      %36 = arith.addi %35, %c0_i32_19 : i32
      %c0_20 = arith.constant 0 : index
      %37 = arith.index_cast %36 : i32 to index
      %c0_21 = arith.constant 0 : index
      %c0_22 = arith.constant 0 : index
      %38 = vector.load %arg1[%c0_20, %37, %c0_21, %c0_22] : memref<1x10x5x32xbf16, #tpu.memory_space<vmem>>, vector<1x1x5x32xbf16>
      %39 = vector.shape_cast %38 : vector<1x1x5x32xbf16> to vector<5x32xbf16>
      %40 = vector.extract_strided_slice %39 {offsets = [0, 0], sizes = [4, 32], strides = [1, 1]} : vector<5x32xbf16> to vector<4x32xbf16>
      %c0_23 = arith.constant 0 : index
      %c0_24 = arith.constant 0 : index
      %c0_25 = arith.constant 0 : index
      %41 = vector.load %arg2[%c0_23, %c0_24, %c0_25] : memref<8x32x32xbf16, #tpu.memory_space<vmem>>, vector<1x32x32xbf16>
      %42 = vector.shape_cast %41 : vector<1x32x32xbf16> to vector<32x32xbf16>
      %cst_26 = arith.constant dense<0.000000e+00> : vector<4x32xf32>
      %43 = tpu.matmul %40, %42, %cst_26 {dimension_numbers = #tpu.dot_dimension_numbers<[1], [0], [0], [1], [0, 0, 1, 1], [], []>} : vector<4x32xbf16>, vector<32x32xbf16>, vector<4x32xf32> -> vector<4x32xf32>
      %44 = arith.addf %34, %43 : vector<4x32xf32>
      %45 = vector.extract_strided_slice %39 {offsets = [1, 0], sizes = [4, 32], strides = [1, 1]} : vector<5x32xbf16> to vector<4x32xbf16>
      %c1 = arith.constant 1 : index
      %c0_27 = arith.constant 0 : index
      %c0_28 = arith.constant 0 : index
      %46 = vector.load %arg2[%c1, %c0_27, %c0_28] : memref<8x32x32xbf16, #tpu.memory_space<vmem>>, vector<1x32x32xbf16>
      %47 = vector.shape_cast %46 : vector<1x32x32xbf16> to vector<32x32xbf16>
      %cst_29 = arith.constant dense<0.000000e+00> : vector<4x32xf32>
      %48 = tpu.matmul %45, %47, %cst_29 {dimension_numbers = #tpu.dot_dimension_numbers<[1], [0], [0], [1], [0, 0, 1, 1], [], []>} : vector<4x32xbf16>, vector<32x32xbf16>, vector<4x32xf32> -> vector<4x32xf32>
      %49 = arith.addf %44, %48 : vector<4x32xf32>
      %c1_i32_30 = arith.constant 1 : i32
      %50 = arith.addi %35, %c1_i32_30 : i32
      %c0_31 = arith.constant 0 : index
      %51 = arith.index_cast %50 : i32 to index
      %c0_32 = arith.constant 0 : index
      %c0_33 = arith.constant 0 : index
      %52 = vector.load %arg1[%c0_31, %51, %c0_32, %c0_33] : memref<1x10x5x32xbf16, #tpu.memory_space<vmem>>, vector<1x1x5x32xbf16>
      %53 = vector.shape_cast %52 : vector<1x1x5x32xbf16> to vector<5x32xbf16>
      %54 = vector.extract_strided_slice %53 {offsets = [0, 0], sizes = [4, 32], strides = [1, 1]} : vector<5x32xbf16> to vector<4x32xbf16>
      %c2 = arith.constant 2 : index
      %c0_34 = arith.constant 0 : index
      %c0_35 = arith.constant 0 : index
      %55 = vector.load %arg2[%c2, %c0_34, %c0_35] : memref<8x32x32xbf16, #tpu.memory_space<vmem>>, vector<1x32x32xbf16>
      %56 = vector.shape_cast %55 : vector<1x32x32xbf16> to vector<32x32xbf16>
      %cst_36 = arith.constant dense<0.000000e+00> : vector<4x32xf32>
      %57 = tpu.matmul %54, %56, %cst_36 {dimension_numbers = #tpu.dot_dimension_numbers<[1], [0], [0], [1], [0, 0, 1, 1], [], []>} : vector<4x32xbf16>, vector<32x32xbf16>, vector<4x32xf32> -> vector<4x32xf32>
      %58 = arith.addf %49, %57 : vector<4x32xf32>
      %59 = vector.extract_strided_slice %53 {offsets = [1, 0], sizes = [4, 32], strides = [1, 1]} : vector<5x32xbf16> to vector<4x32xbf16>
      %c3 = arith.constant 3 : index
      %c0_37 = arith.constant 0 : index
      %c0_38 = arith.constant 0 : index
      %60 = vector.load %arg2[%c3, %c0_37, %c0_38] : memref<8x32x32xbf16, #tpu.memory_space<vmem>>, vector<1x32x32xbf16>
      %61 = vector.shape_cast %60 : vector<1x32x32xbf16> to vector<32x32xbf16>
      %cst_39 = arith.constant dense<0.000000e+00> : vector<4x32xf32>
      %62 = tpu.matmul %59, %61, %cst_39 {dimension_numbers = #tpu.dot_dimension_numbers<[1], [0], [0], [1], [0, 0, 1, 1], [], []>} : vector<4x32xbf16>, vector<32x32xbf16>, vector<4x32xf32> -> vector<4x32xf32>
      %63 = arith.addf %58, %62 : vector<4x32xf32>
      %c2_i32_40 = arith.constant 2 : i32
      %64 = arith.addi %35, %c2_i32_40 : i32
      %c0_41 = arith.constant 0 : index
      %65 = arith.index_cast %64 : i32 to index
      %c0_42 = arith.constant 0 : index
      %c0_43 = arith.constant 0 : index
      %66 = vector.load %arg1[%c0_41, %65, %c0_42, %c0_43] : memref<1x10x5x32xbf16, #tpu.memory_space<vmem>>, vector<1x1x5x32xbf16>
      %67 = vector.shape_cast %66 : vector<1x1x5x32xbf16> to vector<5x32xbf16>
      %68 = vector.extract_strided_slice %67 {offsets = [0, 0], sizes = [4, 32], strides = [1, 1]} : vector<5x32xbf16> to vector<4x32xbf16>
      %c4 = arith.constant 4 : index
      %c0_44 = arith.constant 0 : index
      %c0_45 = arith.constant 0 : index
      %69 = vector.load %arg2[%c4, %c0_44, %c0_45] : memref<8x32x32xbf16, #tpu.memory_space<vmem>>, vector<1x32x32xbf16>
      %70 = vector.shape_cast %69 : vector<1x32x32xbf16> to vector<32x32xbf16>
      %cst_46 = arith.constant dense<0.000000e+00> : vector<4x32xf32>
      %71 = tpu.matmul %68, %70, %cst_46 {dimension_numbers = #tpu.dot_dimension_numbers<[1], [0], [0], [1], [0, 0, 1, 1], [], []>} : vector<4x32xbf16>, vector<32x32xbf16>, vector<4x32xf32> -> vector<4x32xf32>
      %72 = arith.addf %63, %71 : vector<4x32xf32>
      %73 = vector.extract_strided_slice %67 {offsets = [1, 0], sizes = [4, 32], strides = [1, 1]} : vector<5x32xbf16> to vector<4x32xbf16>
      %c5 = arith.constant 5 : index
      %c0_47 = arith.constant 0 : index
      %c0_48 = arith.constant 0 : index
      %74 = vector.load %arg2[%c5, %c0_47, %c0_48] : memref<8x32x32xbf16, #tpu.memory_space<vmem>>, vector<1x32x32xbf16>
      %75 = vector.shape_cast %74 : vector<1x32x32xbf16> to vector<32x32xbf16>
      %cst_49 = arith.constant dense<0.000000e+00> : vector<4x32xf32>
      %76 = tpu.matmul %73, %75, %cst_49 {dimension_numbers = #tpu.dot_dimension_numbers<[1], [0], [0], [1], [0, 0, 1, 1], [], []>} : vector<4x32xbf16>, vector<32x32xbf16>, vector<4x32xf32> -> vector<4x32xf32>
      %77 = arith.addf %72, %76 : vector<4x32xf32>
      %c3_i32 = arith.constant 3 : i32
      %78 = arith.addi %35, %c3_i32 : i32
      %c0_50 = arith.constant 0 : index
      %79 = arith.index_cast %78 : i32 to index
      %c0_51 = arith.constant 0 : index
      %c0_52 = arith.constant 0 : index
      %80 = vector.load %arg1[%c0_50, %79, %c0_51, %c0_52] : memref<1x10x5x32xbf16, #tpu.memory_space<vmem>>, vector<1x1x5x32xbf16>
      %81 = vector.shape_cast %80 : vector<1x1x5x32xbf16> to vector<5x32xbf16>
      %82 = vector.extract_strided_slice %81 {offsets = [0, 0], sizes = [4, 32], strides = [1, 1]} : vector<5x32xbf16> to vector<4x32xbf16>
      %c6 = arith.constant 6 : index
      %c0_53 = arith.constant 0 : index
      %c0_54 = arith.constant 0 : index
      %83 = vector.load %arg2[%c6, %c0_53, %c0_54] : memref<8x32x32xbf16, #tpu.memory_space<vmem>>, vector<1x32x32xbf16>
      %84 = vector.shape_cast %83 : vector<1x32x32xbf16> to vector<32x32xbf16>
      %cst_55 = arith.constant dense<0.000000e+00> : vector<4x32xf32>
      %85 = tpu.matmul %82, %84, %cst_55 {dimension_numbers = #tpu.dot_dimension_numbers<[1], [0], [0], [1], [0, 0, 1, 1], [], []>} : vector<4x32xbf16>, vector<32x32xbf16>, vector<4x32xf32> -> vector<4x32xf32>
      %86 = arith.addf %77, %85 : vector<4x32xf32>
      %87 = vector.extract_strided_slice %81 {offsets = [1, 0], sizes = [4, 32], strides = [1, 1]} : vector<5x32xbf16> to vector<4x32xbf16>
      %c7 = arith.constant 7 : index
      %c0_56 = arith.constant 0 : index
      %c0_57 = arith.constant 0 : index
      %88 = vector.load %arg2[%c7, %c0_56, %c0_57] : memref<8x32x32xbf16, #tpu.memory_space<vmem>>, vector<1x32x32xbf16>
      %89 = vector.shape_cast %88 : vector<1x32x32xbf16> to vector<32x32xbf16>
      %cst_58 = arith.constant dense<0.000000e+00> : vector<4x32xf32>
      %90 = tpu.matmul %87, %89, %cst_58 {dimension_numbers = #tpu.dot_dimension_numbers<[1], [0], [0], [1], [0, 0, 1, 1], [], []>} : vector<4x32xbf16>, vector<32x32xbf16>, vector<4x32xf32> -> vector<4x32xf32>
      %91 = arith.addf %86, %90 : vector<4x32xf32>
      %92 = vector.broadcast %0 : vector<1x32xf32> to vector<4x32xf32>
      %93 = arith.addf %91, %92 : vector<4x32xf32>
      %94 = arith.truncf %93 : vector<4x32xf32> to vector<4x32xbf16>
      %c0_59 = arith.constant 0 : index
      %95 = arith.index_cast %arg5 : i32 to index
      %c0_60 = arith.constant 0 : index
      %c0_61 = arith.constant 0 : index
      %96 = vector.load %arg4[%c0_59, %95, %c0_60, %c0_61] : memref<1x4x4x32xbf16, #tpu.memory_space<vmem>>, vector<1x1x4x32xbf16>
      %97 = vector.shape_cast %96 : vector<1x1x4x32xbf16> to vector<4x32xbf16>
      %98 = vector.shape_cast %94 : vector<4x32xbf16> to vector<1x1x4x32xbf16>
      tpu.vector_store %arg4[%c0_59, %95, %c0_60, %c0_61], %98 {strides = array<i32>} : memref<1x4x4x32xbf16, #tpu.memory_space<vmem>>, vector<1x1x4x32xbf16>,
    }
    %c4_i32_1 = arith.constant 4 : i32
    %c0_2 = arith.constant 0 : index
    %c0_3 = arith.constant 0 : index
    %c0_4 = arith.constant 0 : index
    %c0_5 = arith.constant 0 : index
    %2 = vector.load %arg4[%c0_2, %c0_3, %c0_4, %c0_5] : memref<1x4x4x32xbf16, #tpu.memory_space<vmem>>, vector<1x4x4x32xbf16>
    %3 = vector.shape_cast %2 : vector<1x4x4x32xbf16> to vector<4x4x32xbf16>
    %4 = arith.extf %3 : vector<4x4x32xbf16> to vector<4x4x32xf32>
    %cst = arith.constant dense<0.000000e+00> : vector<4x32xf32>
    %5 = vector.multi_reduction <add>, %4, %cst [1] : vector<4x4x32xf32> to vector<4x32xf32>
    %6 = vector.shape_cast %5 : vector<4x32xf32> to vector<4x1x32xf32>
    %cst_6 = arith.constant dense<0.000000e+00> : vector<1x32xf32>
    %7 = vector.multi_reduction <add>, %6, %cst_6 [0] : vector<4x1x32xf32> to vector<1x32xf32>
    %8 = vector.shape_cast %7 : vector<1x32xf32> to vector<1x1x32xf32>
    %cst_7 = arith.constant 6.250000e-02 : f32
    %9 = vector.broadcast %cst_7 : f32 to vector<1x1x32xf32>
    %10 = arith.mulf %8, %9 : vector<1x1x32xf32>
    %11 = vector.broadcast %10 : vector<1x1x32xf32> to vector<4x4x32xf32>
    %12 = arith.subf %4, %11 : vector<4x4x32xf32>
    %13 = arith.mulf %12, %12 : vector<4x4x32xf32>
    %cst_8 = arith.constant dense<0.000000e+00> : vector<4x32xf32>
    %14 = vector.multi_reduction <add>, %13, %cst_8 [1] : vector<4x4x32xf32> to vector<4x32xf32>
    %15 = vector.shape_cast %14 : vector<4x32xf32> to vector<4x1x32xf32>
    %cst_9 = arith.constant dense<0.000000e+00> : vector<1x32xf32>
    %16 = vector.multi_reduction <add>, %15, %cst_9 [0] : vector<4x1x32xf32> to vector<1x32xf32>
    %17 = vector.shape_cast %16 : vector<1x32xf32> to vector<1x1x32xf32>
    %cst_10 = arith.constant 6.250000e-02 : f32
    %18 = vector.broadcast %cst_10 : f32 to vector<1x1x32xf32>
    %19 = arith.mulf %17, %18 : vector<1x1x32xf32>
    %cst_11 = arith.constant 9.99999974E-6 : f32
    %20 = vector.broadcast %cst_11 : f32 to vector<1x1x32xf32>
    %21 = arith.addf %19, %20 : vector<1x1x32xf32>
    %22 = math.rsqrt %21 : vector<1x1x32xf32>
    %23 = vector.broadcast %22 : vector<1x1x32xf32> to vector<4x4x32xf32>
    %24 = arith.mulf %12, %23 : vector<4x4x32xf32>
    %cst_12 = arith.constant 0.000000e+00 : f32
    %25 = vector.broadcast %cst_12 : f32 to vector<4x4x32xf32>
    %26 = arith.cmpf oge, %24, %25 : vector<4x4x32xf32>
    %cst_13 = arith.constant 2.000000e-01 : f32
    %27 = vector.broadcast %cst_13 : f32 to vector<4x4x32xf32>
    %28 = arith.mulf %27, %24 : vector<4x4x32xf32>
    %29 = arith.select %26, %24, %28 : vector<4x4x32xi1>, vector<4x4x32xf32>
    %30 = arith.truncf %29 : vector<4x4x32xf32> to vector<4x4x32xbf16>
    %c0_14 = arith.constant 0 : index
    %c0_15 = arith.constant 0 : index
    %c0_16 = arith.constant 0 : index
    %c0_17 = arith.constant 0 : index
    %31 = vector.load %arg4[%c0_14, %c0_15, %c0_16, %c0_17] : memref<1x4x4x32xbf16, #tpu.memory_space<vmem>>, vector<1x4x4x32xbf16>
    %32 = vector.shape_cast %31 : vector<1x4x4x32xbf16> to vector<4x4x32xbf16>
    %33 = vector.shape_cast %30 : vector<4x4x32xbf16> to vector<1x4x4x32xbf16>
    tpu.vector_store %arg4[%c0_14, %c0_15, %c0_16, %c0_17], %33 {strides = array<i32>} : memref<1x4x4x32xbf16, #tpu.memory_space<vmem>>, vector<1x4x4x32xbf16>,
    return
  }
  func.func @transform_0(%arg0: i32) -> (i32, i32, i32, i32) {
    %c0_i32 = arith.constant 0 : i32
    %c0_i32_0 = arith.constant 0 : i32
    %c0_i32_1 = arith.constant 0 : i32
    %c0_i32_2 = arith.constant 0 : i32
    return %arg0, %c0_i32, %c0_i32_0, %c0_i32_1 : i32, i32, i32, i32
  }
  func.func @transform_1(%arg0: i32) -> (i32, i32, i32) {
    %c0_i32 = arith.constant 0 : i32
    %c0_i32_0 = arith.constant 0 : i32
    %c0_i32_1 = arith.constant 0 : i32
    %c0_i32_2 = arith.constant 0 : i32
    return %c0_i32, %c0_i32_0, %c0_i32_1 : i32, i32, i32
  }
  func.func @transform_2(%arg0: i32) -> (i32, i32) {
    %c0_i32 = arith.constant 0 : i32
    %c0_i32_0 = arith.constant 0 : i32
    %c0_i32_1 = arith.constant 0 : i32
    return %c0_i32, %c0_i32_0 : i32, i32
  }
  func.func @transform_3(%arg0: i32) -> (i32, i32, i32, i32) {
    %c0_i32 = arith.constant 0 : i32
    %c0_i32_0 = arith.constant 0 : i32
    %c0_i32_1 = arith.constant 0 : i32
    %c0_i32_2 = arith.constant 0 : i32
    return %arg0, %c0_i32, %c0_i32_0, %c0_i32_1 : i32, i32, i32, i32
  }
}

module attributes {stable_mosaic.version = 11 : i64} {
  func.func @_fused_conv_kernel(%arg0: i32, %arg1: memref<1x6x8x32xbf16, #tpu.memory_space<vmem>>, %arg2: memref<16x32x64xbf16, #tpu.memory_space<vmem>>, %arg3: memref<1x64xf32, #tpu.memory_space<vmem>>, %arg4: memref<1x3x5x64xbf16, #tpu.memory_space<vmem>>) attributes {dimension_semantics = [#tpu.dimension_semantics<parallel>], iteration_bounds = array<i64: 2>, scalar_prefetch = 0 : i64, scratch_operands = 0 : i64, tpu.core_type = #tpu.core_type<tc>, window_params = [{transform_indices = @transform_0, window_bounds = array<i64: 1, 6, 8, 32>}, {pipeline_mode = #tpu.pipeline_mode<synchronous>, transform_indices = @transform_1, window_bounds = array<i64: 16, 32, 64>}, {pipeline_mode = #tpu.pipeline_mode<synchronous>, transform_indices = @transform_2, window_bounds = array<i64: 1, 64>}, {transform_indices = @transform_3, window_bounds = array<i64: 1, 3, 5, 64>}]} {
    %c0 = arith.constant 0 : index
    %c0_0 = arith.constant 0 : index
    %0 = vector.load %arg3[%c0, %c0_0] : memref<1x64xf32, #tpu.memory_space<vmem>>, vector<1x64xf32>
    %c0_i32 = arith.constant 0 : i32
    %c3_i32 = arith.constant 3 : i32
    %1 = arith.addi %c0_i32, %c3_i32 : i32
    %c1_i32 = arith.constant 1 : i32
    scf.for %arg5 = %c0_i32 to %1 step %c1_i32  : i32 {
      %cst_18 = arith.constant 0.000000e+00 : f32
      %34 = vector.broadcast %cst_18 : f32 to vector<5x64xf32>
      %c1_i32_19 = arith.constant 1 : i32
      %35 = arith.muli %c1_i32_19, %arg5 : i32
      %c0_i32_20 = arith.constant 0 : i32
      %36 = arith.addi %35, %c0_i32_20 : i32
      %c0_21 = arith.constant 0 : index
      %37 = arith.index_cast %36 : i32 to index
      %c0_22 = arith.constant 0 : index
      %c0_23 = arith.constant 0 : index
      %38 = vector.load %arg1[%c0_21, %37, %c0_22, %c0_23] : memref<1x6x8x32xbf16, #tpu.memory_space<vmem>>, vector<1x1x8x32xbf16>
      %39 = vector.shape_cast %38 : vector<1x1x8x32xbf16> to vector<8x32xbf16>
      %40 = vector.extract_strided_slice %39 {offsets = [0, 0], sizes = [5, 32], strides = [1, 1]} : vector<8x32xbf16> to vector<5x32xbf16>
      %c0_24 = arith.constant 0 : index
      %c0_25 = arith.constant 0 : index
      %c0_26 = arith.constant 0 : index
      %41 = vector.load %arg2[%c0_24, %c0_25, %c0_26] : memref<16x32x64xbf16, #tpu.memory_space<vmem>>, vector<1x32x64xbf16>
      %42 = vector.shape_cast %41 : vector<1x32x64xbf16> to vector<32x64xbf16>
      %cst_27 = arith.constant dense<0.000000e+00> : vector<5x64xf32>
      %43 = tpu.matmul %40, %42, %cst_27 {dimension_numbers = #tpu.dot_dimension_numbers<[1], [0], [0], [1], [0, 0, 1, 1], [], []>} : vector<5x32xbf16>, vector<32x64xbf16>, vector<5x64xf32> -> vector<5x64xf32>
      %44 = arith.addf %34, %43 : vector<5x64xf32>
      %45 = vector.extract_strided_slice %39 {offsets = [1, 0], sizes = [5, 32], strides = [1, 1]} : vector<8x32xbf16> to vector<5x32xbf16>
      %c1 = arith.constant 1 : index
      %c0_28 = arith.constant 0 : index
      %c0_29 = arith.constant 0 : index
      %46 = vector.load %arg2[%c1, %c0_28, %c0_29] : memref<16x32x64xbf16, #tpu.memory_space<vmem>>, vector<1x32x64xbf16>
      %47 = vector.shape_cast %46 : vector<1x32x64xbf16> to vector<32x64xbf16>
      %cst_30 = arith.constant dense<0.000000e+00> : vector<5x64xf32>
      %48 = tpu.matmul %45, %47, %cst_30 {dimension_numbers = #tpu.dot_dimension_numbers<[1], [0], [0], [1], [0, 0, 1, 1], [], []>} : vector<5x32xbf16>, vector<32x64xbf16>, vector<5x64xf32> -> vector<5x64xf32>
      %49 = arith.addf %44, %48 : vector<5x64xf32>
      %50 = vector.extract_strided_slice %39 {offsets = [2, 0], sizes = [5, 32], strides = [1, 1]} : vector<8x32xbf16> to vector<5x32xbf16>
      %c2 = arith.constant 2 : index
      %c0_31 = arith.constant 0 : index
      %c0_32 = arith.constant 0 : index
      %51 = vector.load %arg2[%c2, %c0_31, %c0_32] : memref<16x32x64xbf16, #tpu.memory_space<vmem>>, vector<1x32x64xbf16>
      %52 = vector.shape_cast %51 : vector<1x32x64xbf16> to vector<32x64xbf16>
      %cst_33 = arith.constant dense<0.000000e+00> : vector<5x64xf32>
      %53 = tpu.matmul %50, %52, %cst_33 {dimension_numbers = #tpu.dot_dimension_numbers<[1], [0], [0], [1], [0, 0, 1, 1], [], []>} : vector<5x32xbf16>, vector<32x64xbf16>, vector<5x64xf32> -> vector<5x64xf32>
      %54 = arith.addf %49, %53 : vector<5x64xf32>
      %55 = vector.extract_strided_slice %39 {offsets = [3, 0], sizes = [5, 32], strides = [1, 1]} : vector<8x32xbf16> to vector<5x32xbf16>
      %c3 = arith.constant 3 : index
      %c0_34 = arith.constant 0 : index
      %c0_35 = arith.constant 0 : index
      %56 = vector.load %arg2[%c3, %c0_34, %c0_35] : memref<16x32x64xbf16, #tpu.memory_space<vmem>>, vector<1x32x64xbf16>
      %57 = vector.shape_cast %56 : vector<1x32x64xbf16> to vector<32x64xbf16>
      %cst_36 = arith.constant dense<0.000000e+00> : vector<5x64xf32>
      %58 = tpu.matmul %55, %57, %cst_36 {dimension_numbers = #tpu.dot_dimension_numbers<[1], [0], [0], [1], [0, 0, 1, 1], [], []>} : vector<5x32xbf16>, vector<32x64xbf16>, vector<5x64xf32> -> vector<5x64xf32>
      %59 = arith.addf %54, %58 : vector<5x64xf32>
      %c1_i32_37 = arith.constant 1 : i32
      %60 = arith.addi %35, %c1_i32_37 : i32
      %c0_38 = arith.constant 0 : index
      %61 = arith.index_cast %60 : i32 to index
      %c0_39 = arith.constant 0 : index
      %c0_40 = arith.constant 0 : index
      %62 = vector.load %arg1[%c0_38, %61, %c0_39, %c0_40] : memref<1x6x8x32xbf16, #tpu.memory_space<vmem>>, vector<1x1x8x32xbf16>
      %63 = vector.shape_cast %62 : vector<1x1x8x32xbf16> to vector<8x32xbf16>
      %64 = vector.extract_strided_slice %63 {offsets = [0, 0], sizes = [5, 32], strides = [1, 1]} : vector<8x32xbf16> to vector<5x32xbf16>
      %c4 = arith.constant 4 : index
      %c0_41 = arith.constant 0 : index
      %c0_42 = arith.constant 0 : index
      %65 = vector.load %arg2[%c4, %c0_41, %c0_42] : memref<16x32x64xbf16, #tpu.memory_space<vmem>>, vector<1x32x64xbf16>
      %66 = vector.shape_cast %65 : vector<1x32x64xbf16> to vector<32x64xbf16>
      %cst_43 = arith.constant dense<0.000000e+00> : vector<5x64xf32>
      %67 = tpu.matmul %64, %66, %cst_43 {dimension_numbers = #tpu.dot_dimension_numbers<[1], [0], [0], [1], [0, 0, 1, 1], [], []>} : vector<5x32xbf16>, vector<32x64xbf16>, vector<5x64xf32> -> vector<5x64xf32>
      %68 = arith.addf %59, %67 : vector<5x64xf32>
      %69 = vector.extract_strided_slice %63 {offsets = [1, 0], sizes = [5, 32], strides = [1, 1]} : vector<8x32xbf16> to vector<5x32xbf16>
      %c5 = arith.constant 5 : index
      %c0_44 = arith.constant 0 : index
      %c0_45 = arith.constant 0 : index
      %70 = vector.load %arg2[%c5, %c0_44, %c0_45] : memref<16x32x64xbf16, #tpu.memory_space<vmem>>, vector<1x32x64xbf16>
      %71 = vector.shape_cast %70 : vector<1x32x64xbf16> to vector<32x64xbf16>
      %cst_46 = arith.constant dense<0.000000e+00> : vector<5x64xf32>
      %72 = tpu.matmul %69, %71, %cst_46 {dimension_numbers = #tpu.dot_dimension_numbers<[1], [0], [0], [1], [0, 0, 1, 1], [], []>} : vector<5x32xbf16>, vector<32x64xbf16>, vector<5x64xf32> -> vector<5x64xf32>
      %73 = arith.addf %68, %72 : vector<5x64xf32>
      %74 = vector.extract_strided_slice %63 {offsets = [2, 0], sizes = [5, 32], strides = [1, 1]} : vector<8x32xbf16> to vector<5x32xbf16>
      %c6 = arith.constant 6 : index
      %c0_47 = arith.constant 0 : index
      %c0_48 = arith.constant 0 : index
      %75 = vector.load %arg2[%c6, %c0_47, %c0_48] : memref<16x32x64xbf16, #tpu.memory_space<vmem>>, vector<1x32x64xbf16>
      %76 = vector.shape_cast %75 : vector<1x32x64xbf16> to vector<32x64xbf16>
      %cst_49 = arith.constant dense<0.000000e+00> : vector<5x64xf32>
      %77 = tpu.matmul %74, %76, %cst_49 {dimension_numbers = #tpu.dot_dimension_numbers<[1], [0], [0], [1], [0, 0, 1, 1], [], []>} : vector<5x32xbf16>, vector<32x64xbf16>, vector<5x64xf32> -> vector<5x64xf32>
      %78 = arith.addf %73, %77 : vector<5x64xf32>
      %79 = vector.extract_strided_slice %63 {offsets = [3, 0], sizes = [5, 32], strides = [1, 1]} : vector<8x32xbf16> to vector<5x32xbf16>
      %c7 = arith.constant 7 : index
      %c0_50 = arith.constant 0 : index
      %c0_51 = arith.constant 0 : index
      %80 = vector.load %arg2[%c7, %c0_50, %c0_51] : memref<16x32x64xbf16, #tpu.memory_space<vmem>>, vector<1x32x64xbf16>
      %81 = vector.shape_cast %80 : vector<1x32x64xbf16> to vector<32x64xbf16>
      %cst_52 = arith.constant dense<0.000000e+00> : vector<5x64xf32>
      %82 = tpu.matmul %79, %81, %cst_52 {dimension_numbers = #tpu.dot_dimension_numbers<[1], [0], [0], [1], [0, 0, 1, 1], [], []>} : vector<5x32xbf16>, vector<32x64xbf16>, vector<5x64xf32> -> vector<5x64xf32>
      %83 = arith.addf %78, %82 : vector<5x64xf32>
      %c2_i32 = arith.constant 2 : i32
      %84 = arith.addi %35, %c2_i32 : i32
      %c0_53 = arith.constant 0 : index
      %85 = arith.index_cast %84 : i32 to index
      %c0_54 = arith.constant 0 : index
      %c0_55 = arith.constant 0 : index
      %86 = vector.load %arg1[%c0_53, %85, %c0_54, %c0_55] : memref<1x6x8x32xbf16, #tpu.memory_space<vmem>>, vector<1x1x8x32xbf16>
      %87 = vector.shape_cast %86 : vector<1x1x8x32xbf16> to vector<8x32xbf16>
      %88 = vector.extract_strided_slice %87 {offsets = [0, 0], sizes = [5, 32], strides = [1, 1]} : vector<8x32xbf16> to vector<5x32xbf16>
      %c8 = arith.constant 8 : index
      %c0_56 = arith.constant 0 : index
      %c0_57 = arith.constant 0 : index
      %89 = vector.load %arg2[%c8, %c0_56, %c0_57] : memref<16x32x64xbf16, #tpu.memory_space<vmem>>, vector<1x32x64xbf16>
      %90 = vector.shape_cast %89 : vector<1x32x64xbf16> to vector<32x64xbf16>
      %cst_58 = arith.constant dense<0.000000e+00> : vector<5x64xf32>
      %91 = tpu.matmul %88, %90, %cst_58 {dimension_numbers = #tpu.dot_dimension_numbers<[1], [0], [0], [1], [0, 0, 1, 1], [], []>} : vector<5x32xbf16>, vector<32x64xbf16>, vector<5x64xf32> -> vector<5x64xf32>
      %92 = arith.addf %83, %91 : vector<5x64xf32>
      %93 = vector.extract_strided_slice %87 {offsets = [1, 0], sizes = [5, 32], strides = [1, 1]} : vector<8x32xbf16> to vector<5x32xbf16>
      %c9 = arith.constant 9 : index
      %c0_59 = arith.constant 0 : index
      %c0_60 = arith.constant 0 : index
      %94 = vector.load %arg2[%c9, %c0_59, %c0_60] : memref<16x32x64xbf16, #tpu.memory_space<vmem>>, vector<1x32x64xbf16>
      %95 = vector.shape_cast %94 : vector<1x32x64xbf16> to vector<32x64xbf16>
      %cst_61 = arith.constant dense<0.000000e+00> : vector<5x64xf32>
      %96 = tpu.matmul %93, %95, %cst_61 {dimension_numbers = #tpu.dot_dimension_numbers<[1], [0], [0], [1], [0, 0, 1, 1], [], []>} : vector<5x32xbf16>, vector<32x64xbf16>, vector<5x64xf32> -> vector<5x64xf32>
      %97 = arith.addf %92, %96 : vector<5x64xf32>
      %98 = vector.extract_strided_slice %87 {offsets = [2, 0], sizes = [5, 32], strides = [1, 1]} : vector<8x32xbf16> to vector<5x32xbf16>
      %c10 = arith.constant 10 : index
      %c0_62 = arith.constant 0 : index
      %c0_63 = arith.constant 0 : index
      %99 = vector.load %arg2[%c10, %c0_62, %c0_63] : memref<16x32x64xbf16, #tpu.memory_space<vmem>>, vector<1x32x64xbf16>
      %100 = vector.shape_cast %99 : vector<1x32x64xbf16> to vector<32x64xbf16>
      %cst_64 = arith.constant dense<0.000000e+00> : vector<5x64xf32>
      %101 = tpu.matmul %98, %100, %cst_64 {dimension_numbers = #tpu.dot_dimension_numbers<[1], [0], [0], [1], [0, 0, 1, 1], [], []>} : vector<5x32xbf16>, vector<32x64xbf16>, vector<5x64xf32> -> vector<5x64xf32>
      %102 = arith.addf %97, %101 : vector<5x64xf32>
      %103 = vector.extract_strided_slice %87 {offsets = [3, 0], sizes = [5, 32], strides = [1, 1]} : vector<8x32xbf16> to vector<5x32xbf16>
      %c11 = arith.constant 11 : index
      %c0_65 = arith.constant 0 : index
      %c0_66 = arith.constant 0 : index
      %104 = vector.load %arg2[%c11, %c0_65, %c0_66] : memref<16x32x64xbf16, #tpu.memory_space<vmem>>, vector<1x32x64xbf16>
      %105 = vector.shape_cast %104 : vector<1x32x64xbf16> to vector<32x64xbf16>
      %cst_67 = arith.constant dense<0.000000e+00> : vector<5x64xf32>
      %106 = tpu.matmul %103, %105, %cst_67 {dimension_numbers = #tpu.dot_dimension_numbers<[1], [0], [0], [1], [0, 0, 1, 1], [], []>} : vector<5x32xbf16>, vector<32x64xbf16>, vector<5x64xf32> -> vector<5x64xf32>
      %107 = arith.addf %102, %106 : vector<5x64xf32>
      %c3_i32_68 = arith.constant 3 : i32
      %108 = arith.addi %35, %c3_i32_68 : i32
      %c0_69 = arith.constant 0 : index
      %109 = arith.index_cast %108 : i32 to index
      %c0_70 = arith.constant 0 : index
      %c0_71 = arith.constant 0 : index
      %110 = vector.load %arg1[%c0_69, %109, %c0_70, %c0_71] : memref<1x6x8x32xbf16, #tpu.memory_space<vmem>>, vector<1x1x8x32xbf16>
      %111 = vector.shape_cast %110 : vector<1x1x8x32xbf16> to vector<8x32xbf16>
      %112 = vector.extract_strided_slice %111 {offsets = [0, 0], sizes = [5, 32], strides = [1, 1]} : vector<8x32xbf16> to vector<5x32xbf16>
      %c12 = arith.constant 12 : index
      %c0_72 = arith.constant 0 : index
      %c0_73 = arith.constant 0 : index
      %113 = vector.load %arg2[%c12, %c0_72, %c0_73] : memref<16x32x64xbf16, #tpu.memory_space<vmem>>, vector<1x32x64xbf16>
      %114 = vector.shape_cast %113 : vector<1x32x64xbf16> to vector<32x64xbf16>
      %cst_74 = arith.constant dense<0.000000e+00> : vector<5x64xf32>
      %115 = tpu.matmul %112, %114, %cst_74 {dimension_numbers = #tpu.dot_dimension_numbers<[1], [0], [0], [1], [0, 0, 1, 1], [], []>} : vector<5x32xbf16>, vector<32x64xbf16>, vector<5x64xf32> -> vector<5x64xf32>
      %116 = arith.addf %107, %115 : vector<5x64xf32>
      %117 = vector.extract_strided_slice %111 {offsets = [1, 0], sizes = [5, 32], strides = [1, 1]} : vector<8x32xbf16> to vector<5x32xbf16>
      %c13 = arith.constant 13 : index
      %c0_75 = arith.constant 0 : index
      %c0_76 = arith.constant 0 : index
      %118 = vector.load %arg2[%c13, %c0_75, %c0_76] : memref<16x32x64xbf16, #tpu.memory_space<vmem>>, vector<1x32x64xbf16>
      %119 = vector.shape_cast %118 : vector<1x32x64xbf16> to vector<32x64xbf16>
      %cst_77 = arith.constant dense<0.000000e+00> : vector<5x64xf32>
      %120 = tpu.matmul %117, %119, %cst_77 {dimension_numbers = #tpu.dot_dimension_numbers<[1], [0], [0], [1], [0, 0, 1, 1], [], []>} : vector<5x32xbf16>, vector<32x64xbf16>, vector<5x64xf32> -> vector<5x64xf32>
      %121 = arith.addf %116, %120 : vector<5x64xf32>
      %122 = vector.extract_strided_slice %111 {offsets = [2, 0], sizes = [5, 32], strides = [1, 1]} : vector<8x32xbf16> to vector<5x32xbf16>
      %c14 = arith.constant 14 : index
      %c0_78 = arith.constant 0 : index
      %c0_79 = arith.constant 0 : index
      %123 = vector.load %arg2[%c14, %c0_78, %c0_79] : memref<16x32x64xbf16, #tpu.memory_space<vmem>>, vector<1x32x64xbf16>
      %124 = vector.shape_cast %123 : vector<1x32x64xbf16> to vector<32x64xbf16>
      %cst_80 = arith.constant dense<0.000000e+00> : vector<5x64xf32>
      %125 = tpu.matmul %122, %124, %cst_80 {dimension_numbers = #tpu.dot_dimension_numbers<[1], [0], [0], [1], [0, 0, 1, 1], [], []>} : vector<5x32xbf16>, vector<32x64xbf16>, vector<5x64xf32> -> vector<5x64xf32>
      %126 = arith.addf %121, %125 : vector<5x64xf32>
      %127 = vector.extract_strided_slice %111 {offsets = [3, 0], sizes = [5, 32], strides = [1, 1]} : vector<8x32xbf16> to vector<5x32xbf16>
      %c15 = arith.constant 15 : index
      %c0_81 = arith.constant 0 : index
      %c0_82 = arith.constant 0 : index
      %128 = vector.load %arg2[%c15, %c0_81, %c0_82] : memref<16x32x64xbf16, #tpu.memory_space<vmem>>, vector<1x32x64xbf16>
      %129 = vector.shape_cast %128 : vector<1x32x64xbf16> to vector<32x64xbf16>
      %cst_83 = arith.constant dense<0.000000e+00> : vector<5x64xf32>
      %130 = tpu.matmul %127, %129, %cst_83 {dimension_numbers = #tpu.dot_dimension_numbers<[1], [0], [0], [1], [0, 0, 1, 1], [], []>} : vector<5x32xbf16>, vector<32x64xbf16>, vector<5x64xf32> -> vector<5x64xf32>
      %131 = arith.addf %126, %130 : vector<5x64xf32>
      %132 = vector.broadcast %0 : vector<1x64xf32> to vector<5x64xf32>
      %133 = arith.addf %131, %132 : vector<5x64xf32>
      %134 = arith.truncf %133 : vector<5x64xf32> to vector<5x64xbf16>
      %c0_84 = arith.constant 0 : index
      %135 = arith.index_cast %arg5 : i32 to index
      %c0_85 = arith.constant 0 : index
      %c0_86 = arith.constant 0 : index
      %136 = vector.load %arg4[%c0_84, %135, %c0_85, %c0_86] : memref<1x3x5x64xbf16, #tpu.memory_space<vmem>>, vector<1x1x5x64xbf16>
      %137 = vector.shape_cast %136 : vector<1x1x5x64xbf16> to vector<5x64xbf16>
      %138 = vector.shape_cast %134 : vector<5x64xbf16> to vector<1x1x5x64xbf16>
      tpu.vector_store %arg4[%c0_84, %135, %c0_85, %c0_86], %138 {strides = array<i32>} : memref<1x3x5x64xbf16, #tpu.memory_space<vmem>>, vector<1x1x5x64xbf16>,
    }
    %c3_i32_1 = arith.constant 3 : i32
    %c0_2 = arith.constant 0 : index
    %c0_3 = arith.constant 0 : index
    %c0_4 = arith.constant 0 : index
    %c0_5 = arith.constant 0 : index
    %2 = vector.load %arg4[%c0_2, %c0_3, %c0_4, %c0_5] : memref<1x3x5x64xbf16, #tpu.memory_space<vmem>>, vector<1x3x5x64xbf16>
    %3 = vector.shape_cast %2 : vector<1x3x5x64xbf16> to vector<3x5x64xbf16>
    %4 = arith.extf %3 : vector<3x5x64xbf16> to vector<3x5x64xf32>
    %cst = arith.constant dense<0.000000e+00> : vector<3x64xf32>
    %5 = vector.multi_reduction <add>, %4, %cst [1] : vector<3x5x64xf32> to vector<3x64xf32>
    %6 = vector.shape_cast %5 : vector<3x64xf32> to vector<3x1x64xf32>
    %cst_6 = arith.constant dense<0.000000e+00> : vector<1x64xf32>
    %7 = vector.multi_reduction <add>, %6, %cst_6 [0] : vector<3x1x64xf32> to vector<1x64xf32>
    %8 = vector.shape_cast %7 : vector<1x64xf32> to vector<1x1x64xf32>
    %cst_7 = arith.constant 0.0666666701 : f32
    %9 = vector.broadcast %cst_7 : f32 to vector<1x1x64xf32>
    %10 = arith.mulf %8, %9 : vector<1x1x64xf32>
    %11 = vector.broadcast %10 : vector<1x1x64xf32> to vector<3x5x64xf32>
    %12 = arith.subf %4, %11 : vector<3x5x64xf32>
    %13 = arith.mulf %12, %12 : vector<3x5x64xf32>
    %cst_8 = arith.constant dense<0.000000e+00> : vector<3x64xf32>
    %14 = vector.multi_reduction <add>, %13, %cst_8 [1] : vector<3x5x64xf32> to vector<3x64xf32>
    %15 = vector.shape_cast %14 : vector<3x64xf32> to vector<3x1x64xf32>
    %cst_9 = arith.constant dense<0.000000e+00> : vector<1x64xf32>
    %16 = vector.multi_reduction <add>, %15, %cst_9 [0] : vector<3x1x64xf32> to vector<1x64xf32>
    %17 = vector.shape_cast %16 : vector<1x64xf32> to vector<1x1x64xf32>
    %cst_10 = arith.constant 0.0666666701 : f32
    %18 = vector.broadcast %cst_10 : f32 to vector<1x1x64xf32>
    %19 = arith.mulf %17, %18 : vector<1x1x64xf32>
    %cst_11 = arith.constant 9.99999974E-6 : f32
    %20 = vector.broadcast %cst_11 : f32 to vector<1x1x64xf32>
    %21 = arith.addf %19, %20 : vector<1x1x64xf32>
    %22 = math.rsqrt %21 : vector<1x1x64xf32>
    %23 = vector.broadcast %22 : vector<1x1x64xf32> to vector<3x5x64xf32>
    %24 = arith.mulf %12, %23 : vector<3x5x64xf32>
    %cst_12 = arith.constant 0.000000e+00 : f32
    %25 = vector.broadcast %cst_12 : f32 to vector<3x5x64xf32>
    %26 = arith.cmpf oge, %24, %25 : vector<3x5x64xf32>
    %cst_13 = arith.constant 2.000000e-01 : f32
    %27 = vector.broadcast %cst_13 : f32 to vector<3x5x64xf32>
    %28 = arith.mulf %27, %24 : vector<3x5x64xf32>
    %29 = arith.select %26, %24, %28 : vector<3x5x64xi1>, vector<3x5x64xf32>
    %30 = arith.truncf %29 : vector<3x5x64xf32> to vector<3x5x64xbf16>
    %c0_14 = arith.constant 0 : index
    %c0_15 = arith.constant 0 : index
    %c0_16 = arith.constant 0 : index
    %c0_17 = arith.constant 0 : index
    %31 = vector.load %arg4[%c0_14, %c0_15, %c0_16, %c0_17] : memref<1x3x5x64xbf16, #tpu.memory_space<vmem>>, vector<1x3x5x64xbf16>
    %32 = vector.shape_cast %31 : vector<1x3x5x64xbf16> to vector<3x5x64xbf16>
    %33 = vector.shape_cast %30 : vector<3x5x64xbf16> to vector<1x3x5x64xbf16>
    tpu.vector_store %arg4[%c0_14, %c0_15, %c0_16, %c0_17], %33 {strides = array<i32>} : memref<1x3x5x64xbf16, #tpu.memory_space<vmem>>, vector<1x3x5x64xbf16>,
    return
  }
  func.func @transform_0(%arg0: i32) -> (i32, i32, i32, i32) {
    %c0_i32 = arith.constant 0 : i32
    %c0_i32_0 = arith.constant 0 : i32
    %c0_i32_1 = arith.constant 0 : i32
    %c0_i32_2 = arith.constant 0 : i32
    return %arg0, %c0_i32, %c0_i32_0, %c0_i32_1 : i32, i32, i32, i32
  }
  func.func @transform_1(%arg0: i32) -> (i32, i32, i32) {
    %c0_i32 = arith.constant 0 : i32
    %c0_i32_0 = arith.constant 0 : i32
    %c0_i32_1 = arith.constant 0 : i32
    %c0_i32_2 = arith.constant 0 : i32
    return %c0_i32, %c0_i32_0, %c0_i32_1 : i32, i32, i32
  }
  func.func @transform_2(%arg0: i32) -> (i32, i32) {
    %c0_i32 = arith.constant 0 : i32
    %c0_i32_0 = arith.constant 0 : i32
    %c0_i32_1 = arith.constant 0 : i32
    return %c0_i32, %c0_i32_0 : i32, i32
  }
  func.func @transform_3(%arg0: i32) -> (i32, i32, i32, i32) {
    %c0_i32 = arith.constant 0 : i32
    %c0_i32_0 = arith.constant 0 : i32
    %c0_i32_1 = arith.constant 0 : i32
    %c0_i32_2 = arith.constant 0 : i32
    return %arg0, %c0_i32, %c0_i32_0, %c0_i32_1 : i32, i32, i32, i32
  }
}

module attributes {stable_mosaic.version = 11 : i64} {
  func.func @_fused_conv_kernel(%arg0: i32, %arg1: memref<1x7x7x64xbf16, #tpu.memory_space<vmem>>, %arg2: memref<16x64x8xbf16, #tpu.memory_space<vmem>>, %arg3: memref<1x8xf32, #tpu.memory_space<vmem>>, %arg4: memref<1x4x4x8xf32, #tpu.memory_space<vmem>>) attributes {dimension_semantics = [#tpu.dimension_semantics<parallel>], iteration_bounds = array<i64: 2>, scalar_prefetch = 0 : i64, scratch_operands = 0 : i64, tpu.core_type = #tpu.core_type<tc>, window_params = [{transform_indices = @transform_0, window_bounds = array<i64: 1, 7, 7, 64>}, {pipeline_mode = #tpu.pipeline_mode<synchronous>, transform_indices = @transform_1, window_bounds = array<i64: 16, 64, 8>}, {pipeline_mode = #tpu.pipeline_mode<synchronous>, transform_indices = @transform_2, window_bounds = array<i64: 1, 8>}, {transform_indices = @transform_3, window_bounds = array<i64: 1, 4, 4, 8>}]} {
    %c0 = arith.constant 0 : index
    %c0_0 = arith.constant 0 : index
    %0 = vector.load %arg3[%c0, %c0_0] : memref<1x8xf32, #tpu.memory_space<vmem>>, vector<1x8xf32>
    %c0_i32 = arith.constant 0 : i32
    %c4_i32 = arith.constant 4 : i32
    %1 = arith.addi %c0_i32, %c4_i32 : i32
    %c1_i32 = arith.constant 1 : i32
    scf.for %arg5 = %c0_i32 to %1 step %c1_i32  : i32 {
      %cst = arith.constant 0.000000e+00 : f32
      %2 = vector.broadcast %cst : f32 to vector<4x8xf32>
      %c1_i32_2 = arith.constant 1 : i32
      %3 = arith.muli %c1_i32_2, %arg5 : i32
      %c0_i32_3 = arith.constant 0 : i32
      %4 = arith.addi %3, %c0_i32_3 : i32
      %c0_4 = arith.constant 0 : index
      %5 = arith.index_cast %4 : i32 to index
      %c0_5 = arith.constant 0 : index
      %c0_6 = arith.constant 0 : index
      %6 = vector.load %arg1[%c0_4, %5, %c0_5, %c0_6] : memref<1x7x7x64xbf16, #tpu.memory_space<vmem>>, vector<1x1x7x64xbf16>
      %7 = vector.shape_cast %6 : vector<1x1x7x64xbf16> to vector<7x64xbf16>
      %8 = vector.extract_strided_slice %7 {offsets = [0, 0], sizes = [4, 64], strides = [1, 1]} : vector<7x64xbf16> to vector<4x64xbf16>
      %c0_7 = arith.constant 0 : index
      %c0_8 = arith.constant 0 : index
      %c0_9 = arith.constant 0 : index
      %9 = vector.load %arg2[%c0_7, %c0_8, %c0_9] : memref<16x64x8xbf16, #tpu.memory_space<vmem>>, vector<1x64x8xbf16>
      %10 = vector.shape_cast %9 : vector<1x64x8xbf16> to vector<64x8xbf16>
      %cst_10 = arith.constant dense<0.000000e+00> : vector<4x8xf32>
      %11 = tpu.matmul %8, %10, %cst_10 {dimension_numbers = #tpu.dot_dimension_numbers<[1], [0], [0], [1], [0, 0, 1, 1], [], []>} : vector<4x64xbf16>, vector<64x8xbf16>, vector<4x8xf32> -> vector<4x8xf32>
      %12 = arith.addf %2, %11 : vector<4x8xf32>
      %13 = vector.extract_strided_slice %7 {offsets = [1, 0], sizes = [4, 64], strides = [1, 1]} : vector<7x64xbf16> to vector<4x64xbf16>
      %c1 = arith.constant 1 : index
      %c0_11 = arith.constant 0 : index
      %c0_12 = arith.constant 0 : index
      %14 = vector.load %arg2[%c1, %c0_11, %c0_12] : memref<16x64x8xbf16, #tpu.memory_space<vmem>>, vector<1x64x8xbf16>
      %15 = vector.shape_cast %14 : vector<1x64x8xbf16> to vector<64x8xbf16>
      %cst_13 = arith.constant dense<0.000000e+00> : vector<4x8xf32>
      %16 = tpu.matmul %13, %15, %cst_13 {dimension_numbers = #tpu.dot_dimension_numbers<[1], [0], [0], [1], [0, 0, 1, 1], [], []>} : vector<4x64xbf16>, vector<64x8xbf16>, vector<4x8xf32> -> vector<4x8xf32>
      %17 = arith.addf %12, %16 : vector<4x8xf32>
      %18 = vector.extract_strided_slice %7 {offsets = [2, 0], sizes = [4, 64], strides = [1, 1]} : vector<7x64xbf16> to vector<4x64xbf16>
      %c2 = arith.constant 2 : index
      %c0_14 = arith.constant 0 : index
      %c0_15 = arith.constant 0 : index
      %19 = vector.load %arg2[%c2, %c0_14, %c0_15] : memref<16x64x8xbf16, #tpu.memory_space<vmem>>, vector<1x64x8xbf16>
      %20 = vector.shape_cast %19 : vector<1x64x8xbf16> to vector<64x8xbf16>
      %cst_16 = arith.constant dense<0.000000e+00> : vector<4x8xf32>
      %21 = tpu.matmul %18, %20, %cst_16 {dimension_numbers = #tpu.dot_dimension_numbers<[1], [0], [0], [1], [0, 0, 1, 1], [], []>} : vector<4x64xbf16>, vector<64x8xbf16>, vector<4x8xf32> -> vector<4x8xf32>
      %22 = arith.addf %17, %21 : vector<4x8xf32>
      %23 = vector.extract_strided_slice %7 {offsets = [3, 0], sizes = [4, 64], strides = [1, 1]} : vector<7x64xbf16> to vector<4x64xbf16>
      %c3 = arith.constant 3 : index
      %c0_17 = arith.constant 0 : index
      %c0_18 = arith.constant 0 : index
      %24 = vector.load %arg2[%c3, %c0_17, %c0_18] : memref<16x64x8xbf16, #tpu.memory_space<vmem>>, vector<1x64x8xbf16>
      %25 = vector.shape_cast %24 : vector<1x64x8xbf16> to vector<64x8xbf16>
      %cst_19 = arith.constant dense<0.000000e+00> : vector<4x8xf32>
      %26 = tpu.matmul %23, %25, %cst_19 {dimension_numbers = #tpu.dot_dimension_numbers<[1], [0], [0], [1], [0, 0, 1, 1], [], []>} : vector<4x64xbf16>, vector<64x8xbf16>, vector<4x8xf32> -> vector<4x8xf32>
      %27 = arith.addf %22, %26 : vector<4x8xf32>
      %c1_i32_20 = arith.constant 1 : i32
      %28 = arith.addi %3, %c1_i32_20 : i32
      %c0_21 = arith.constant 0 : index
      %29 = arith.index_cast %28 : i32 to index
      %c0_22 = arith.constant 0 : index
      %c0_23 = arith.constant 0 : index
      %30 = vector.load %arg1[%c0_21, %29, %c0_22, %c0_23] : memref<1x7x7x64xbf16, #tpu.memory_space<vmem>>, vector<1x1x7x64xbf16>
      %31 = vector.shape_cast %30 : vector<1x1x7x64xbf16> to vector<7x64xbf16>
      %32 = vector.extract_strided_slice %31 {offsets = [0, 0], sizes = [4, 64], strides = [1, 1]} : vector<7x64xbf16> to vector<4x64xbf16>
      %c4 = arith.constant 4 : index
      %c0_24 = arith.constant 0 : index
      %c0_25 = arith.constant 0 : index
      %33 = vector.load %arg2[%c4, %c0_24, %c0_25] : memref<16x64x8xbf16, #tpu.memory_space<vmem>>, vector<1x64x8xbf16>
      %34 = vector.shape_cast %33 : vector<1x64x8xbf16> to vector<64x8xbf16>
      %cst_26 = arith.constant dense<0.000000e+00> : vector<4x8xf32>
      %35 = tpu.matmul %32, %34, %cst_26 {dimension_numbers = #tpu.dot_dimension_numbers<[1], [0], [0], [1], [0, 0, 1, 1], [], []>} : vector<4x64xbf16>, vector<64x8xbf16>, vector<4x8xf32> -> vector<4x8xf32>
      %36 = arith.addf %27, %35 : vector<4x8xf32>
      %37 = vector.extract_strided_slice %31 {offsets = [1, 0], sizes = [4, 64], strides = [1, 1]} : vector<7x64xbf16> to vector<4x64xbf16>
      %c5 = arith.constant 5 : index
      %c0_27 = arith.constant 0 : index
      %c0_28 = arith.constant 0 : index
      %38 = vector.load %arg2[%c5, %c0_27, %c0_28] : memref<16x64x8xbf16, #tpu.memory_space<vmem>>, vector<1x64x8xbf16>
      %39 = vector.shape_cast %38 : vector<1x64x8xbf16> to vector<64x8xbf16>
      %cst_29 = arith.constant dense<0.000000e+00> : vector<4x8xf32>
      %40 = tpu.matmul %37, %39, %cst_29 {dimension_numbers = #tpu.dot_dimension_numbers<[1], [0], [0], [1], [0, 0, 1, 1], [], []>} : vector<4x64xbf16>, vector<64x8xbf16>, vector<4x8xf32> -> vector<4x8xf32>
      %41 = arith.addf %36, %40 : vector<4x8xf32>
      %42 = vector.extract_strided_slice %31 {offsets = [2, 0], sizes = [4, 64], strides = [1, 1]} : vector<7x64xbf16> to vector<4x64xbf16>
      %c6 = arith.constant 6 : index
      %c0_30 = arith.constant 0 : index
      %c0_31 = arith.constant 0 : index
      %43 = vector.load %arg2[%c6, %c0_30, %c0_31] : memref<16x64x8xbf16, #tpu.memory_space<vmem>>, vector<1x64x8xbf16>
      %44 = vector.shape_cast %43 : vector<1x64x8xbf16> to vector<64x8xbf16>
      %cst_32 = arith.constant dense<0.000000e+00> : vector<4x8xf32>
      %45 = tpu.matmul %42, %44, %cst_32 {dimension_numbers = #tpu.dot_dimension_numbers<[1], [0], [0], [1], [0, 0, 1, 1], [], []>} : vector<4x64xbf16>, vector<64x8xbf16>, vector<4x8xf32> -> vector<4x8xf32>
      %46 = arith.addf %41, %45 : vector<4x8xf32>
      %47 = vector.extract_strided_slice %31 {offsets = [3, 0], sizes = [4, 64], strides = [1, 1]} : vector<7x64xbf16> to vector<4x64xbf16>
      %c7 = arith.constant 7 : index
      %c0_33 = arith.constant 0 : index
      %c0_34 = arith.constant 0 : index
      %48 = vector.load %arg2[%c7, %c0_33, %c0_34] : memref<16x64x8xbf16, #tpu.memory_space<vmem>>, vector<1x64x8xbf16>
      %49 = vector.shape_cast %48 : vector<1x64x8xbf16> to vector<64x8xbf16>
      %cst_35 = arith.constant dense<0.000000e+00> : vector<4x8xf32>
      %50 = tpu.matmul %47, %49, %cst_35 {dimension_numbers = #tpu.dot_dimension_numbers<[1], [0], [0], [1], [0, 0, 1, 1], [], []>} : vector<4x64xbf16>, vector<64x8xbf16>, vector<4x8xf32> -> vector<4x8xf32>
      %51 = arith.addf %46, %50 : vector<4x8xf32>
      %c2_i32 = arith.constant 2 : i32
      %52 = arith.addi %3, %c2_i32 : i32
      %c0_36 = arith.constant 0 : index
      %53 = arith.index_cast %52 : i32 to index
      %c0_37 = arith.constant 0 : index
      %c0_38 = arith.constant 0 : index
      %54 = vector.load %arg1[%c0_36, %53, %c0_37, %c0_38] : memref<1x7x7x64xbf16, #tpu.memory_space<vmem>>, vector<1x1x7x64xbf16>
      %55 = vector.shape_cast %54 : vector<1x1x7x64xbf16> to vector<7x64xbf16>
      %56 = vector.extract_strided_slice %55 {offsets = [0, 0], sizes = [4, 64], strides = [1, 1]} : vector<7x64xbf16> to vector<4x64xbf16>
      %c8 = arith.constant 8 : index
      %c0_39 = arith.constant 0 : index
      %c0_40 = arith.constant 0 : index
      %57 = vector.load %arg2[%c8, %c0_39, %c0_40] : memref<16x64x8xbf16, #tpu.memory_space<vmem>>, vector<1x64x8xbf16>
      %58 = vector.shape_cast %57 : vector<1x64x8xbf16> to vector<64x8xbf16>
      %cst_41 = arith.constant dense<0.000000e+00> : vector<4x8xf32>
      %59 = tpu.matmul %56, %58, %cst_41 {dimension_numbers = #tpu.dot_dimension_numbers<[1], [0], [0], [1], [0, 0, 1, 1], [], []>} : vector<4x64xbf16>, vector<64x8xbf16>, vector<4x8xf32> -> vector<4x8xf32>
      %60 = arith.addf %51, %59 : vector<4x8xf32>
      %61 = vector.extract_strided_slice %55 {offsets = [1, 0], sizes = [4, 64], strides = [1, 1]} : vector<7x64xbf16> to vector<4x64xbf16>
      %c9 = arith.constant 9 : index
      %c0_42 = arith.constant 0 : index
      %c0_43 = arith.constant 0 : index
      %62 = vector.load %arg2[%c9, %c0_42, %c0_43] : memref<16x64x8xbf16, #tpu.memory_space<vmem>>, vector<1x64x8xbf16>
      %63 = vector.shape_cast %62 : vector<1x64x8xbf16> to vector<64x8xbf16>
      %cst_44 = arith.constant dense<0.000000e+00> : vector<4x8xf32>
      %64 = tpu.matmul %61, %63, %cst_44 {dimension_numbers = #tpu.dot_dimension_numbers<[1], [0], [0], [1], [0, 0, 1, 1], [], []>} : vector<4x64xbf16>, vector<64x8xbf16>, vector<4x8xf32> -> vector<4x8xf32>
      %65 = arith.addf %60, %64 : vector<4x8xf32>
      %66 = vector.extract_strided_slice %55 {offsets = [2, 0], sizes = [4, 64], strides = [1, 1]} : vector<7x64xbf16> to vector<4x64xbf16>
      %c10 = arith.constant 10 : index
      %c0_45 = arith.constant 0 : index
      %c0_46 = arith.constant 0 : index
      %67 = vector.load %arg2[%c10, %c0_45, %c0_46] : memref<16x64x8xbf16, #tpu.memory_space<vmem>>, vector<1x64x8xbf16>
      %68 = vector.shape_cast %67 : vector<1x64x8xbf16> to vector<64x8xbf16>
      %cst_47 = arith.constant dense<0.000000e+00> : vector<4x8xf32>
      %69 = tpu.matmul %66, %68, %cst_47 {dimension_numbers = #tpu.dot_dimension_numbers<[1], [0], [0], [1], [0, 0, 1, 1], [], []>} : vector<4x64xbf16>, vector<64x8xbf16>, vector<4x8xf32> -> vector<4x8xf32>
      %70 = arith.addf %65, %69 : vector<4x8xf32>
      %71 = vector.extract_strided_slice %55 {offsets = [3, 0], sizes = [4, 64], strides = [1, 1]} : vector<7x64xbf16> to vector<4x64xbf16>
      %c11 = arith.constant 11 : index
      %c0_48 = arith.constant 0 : index
      %c0_49 = arith.constant 0 : index
      %72 = vector.load %arg2[%c11, %c0_48, %c0_49] : memref<16x64x8xbf16, #tpu.memory_space<vmem>>, vector<1x64x8xbf16>
      %73 = vector.shape_cast %72 : vector<1x64x8xbf16> to vector<64x8xbf16>
      %cst_50 = arith.constant dense<0.000000e+00> : vector<4x8xf32>
      %74 = tpu.matmul %71, %73, %cst_50 {dimension_numbers = #tpu.dot_dimension_numbers<[1], [0], [0], [1], [0, 0, 1, 1], [], []>} : vector<4x64xbf16>, vector<64x8xbf16>, vector<4x8xf32> -> vector<4x8xf32>
      %75 = arith.addf %70, %74 : vector<4x8xf32>
      %c3_i32 = arith.constant 3 : i32
      %76 = arith.addi %3, %c3_i32 : i32
      %c0_51 = arith.constant 0 : index
      %77 = arith.index_cast %76 : i32 to index
      %c0_52 = arith.constant 0 : index
      %c0_53 = arith.constant 0 : index
      %78 = vector.load %arg1[%c0_51, %77, %c0_52, %c0_53] : memref<1x7x7x64xbf16, #tpu.memory_space<vmem>>, vector<1x1x7x64xbf16>
      %79 = vector.shape_cast %78 : vector<1x1x7x64xbf16> to vector<7x64xbf16>
      %80 = vector.extract_strided_slice %79 {offsets = [0, 0], sizes = [4, 64], strides = [1, 1]} : vector<7x64xbf16> to vector<4x64xbf16>
      %c12 = arith.constant 12 : index
      %c0_54 = arith.constant 0 : index
      %c0_55 = arith.constant 0 : index
      %81 = vector.load %arg2[%c12, %c0_54, %c0_55] : memref<16x64x8xbf16, #tpu.memory_space<vmem>>, vector<1x64x8xbf16>
      %82 = vector.shape_cast %81 : vector<1x64x8xbf16> to vector<64x8xbf16>
      %cst_56 = arith.constant dense<0.000000e+00> : vector<4x8xf32>
      %83 = tpu.matmul %80, %82, %cst_56 {dimension_numbers = #tpu.dot_dimension_numbers<[1], [0], [0], [1], [0, 0, 1, 1], [], []>} : vector<4x64xbf16>, vector<64x8xbf16>, vector<4x8xf32> -> vector<4x8xf32>
      %84 = arith.addf %75, %83 : vector<4x8xf32>
      %85 = vector.extract_strided_slice %79 {offsets = [1, 0], sizes = [4, 64], strides = [1, 1]} : vector<7x64xbf16> to vector<4x64xbf16>
      %c13 = arith.constant 13 : index
      %c0_57 = arith.constant 0 : index
      %c0_58 = arith.constant 0 : index
      %86 = vector.load %arg2[%c13, %c0_57, %c0_58] : memref<16x64x8xbf16, #tpu.memory_space<vmem>>, vector<1x64x8xbf16>
      %87 = vector.shape_cast %86 : vector<1x64x8xbf16> to vector<64x8xbf16>
      %cst_59 = arith.constant dense<0.000000e+00> : vector<4x8xf32>
      %88 = tpu.matmul %85, %87, %cst_59 {dimension_numbers = #tpu.dot_dimension_numbers<[1], [0], [0], [1], [0, 0, 1, 1], [], []>} : vector<4x64xbf16>, vector<64x8xbf16>, vector<4x8xf32> -> vector<4x8xf32>
      %89 = arith.addf %84, %88 : vector<4x8xf32>
      %90 = vector.extract_strided_slice %79 {offsets = [2, 0], sizes = [4, 64], strides = [1, 1]} : vector<7x64xbf16> to vector<4x64xbf16>
      %c14 = arith.constant 14 : index
      %c0_60 = arith.constant 0 : index
      %c0_61 = arith.constant 0 : index
      %91 = vector.load %arg2[%c14, %c0_60, %c0_61] : memref<16x64x8xbf16, #tpu.memory_space<vmem>>, vector<1x64x8xbf16>
      %92 = vector.shape_cast %91 : vector<1x64x8xbf16> to vector<64x8xbf16>
      %cst_62 = arith.constant dense<0.000000e+00> : vector<4x8xf32>
      %93 = tpu.matmul %90, %92, %cst_62 {dimension_numbers = #tpu.dot_dimension_numbers<[1], [0], [0], [1], [0, 0, 1, 1], [], []>} : vector<4x64xbf16>, vector<64x8xbf16>, vector<4x8xf32> -> vector<4x8xf32>
      %94 = arith.addf %89, %93 : vector<4x8xf32>
      %95 = vector.extract_strided_slice %79 {offsets = [3, 0], sizes = [4, 64], strides = [1, 1]} : vector<7x64xbf16> to vector<4x64xbf16>
      %c15 = arith.constant 15 : index
      %c0_63 = arith.constant 0 : index
      %c0_64 = arith.constant 0 : index
      %96 = vector.load %arg2[%c15, %c0_63, %c0_64] : memref<16x64x8xbf16, #tpu.memory_space<vmem>>, vector<1x64x8xbf16>
      %97 = vector.shape_cast %96 : vector<1x64x8xbf16> to vector<64x8xbf16>
      %cst_65 = arith.constant dense<0.000000e+00> : vector<4x8xf32>
      %98 = tpu.matmul %95, %97, %cst_65 {dimension_numbers = #tpu.dot_dimension_numbers<[1], [0], [0], [1], [0, 0, 1, 1], [], []>} : vector<4x64xbf16>, vector<64x8xbf16>, vector<4x8xf32> -> vector<4x8xf32>
      %99 = arith.addf %94, %98 : vector<4x8xf32>
      %100 = vector.broadcast %0 : vector<1x8xf32> to vector<4x8xf32>
      %101 = arith.addf %99, %100 : vector<4x8xf32>
      %c0_66 = arith.constant 0 : index
      %102 = arith.index_cast %arg5 : i32 to index
      %c0_67 = arith.constant 0 : index
      %c0_68 = arith.constant 0 : index
      %103 = vector.load %arg4[%c0_66, %102, %c0_67, %c0_68] : memref<1x4x4x8xf32, #tpu.memory_space<vmem>>, vector<1x1x4x8xf32>
      %104 = vector.shape_cast %103 : vector<1x1x4x8xf32> to vector<4x8xf32>
      %105 = vector.shape_cast %101 : vector<4x8xf32> to vector<1x1x4x8xf32>
      tpu.vector_store %arg4[%c0_66, %102, %c0_67, %c0_68], %105 {strides = array<i32>} : memref<1x4x4x8xf32, #tpu.memory_space<vmem>>, vector<1x1x4x8xf32>,
    }
    %c4_i32_1 = arith.constant 4 : i32
    return
  }
  func.func @transform_0(%arg0: i32) -> (i32, i32, i32, i32) {
    %c0_i32 = arith.constant 0 : i32
    %c0_i32_0 = arith.constant 0 : i32
    %c0_i32_1 = arith.constant 0 : i32
    %c0_i32_2 = arith.constant 0 : i32
    return %arg0, %c0_i32, %c0_i32_0, %c0_i32_1 : i32, i32, i32, i32
  }
  func.func @transform_1(%arg0: i32) -> (i32, i32, i32) {
    %c0_i32 = arith.constant 0 : i32
    %c0_i32_0 = arith.constant 0 : i32
    %c0_i32_1 = arith.constant 0 : i32
    %c0_i32_2 = arith.constant 0 : i32
    return %c0_i32, %c0_i32_0, %c0_i32_1 : i32, i32, i32
  }
  func.func @transform_2(%arg0: i32) -> (i32, i32) {
    %c0_i32 = arith.constant 0 : i32
    %c0_i32_0 = arith.constant 0 : i32
    %c0_i32_1 = arith.constant 0 : i32
    return %c0_i32, %c0_i32_0 : i32, i32
  }
  func.func @transform_3(%arg0: i32) -> (i32, i32, i32, i32) {
    %c0_i32 = arith.constant 0 : i32
    %c0_i32_0 = arith.constant 0 : i32
    %c0_i32_1 = arith.constant 0 : i32
    %c0_i32_2 = arith.constant 0 : i32
    return %arg0, %c0_i32, %c0_i32_0, %c0_i32_1 : i32, i32, i32, i32
  }
}

</mosaic_0001>

<bundles_post_ra>
// kernel: discriminator_forward.5
= control target key start
LH: loop header
LB: loop body
LE: loop exit
PB: predicated region body
PF: predicated region fallthrough
CT: control target
= control target key end

     0   :  { %s981_s12 = smov 0   ;;  %s1099_s0 = inlined_call_operand.vmem [shape: bf16[2,34,17,6], index: 0, kind: input, shape index: {}]   ;;  %s1100_s1 = inlined_call_operand.vmem [shape: bf16[8,6,8], index: 1, kind: input, shape index: {}]   ;;  %s1101_s2 = inlined_call_operand.vmem [shape: f32[1,8], index: 2, kind: input, shape index: {}]   ;;  %s1102_s3 = inlined_call_operand.vmem [shape: bf16[2,16,16,8], index: 3, kind: output, shape index: {}]  }
   0x1 LB: > { %s792_s13 = sadd.s32 4294967295, %s953_s12   ;;  %p796_p0 = scmp.ge.s32.totalorder %s953_s12, 1  ;;  %s953_s12 = sphi %s981_s12, %s13_s12  }
   0x2   : > { %p137_p1 = scmp.lt.s32.totalorder %s953_s12, 3 }
   0x4   : > { %p138_p2 = pnand %p796_p0, %p137_p1 }
   0x5   : > { %p161_p3 = scmp.lt.s32.totalorder (!%p138_p2), %s792_s13, 1  ;;  %v992_v0 = vld [vmem:[%s1101_s2] ss:$0 sm:$0xff] (!%p138_p2)  ;;  %s1004_s24 = smov (!%p138_p2), 0  }
   0x6   : > { %141 = sbr.rel (%p138_p2) target bundleno = 279 (0x117), region = 32 }
   0xd   : > { %s1104_s13 = smov (!%p161_p3, %s792_s13), 1 }
   0xe   : > { %s916_s16 = smul.u32 408, %s1104_s13  ;;  %s847_s17 = sshll.u32 %s1104_s13, 7 }
   0xf   : > { %s997_s20 = scalar_lea.vmem %s1102_s3, %s847_s17 }
  0x10   : > { %s1002_s23 = scalar_lea.vmem %s1099_s0, %s916_s16 }
  0x11 LB: >> { %v803_v1 = vld [vmem:[%s1100_s1 + $0x4] sm:$0x7]  ;;  %vm214_vm0 = vcmask 1042432   ;;  %v186_v2 = vld [vmem:[%s1100_s1] sm:$0x7]  ;;  %v959_v3 = vmov 0.0   ;;  %s957_s24 = sphi %s1004_s24, %s178_s24  }
  0x12   : >> { %868 = vmatprep.subr.bf16.mxu0 %v959_v3  ;;  %874 = vmatprep.subr.bf16.mxu1 %v959_v3  ;;  %v216_v4 = vsel %vm214_vm0, %v803_v1, 0  ;;  %v262_v5 = vsel %vm214_vm0, %v186_v2, 0  ;;  %s848_s29 = smul.u32 24, %s957_s24  ;;  %v816_v6 = vld [vmem:[%s1100_s1 + $0xc] sm:$0x7]  ;;  %vm960_vm1 = vmmov 0  }
  0x13   : >> { %869 = vmatpush3.bf16.msra.mxu0 %v216_v4  ;;  %875 = vmatpush3.bf16.msra.mxu1 %v262_v5  ;;  %vm210_vm2 = vcmask 48128   ;;  %vm197_vm3 = vsmask.f32 7424  ;;  %v388_v8 = vsel %vm214_vm0, %v816_v6, 0  ;;  %v813_v10 = vld [vmem:[%s1100_s1 + $0x8] sm:$0x7] }
  0x14   : >> { %876 = vmatprep.mubr.msk.bf16.mxu1 %vm960_vm1, %v959_v3  ;;  %870 = vmatprep.mubr.msk.bf16.mxu0 %vm960_vm1, %v959_v3  ;;  %s1028_s5 = scalar_lea.vmem %s1002_s23, %s848_s29  ;;  %v827_v19 = vld [vmem:[%s1100_s1 + $0x14] sm:$0x7]  ;;  %v323_v24 = vsel %vm214_vm0, %v813_v10, 0  ;;  %v824_v37 = vld [vmem:[%s1100_s1 + $0x10] sm:$0x7]  ;;  %s851_s17 = sshll.u32 %s957_s24, 3 }
  0x15   : >> { %880 = vmatprep.subr.bf16.mxu0 %v959_v3  ;;  %886 = vmatprep.subr.bf16.mxu1 %v959_v3  ;;  %v935_v7 = vld [vmem:[%s1028_s5] sm:$0xff]   ;;  %v936_v9 = vld [vmem:[%s1028_s5 + $0x8] ss:$0 sps:$4 sm:$0x11]   ;;  %v937_v11 = vld [vmem:[%s1028_s5 + $0xc] sm:$0xff]   ;;  %v516_v35 = vsel %vm214_vm0, %v827_v19, 0  ;;  %s712_s18 = scalar_lea.vmem %s997_s20, %s851_s17 }
  0x16   : >> { %877 = vmatmul.mubr.msk.bf16.vlgmr.msra.gmra.mrb[0].mxu1 %vm210_vm2, %v935_v7  ;;  %v199_v12 = vshrl.u32 %v935_v7, 16  ;;  %v201_v13 = vshll.u32 %v935_v7, 16  ;;  %v206_v14 = vshll.u32 %v936_v9, 16  ;;  %v938_v15 = vld [vmem:[%s1028_s5 + $0x14] ss:$0 sps:$4 sm:$0x11]  }
  0x17   : >> { %887 = vmatpush3.bf16.msra.mxu1 %v388_v8  ;;  %888 = vmatprep.mubr.msk.bf16.mxu1 %vm960_vm1, %v959_v3  ;;  %v373_v17 = vshrl.u32 %v937_v11, 16  ;;  %v375_v18 = vshll.u32 %v937_v11, 16  ;;  %v939_v20 = vld [vmem:[%s1028_s5 + $0x18] sm:$0xff]   ;;  %v380_v22 = vshll.u32 %v938_v15, 16  ;;  %v941_v34 = vld [vmem:[%s1028_s5 + $0x24] sm:$0xff]   ;;  %v451_v43 = vsel %vm214_vm0, %v824_v37, 0 }
  0x18   : >> { %v203_v16 = vrot.slane %v201_v13, 1  ;;  %898 = vmatprep.subr.bf16.mxu1 %v959_v3  ;;  %v208_v21 = vrot.slane %v206_v14, 1  ;;  %v940_v26 = vld [vmem:[%s1028_s5 + $0x20] ss:$0 sps:$4 sm:$0x11]   ;;  %v503_v27 = vshll.u32 %v939_v20, 16 }
  0x19   : >> { %v377_v25 = vrot.slane %v375_v18, 1  ;;  %v382_v28 = vrot.slane %v380_v22, 1  ;;  %v501_v29 = vshrl.u32 %v939_v20, 16  ;;  %v508_v33 = vshll.u32 %v940_v26, 16  ;;  %v838_v42 = vld [vmem:[%s1100_s1 + $0x1c] sm:$0x7] }
  0x1a   : >> { %v204_v23 = vor.u32 %v203_v16, %v199_v12  ;;  %v505_v32 = vrot.slane %v503_v27, 1  ;;  %v942_v40 = vld [vmem:[%s1028_s5 + $0x2c] ss:$0 sps:$4 sm:$0x11]   ;;  %v631_v41 = vshll.u32 %v941_v34, 16  ;;  %v629_v45 = vshrl.u32 %v941_v34, 16 }
  0x1b   : >> { %v378_v31 = vor.u32 %v377_v25, %v373_v17  ;;  %v510_v39 = vrot.slane %v508_v33, 1  ;;  %v636_v47 = vshll.u32 %v942_v40, 16  ;;  %v644_v48 = vsel %vm214_vm0, %v838_v42, 0  ;;  %v835_v49 = vld [vmem:[%s1100_s1 + $0x18] sm:$0x7]  ;;  %s178_s24 = sadd.s32 1, %s957_s24  }
  0x1c   : >> { %v209_v30 = vsel %vm197_vm3, %v204_v23, %v208_v21  ;;  %v506_v38 = vor.u32 %v505_v32, %v501_v29  ;;  %v633_v46 = vrot.slane %v631_v41, 1  ;;  %v579_v52 = vsel %vm214_vm0, %v835_v49, 0  ;;  %p175_p4 = scmp.ge.s32.totalorder %s178_s24, 16  }
  0x1d   : >> { %871 = vmatmul.mubr.msk.bf16.vlgmr.msra.gmra.mrb[0].mxu0 %vm210_vm2, %v209_v30  ;;  %v383_v36 = vsel %vm197_vm3, %v378_v31, %v382_v28  ;;  %v638_v51 = vrot.slane %v636_v47, 1  ;;  %vm713_vm5 = vcmask 60416  }
  0x1e   : >> { %881 = vmatpush3.bf16.msra.mxu0 %v323_v24  ;;  %882 = vmatprep.mubr.msk.bf16.mxu0 %vm960_vm1, %v959_v3  ;;  %v511_v44 = vsel %vm197_vm3, %v506_v38, %v510_v39  ;;  %v634_v50 = vor.u32 %v633_v46, %v629_v45 }
  0x1f   : >> { %889 = vmatmul.mubr.msk.bf16.vlgmr.msra.gmra.mrb[4].mxu1 %vm210_vm2, %v383_v36  ;;  %892 = vmatprep.subr.bf16.mxu0 %v959_v3 }
  0x20   : >> { %899 = vmatpush3.bf16.msra.mxu1 %v516_v35  ;;  %900 = vmatprep.mubr.msk.bf16.mxu1 %vm960_vm1, %v959_v3  ;;  %v639_v53 = vsel %vm197_vm3, %v634_v50, %v638_v51 }
  0x21   : >> { %910 = vmatprep.subr.bf16.mxu1 %v959_v3 }
  0x25   : >> { %883 = vmatmul.mubr.msk.bf16.vlgmr.msra.gmra.mrb[4].mxu0 %vm210_vm2, %v937_v11 }
  0x26   : >> { %893 = vmatpush3.bf16.msra.mxu0 %v451_v43  ;;  %894 = vmatprep.mubr.msk.bf16.mxu0 %vm960_vm1, %v959_v3 }
  0x27   : >> { %901 = vmatmul.mubr.msk.bf16.vlgmr.msra.gmra.mrb[8].mxu1 %vm210_vm2, %v511_v44  ;;  %904 = vmatprep.subr.bf16.mxu0 %v959_v3 }
  0x28   : >> { %911 = vmatpush3.bf16.msra.mxu1 %v644_v48  ;;  %912 = vmatprep.mubr.msk.bf16.mxu1 %vm960_vm1, %v959_v3 }
  0x2d   : >> { %895 = vmatmul.mubr.msk.bf16.vlgmr.msra.gmra.mrb[8].mxu0 %vm210_vm2, %v939_v20 }
  0x2e   : >> { %905 = vmatpush3.bf16.msra.mxu0 %v579_v52  ;;  %906 = vmatprep.mubr.msk.bf16.mxu0 %vm960_vm1, %v959_v3 }
  0x2f   : >> { %913 = vmatmul.mubr.msk.bf16.vlgmr.msra.gmra.mrb[12].mxu1 %vm210_vm2, %v639_v53 }
  0x35   : >> { %907 = vmatmul.mubr.msk.bf16.vlgmr.msra.gmra.mrb[12].mxu0 %vm210_vm2, %v941_v34 }
  0xe9   : >> { %v298_v54 = vpop.f32.mrb[0].mxu1 }
  0xea   : >> { %v878_v55 = vpop.f32.mrb[1].mxu1 }
  0xeb   : >> { %v301_v56 = vpop.f32.mrb[2].mxu1 }
  0xec   : >> { %v879_v57 = vpop.f32.mrb[3].mxu1 }
  0xf0   : >> { %v252_v58 = vpop.f32.mrb[0].mxu0 }
  0xf1   : >> { %v299_v59 = vadd.f32 %v298_v54, %v252_v58  ;;  %v872_v60 = vpop.f32.mrb[1].mxu0 }
  0xf2   : >> { %v255_v61 = vpop.f32.mrb[2].mxu0  ;;  %v424_v62 = vpop.f32.mrb[4].mxu1 }
  0xf3   : >> { %v302_v63 = vadd.f32 %v301_v56, %v255_v61  ;;  %v873_v1 = vpop.f32.mrb[3].mxu0  ;;  %v890_v2 = vpop.f32.mrb[5].mxu1 }
  0xf4   : >> { %v427_v4 = vpop.f32.mrb[6].mxu1 }
  0xf5   : >> { %v891_v5 = vpop.f32.mrb[7].mxu1 }
  0xf8   : >> { %v359_v6 = vpop.f32.mrb[4].mxu0 }
  0xf9   : >> { %v366_v3 = vadd.f32 %v359_v6, %v299_v59  ;;  %v884_v7 = vpop.f32.mrb[5].mxu0 }
  0xfa   : >> { %v362_v8 = vpop.f32.mrb[6].mxu0  ;;  %v552_v9 = vpop.f32.mrb[8].mxu1 }
  0xfb   : >> { %v367_v10 = vadd.f32 %v362_v8, %v302_v63  ;;  %v885_v11 = vpop.f32.mrb[7].mxu0  ;;  %v431_v12 = vadd.f32 %v424_v62, %v366_v3  ;;  %v902_v13 = vpop.f32.mrb[9].mxu1 }
  0xfc   : >> { %v555_v14 = vpop.f32.mrb[10].mxu1 }
  0xfd   : >> { %v432_v15 = vadd.f32 %v427_v4, %v367_v10  ;;  %v903_v16 = vpop.f32.mrb[11].mxu1 }
 0x100   : >> { %v487_v17 = vpop.f32.mrb[8].mxu0 }
 0x101   : >> { %v494_v18 = vadd.f32 %v487_v17, %v431_v12  ;;  %v896_v19 = vpop.f32.mrb[9].mxu0 }
 0x102   : >> { %v490_v20 = vpop.f32.mrb[10].mxu0  ;;  %v680_v21 = vpop.f32.mrb[12].mxu1 }
 0x103   : >> { %v495_v22 = vadd.f32 %v490_v20, %v432_v15  ;;  %v897_v23 = vpop.f32.mrb[11].mxu0  ;;  %v559_v24 = vadd.f32 %v552_v9, %v494_v18  ;;  %v914_v25 = vpop.f32.mrb[13].mxu1 }
 0x104   : >> { %v683_v26 = vpop.f32.mrb[14].mxu1 }
 0x105   : >> { %v560_v27 = vadd.f32 %v555_v14, %v495_v22  ;;  %v915_v28 = vpop.f32.mrb[15].mxu1 }
 0x108   : >> { %v615_v29 = vpop.f32.mrb[12].mxu0 }
 0x109   : >> { %v622_v30 = vadd.f32 %v615_v29, %v559_v24  ;;  %v908_v31 = vpop.f32.mrb[13].mxu0 }
 0x10a   : >> { %v618_v32 = vpop.f32.mrb[14].mxu0 }
 0x10b   : >> { %v687_v33 = vadd.f32 %v680_v21, %v622_v30  ;;  %v623_v34 = vadd.f32 %v618_v32, %v560_v27  ;;  %v909_v35 = vpop.f32.mrb[15].mxu0 }
 0x10d   : >> { %v695_v36 = vadd.f32 %v992_v0, %v687_v33  ;;  %v688_v37 = vadd.f32 %v683_v26, %v623_v34 }
 0x10f   : >> { %vm697_vm4 = vcmp.ge.f32.partialorder %v695_v36, 0.0  ;;  %v699_v38 = vmul.f32 0.2, %v695_v36  ;;  %v696_v39 = vadd.f32 %v992_v0, %v688_v37 }
 0x110   : > { %177 = sbr.rel (!%p175_p4) target bundleno = 17 (0x11), region = 81 }
 0x111   : >> { %v701_v40 = vsel %vm697_vm4, %v695_v36, %v699_v38  ;;  %vm698_vm6 = vcmp.ge.f32.partialorder %v696_v39, 0.0  ;;  %v700_v41 = vmul.f32 0.2, %v696_v39 }
 0x112   : >> { %v849_v42 = vpack.c.bf16 %v701_v40, %v701_v40 }
 0x113   : >> { %v702_v43 = vsel %vm698_vm6, %v696_v39, %v700_v41 }
 0x114   : >> { %714 = vst.msk [vmem:[%s712_s18] sm:$0xf] %vm713_vm5, %v849_v42  ;;  %v850_v44 = vpack.c.bf16 %v702_v43, %v702_v43 }
 0x116   : >> { %715 = vst.msk [vmem:[%s712_s18 + $0x4] sm:$0xf] %vm713_vm5, %v850_v44 }
 0x117 PF: > { %s13_s12 = sadd.s32 1, %s953_s12  }
 0x118   : > { %p10_p5 = scmp.ge.s32.totalorder %s13_s12, 4  }
 0x11a   :  { %12 = sbr.rel (!%p10_p5) target bundleno = 1 (0x1), region = 92 }

// kernel: discriminator_forward.6
= control target key start
LH: loop header
LB: loop body
LE: loop exit
PB: predicated region body
PF: predicated region fallthrough
CT: control target
= control target key end

     0   :  { %s1210_s12 = smov 0   ;;  %s1446_s0 = inlined_call_operand.vmem [shape: bf16[2,18,9,16], index: 0, kind: input, shape index: {}]   ;;  %s1447_s1 = inlined_call_operand.vmem [shape: bf16[8,16,16], index: 1, kind: input, shape index: {}]   ;;  %s1448_s2 = inlined_call_operand.vmem [shape: f32[1,16], index: 2, kind: input, shape index: {}]   ;;  %s1449_s3 = inlined_call_operand.vmem [shape: bf16[2,8,8,16], index: 3, kind: output, shape index: {}]  }
   0x1 LB: > { %s989_s13 = sadd.s32 4294967295, %s1182_s12   ;;  %p993_p0 = scmp.ge.s32.totalorder %s1182_s12, 1  ;;  %s1182_s12 = sphi %s1210_s12, %s13_s12  }
   0x2   : > { %p137_p1 = scmp.lt.s32.totalorder %s1182_s12, 3 }
   0x4   : > { %p138_p2 = pnand %p993_p0, %p137_p1 }
   0x5   : > { %p161_p3 = scmp.lt.s32.totalorder (!%p138_p2), %s989_s13, 1  ;;  %v1221_v0 = vld [vmem:[%s1448_s2] ss:$0 sm:$0xff] (!%p138_p2)  ;;  %s1233_s24 = smov (!%p138_p2), 0  }
   0x6   : > { %141 = sbr.rel (%p138_p2) target bundleno = 374 (0x176), region = 32 }
   0xd   : > { %s1451_s13 = smov (!%p161_p3, %s989_s13), 1 }
   0xe   : > { %s1139_s16 = smul.u32 144, %s1451_s13  ;;  %s1050_s17 = sshll.u32 %s1451_s13, 5 }
   0xf   : > { %s1226_s20 = scalar_lea.vmem %s1449_s3, %s1050_s17 }
  0x10   : > { %s1231_s23 = scalar_lea.vmem %s1446_s0, %s1139_s16 }
  0x11 LB: >> { %v1158_v1 = vld [vmem:[%s1447_s1 + $0x8] sm:$0xff]   ;;  %v1188_v2 = vmov 0.0   ;;  %v1159_v3 = vld [vmem:[%s1447_s1] sm:$0xff]   ;;  %vm1189_vm0 = vmmov 0   ;;  %s1052_s29 = sshll.u32 %s1186_s24, 4  ;;  %vm208_vm1 = vcmask 130048   ;;  %s1186_s24 = sphi %s1233_s24, %s178_s24  }
  0x12   : >> { %1091 = vmatprep.subr.bf16.mxu0 %v1188_v2  ;;  %1097 = vmatprep.subr.bf16.mxu1 %v1188_v2  ;;  %s182_s30 = scalar_lea.vmem %s1231_s23, %s1052_s29  ;;  %v1162_v6 = vld [vmem:[%s1447_s1 + $0x18] sm:$0xff]   ;;  %v1161_v19 = vld [vmem:[%s1447_s1 + $0x10] sm:$0xff]   ;;  %v1165_v24 = vld [vmem:[%s1447_s1 + $0x28] sm:$0xff]   ;;  %s1047_s17 = sshll.u32 %s1186_s24, 2  ;;  %vm683_vm2 = vcmask 125952  }
  0x13   : >> { %1092 = vmatpush3.bf16.msra.mxu0 %v1158_v1  ;;  %1099 = vmatprep.mubr.msk.bf16.mxu1 %vm1189_vm0, %v1188_v2  ;;  %v183_v4 = vld [vmem:[%s182_s30] sm:$0xf]  ;;  %v184_v5 = vld [vmem:[%s182_s30 + $0x4] sm:$0x1]  ;;  %v1009_v8 = vld [vmem:[%s182_s30 + $0x8] sm:$0xf]  ;;  %s682_s18 = scalar_lea.vmem %s1226_s20, %s1047_s17 }
  0x14   : >> { %1098 = vmatpush3.bf16.msra.mxu1 %v1159_v3  ;;  %1093 = vmatprep.mubr.msk.bf16.mxu0 %vm1189_vm0, %v1188_v2  ;;  %v1002_v7 = vcombine.low %v183_v4, %v184_v5  ;;  %v1010_v9 = vld [vmem:[%s182_s30 + $0xc] sm:$0x1]  ;;  %v1022_v15 = vld [vmem:[%s182_s30 + $0x10] sm:$0xf]  ;;  %v1023_v16 = vld [vmem:[%s182_s30 + $0x14] sm:$0x1] }
  0x15   : >> { %1103 = vmatprep.subr.bf16.mxu0 %v1188_v2  ;;  %1109 = vmatprep.subr.bf16.mxu1 %v1188_v2  ;;  %v1017_v10 = vcombine.low %v1009_v8, %v1010_v9  ;;  %v1030_v18 = vcombine.low %v1022_v15, %v1023_v16  ;;  %v1035_v25 = vld [vmem:[%s182_s30 + $0x18] sm:$0xf]  ;;  %v1036_v26 = vld [vmem:[%s182_s30 + $0x1c] sm:$0x1]  ;;  %v1164_v30 = vld [vmem:[%s1447_s1 + $0x20] sm:$0xff]   ;;  %s178_s24 = sadd.s32 1, %s1186_s24  }
  0x16   : >> { %v196_v11 = vshrl.u32 %v1002_v7, 16  ;;  %v198_v12 = vshll.u32 %v1002_v7, 16  ;;  %v1043_v29 = vcombine.low %v1035_v25, %v1036_v26  ;;  %v1168_v33 = vld [vmem:[%s1447_s1 + $0x38] sm:$0xff]   ;;  %v1167_v36 = vld [vmem:[%s1447_s1 + $0x30] sm:$0xff]   ;;  %p175_p4 = scmp.ge.s32.totalorder %s178_s24, 8  }
  0x17   : >> { %1100 = vmatmul.mubr.msk.bf16.vlgmr.msra.gmra.mrb[0].mxu1 %vm208_vm1, %v183_v4  ;;  %v369_v13 = vshrl.u32 %v1017_v10, 16  ;;  %v371_v14 = vshll.u32 %v1017_v10, 16  ;;  %v495_v22 = vshll.u32 %v1030_v18, 16  ;;  %v493_v27 = vshrl.u32 %v1030_v18, 16 }
  0x18   : >> { %1110 = vmatpush3.bf16.msra.mxu1 %v1162_v6  ;;  %1111 = vmatprep.mubr.msk.bf16.mxu1 %vm1189_vm0, %v1188_v2  ;;  %v200_v17 = vrot.slane %v198_v12, 1  ;;  %v619_v32 = vshll.u32 %v1043_v29, 16  ;;  %v617_v34 = vshrl.u32 %v1043_v29, 16 }
  0x19   : >> { %1121 = vmatprep.subr.bf16.mxu1 %v1188_v2  ;;  %v373_v20 = vrot.slane %v371_v14, 1  ;;  %v497_v28 = vrot.slane %v495_v22, 1 }
  0x1a   : >> { %v201_v21 = vor.u32 %v200_v17, %v196_v11  ;;  %v621_v35 = vrot.slane %v619_v32, 1 }
  0x1b   : >> { %v374_v23 = vor.u32 %v373_v20, %v369_v13  ;;  %v498_v31 = vor.u32 %v497_v28, %v493_v27 }
  0x1c   : >> { %1094 = vmatmul.mubr.msk.bf16.vlgmr.msra.gmra.mrb[0].mxu0 %vm208_vm1, %v201_v21  ;;  %v622_v37 = vor.u32 %v621_v35, %v617_v34 }
  0x1d   : >> { %1104 = vmatpush3.bf16.msra.mxu0 %v1161_v19  ;;  %1105 = vmatprep.mubr.msk.bf16.mxu0 %vm1189_vm0, %v1188_v2 }
  0x1e   : >> { %1115 = vmatprep.subr.bf16.mxu0 %v1188_v2 }
  0x1f   : >> { %1112 = vmatmul.mubr.msk.bf16.vlgmr.msra.gmra.mrb[4].mxu1 %vm208_vm1, %v374_v23 }
  0x20   : >> { %1122 = vmatpush3.bf16.msra.mxu1 %v1165_v24  ;;  %1123 = vmatprep.mubr.msk.bf16.mxu1 %vm1189_vm0, %v1188_v2 }
  0x21   : >> { %1133 = vmatprep.subr.bf16.mxu1 %v1188_v2 }
  0x24   : >> { %1106 = vmatmul.mubr.msk.bf16.vlgmr.msra.gmra.mrb[4].mxu0 %vm208_vm1, %v1009_v8 }
  0x25   : >> { %1116 = vmatpush3.bf16.msra.mxu0 %v1164_v30  ;;  %1117 = vmatprep.mubr.msk.bf16.mxu0 %vm1189_vm0, %v1188_v2 }
  0x26   : >> { %1127 = vmatprep.subr.bf16.mxu0 %v1188_v2 }
  0x27   : >> { %1124 = vmatmul.mubr.msk.bf16.vlgmr.msra.gmra.mrb[8].mxu1 %vm208_vm1, %v498_v31 }
  0x28   : >> { %1134 = vmatpush3.bf16.msra.mxu1 %v1168_v33  ;;  %1135 = vmatprep.mubr.msk.bf16.mxu1 %vm1189_vm0, %v1188_v2 }
  0x2c   : >> { %1118 = vmatmul.mubr.msk.bf16.vlgmr.msra.gmra.mrb[8].mxu0 %vm208_vm1, %v1022_v15 }
  0x2d   : >> { %1128 = vmatpush3.bf16.msra.mxu0 %v1167_v36  ;;  %1129 = vmatprep.mubr.msk.bf16.mxu0 %vm1189_vm0, %v1188_v2 }
  0x2f   : >> { %1136 = vmatmul.mubr.msk.bf16.vlgmr.msra.gmra.mrb[12].mxu1 %vm208_vm1, %v622_v37 }
  0x34   : >> { %1130 = vmatmul.mubr.msk.bf16.vlgmr.msra.gmra.mrb[12].mxu0 %vm208_vm1, %v1035_v25 }
  0xea   : >> { %v295_v38 = vpop.f32.mrb[0].mxu1 }
  0xeb   : >> { %v1101_v39 = vpop.f32.mrb[1].mxu1 }
  0xec   : >> { %v298_v40 = vpop.f32.mrb[2].mxu1 }
  0xed   : >> { %v1102_v41 = vpop.f32.mrb[3].mxu1 }
  0xef   : >> { %v246_v42 = vpop.f32.mrb[0].mxu0 }
  0xf0   : >> { %v296_v43 = vadd.f32 %v295_v38, %v246_v42  ;;  %v1095_v44 = vpop.f32.mrb[1].mxu0 }
  0xf1   : >> { %v249_v45 = vpop.f32.mrb[2].mxu0 }
  0xf2   : >> { %v418_v46 = vpop.f32.mrb[4].mxu1  ;;  %v1096_v47 = vpop.f32.mrb[3].mxu0 }
  0xf3   : >> { %v1113_v48 = vpop.f32.mrb[5].mxu1 }
  0xf4   : >> { %v421_v49 = vpop.f32.mrb[6].mxu1 }
  0xf5   : >> { %v1114_v50 = vpop.f32.mrb[7].mxu1 }
  0xf7   : >> { %v353_v51 = vpop.f32.mrb[4].mxu0 }
  0xf8   : >> { %v359_v52 = vadd.f32 %v353_v51, %v296_v43  ;;  %v1107_v53 = vpop.f32.mrb[5].mxu0 }
  0xf9   : >> { %v356_v54 = vpop.f32.mrb[6].mxu0 }
  0xfa   : >> { %v542_v55 = vpop.f32.mrb[8].mxu1  ;;  %v1108_v56 = vpop.f32.mrb[7].mxu0  ;;  %v424_v57 = vadd.f32 %v418_v46, %v359_v52 }
  0xfb   : >> { %v1125_v58 = vpop.f32.mrb[9].mxu1 }
  0xfc   : >> { %v545_v59 = vpop.f32.mrb[10].mxu1 }
  0xfd   : >> { %v1126_v60 = vpop.f32.mrb[11].mxu1 }
  0xff   : >> { %v477_v61 = vpop.f32.mrb[8].mxu0 }
 0x100   : >> { %v483_v62 = vadd.f32 %v477_v61, %v424_v57  ;;  %v1119_v63 = vpop.f32.mrb[9].mxu0 }
 0x101   : >> { %v480_v1 = vpop.f32.mrb[10].mxu0 }
 0x102   : >> { %v666_v2 = vpop.f32.mrb[12].mxu1  ;;  %v1120_v3 = vpop.f32.mrb[11].mxu0  ;;  %v548_v4 = vadd.f32 %v542_v55, %v483_v62 }
 0x103   : >> { %v1137_v5 = vpop.f32.mrb[13].mxu1 }
 0x104   : >> { %v669_v6 = vpop.f32.mrb[14].mxu1 }
 0x105   : >> { %v1138_v7 = vpop.f32.mrb[15].mxu1 }
 0x107   : >> { %v601_v8 = vpop.f32.mrb[12].mxu0 }
 0x108   : >> { %v607_v9 = vadd.f32 %v601_v8, %v548_v4  ;;  %v1131_v10 = vpop.f32.mrb[13].mxu0 }
 0x109   : >> { %v604_v11 = vpop.f32.mrb[14].mxu0 }
 0x10a   : >> { %v672_v12 = vadd.f32 %v666_v2, %v607_v9  ;;  %v1132_v13 = vpop.f32.mrb[15].mxu0  ;;  %177 = sbr.rel (!%p175_p4) target bundleno = 17 (0x11), region = 81 }
 0x10c   : >> { %v679_v14 = vadd.f32 %v1221_v0, %v672_v12 }
 0x10e   : >> { %v680_v15 = vpack.c.bf16 %v679_v14, %v679_v14 }
 0x110   : >> { %684 = vst.msk [vmem:[%s682_s18] sm:$0xf] %vm683_vm2, %v680_v15 }
 0x117   : > { %v1304_v16 = vld [vmem:[%s1226_s20] sm:$0xff]   ;;  %v1307_v17 = vld [vmem:[%s1226_s20 + $0x8] sm:$0xff]   ;;  %v1310_v18 = vld [vmem:[%s1226_s20 + $0x10] sm:$0xff]  }
 0x118   : > { %v1058_v19 = vunpack.c.l.bf16 %v1304_v16  ;;  %v1059_v20 = vunpack.c.h.bf16 %v1304_v16  ;;  %v1062_v21 = vunpack.c.l.bf16 %v1307_v17  ;;  %v1063_v22 = vunpack.c.h.bf16 %v1307_v17  ;;  %v1317_v23 = vld [vmem:[%s1226_s20 + $0x18] sm:$0xff]  }
 0x119   : > { %v1066_v0 = vunpack.c.l.bf16 %v1310_v18  ;;  %v1067_v24 = vunpack.c.h.bf16 %v1310_v18  ;;  %v1070_v25 = vunpack.c.l.bf16 %v1317_v23  ;;  %v1071_v26 = vunpack.c.h.bf16 %v1317_v23 }
 0x11a   : > { %v702_v27 = vsel %vm208_vm1, %v1058_v19, 0.0  ;;  %v709_v28 = vsel %vm208_vm1, %v1059_v20, 0.0  ;;  %v716_v29 = vsel %vm208_vm1, %v1062_v21, 0.0  ;;  %v723_v30 = vsel %vm208_vm1, %v1063_v22, 0.0 }
 0x11b   : > { %v703_v31 = vrot.slane %v702_v27, 4  ;;  %v710_v32 = vrot.slane %v709_v28, 4  ;;  %v717_v33 = vrot.slane %v716_v29, 4  ;;  %v724_v34 = vrot.slane %v723_v30, 4 }
 0x11c   : > { %v730_v35 = vsel %vm208_vm1, %v1066_v0, 0.0  ;;  %v737_v36 = vsel %vm208_vm1, %v1067_v24, 0.0  ;;  %v744_v37 = vsel %vm208_vm1, %v1070_v25, 0.0  ;;  %v751_v38 = vsel %vm208_vm1, %v1071_v26, 0.0 }
 0x11d   : > { %v704_v39 = vadd.f32 %v703_v31, %v702_v27  ;;  %v711_v40 = vadd.f32 %v710_v32, %v709_v28  ;;  %v718_v41 = vadd.f32 %v717_v33, %v716_v29  ;;  %v725_v42 = vadd.f32 %v724_v34, %v723_v30 }
 0x11e   : > { %v731_v43 = vrot.slane %v730_v35, 4  ;;  %v738_v44 = vrot.slane %v737_v36, 4  ;;  %v745_v45 = vrot.slane %v744_v37, 4  ;;  %v752_v46 = vrot.slane %v751_v38, 4 }
 0x11f   : > { %v705_v47 = vrot.slane %v704_v39, 2  ;;  %v712_v48 = vrot.slane %v711_v40, 2  ;;  %v719_v49 = vrot.slane %v718_v41, 2  ;;  %v726_v50 = vrot.slane %v725_v42, 2 }
 0x120   : > { %v732_v51 = vadd.f32 %v731_v43, %v730_v35  ;;  %v739_v52 = vadd.f32 %v738_v44, %v737_v36  ;;  %v746_v53 = vadd.f32 %v745_v45, %v744_v37  ;;  %v753_v54 = vadd.f32 %v752_v46, %v751_v38 }
 0x121   : > { %v706_v55 = vadd.f32 %v705_v47, %v704_v39  ;;  %v713_v56 = vadd.f32 %v712_v48, %v711_v40  ;;  %v720_v57 = vadd.f32 %v719_v49, %v718_v41  ;;  %v727_v58 = vadd.f32 %v726_v50, %v725_v42 }
 0x122   : > { %v733_v59 = vrot.slane %v732_v51, 2  ;;  %v740_v60 = vrot.slane %v739_v52, 2  ;;  %v747_v61 = vrot.slane %v746_v53, 2  ;;  %v754_v62 = vrot.slane %v753_v54, 2 }
 0x123   : > { %v707_v63 = vrot.slane %v706_v55, 1  ;;  %v714_v1 = vrot.slane %v713_v56, 1  ;;  %v721_v2 = vrot.slane %v720_v57, 1  ;;  %v728_v3 = vrot.slane %v727_v58, 1 }
 0x124   : > { %v734_v4 = vadd.f32 %v733_v59, %v732_v51  ;;  %v741_v5 = vadd.f32 %v740_v60, %v739_v52  ;;  %v748_v6 = vadd.f32 %v747_v61, %v746_v53  ;;  %v755_v13 = vadd.f32 %v754_v62, %v753_v54 }
 0x125   : > { %v708_v7 = vadd.f32 %v707_v63, %v706_v55  ;;  %v715_v8 = vadd.f32 %v714_v1, %v713_v56  ;;  %v722_v9 = vadd.f32 %v721_v2, %v720_v57  ;;  %v729_v10 = vadd.f32 %v728_v3, %v727_v58 }
 0x126   : > { %v735_v11 = vrot.slane %v734_v4, 1  ;;  %v742_v12 = vrot.slane %v741_v5, 1  ;;  %v749_v28 = vrot.slane %v748_v6, 1  ;;  %v756_v32 = vrot.slane %v755_v13, 1 }
 0x127   : > { %v758_v14 = vsel %vm208_vm1, %v708_v7, 0.0  ;;  %v759_v15 = vsel %vm208_vm1, %v715_v8, 0.0  ;;  %v761_v29 = vsel %vm208_vm1, %v722_v9, 0.0  ;;  %v763_v33 = vsel %vm208_vm1, %v729_v10, 0.0 }
 0x128   : > { %v736_v27 = vadd.f32 %v735_v11, %v734_v4  ;;  %v760_v30 = vadd.f32 %v759_v15, %v758_v14  ;;  %v743_v31 = vadd.f32 %v742_v12, %v741_v5  ;;  %v750_v35 = vadd.f32 %v749_v28, %v748_v6 }
 0x129   : > { %v757_v38 = vadd.f32 %v756_v32, %v755_v13 }
 0x12a   : > { %v762_v34 = vadd.f32 %v761_v29, %v760_v30  ;;  %v765_v36 = vsel %vm208_vm1, %v736_v27, 0.0  ;;  %v767_v39 = vsel %vm208_vm1, %v743_v31, 0.0  ;;  %v769_v41 = vsel %vm208_vm1, %v750_v35, 0.0 }
 0x12b   : > { %v771_v43 = vsel %vm208_vm1, %v757_v38, 0.0 }
 0x12c   : > { %v764_v37 = vadd.f32 %v763_v33, %v762_v34 }
 0x12e   : > { %v766_v40 = vadd.f32 %v765_v36, %v764_v37 }
 0x130   : > { %v768_v42 = vadd.f32 %v767_v39, %v766_v40 }
 0x132   : > { %v770_v44 = vadd.f32 %v769_v41, %v768_v42 }
 0x134   : > { %v772_v45 = vadd.f32 %v771_v43, %v770_v44 }
 0x136   : > { %v773_v46 = vmul.f32 0.015625, %v772_v45 }
 0x138   : > { %v1357_v47 = vsub.f32 %v1058_v19, %v773_v46  ;;  %v1361_v48 = vsub.f32 %v1059_v20, %v773_v46  ;;  %v1365_v49 = vsub.f32 %v1062_v21, %v773_v46  ;;  %v1369_v50 = vsub.f32 %v1063_v22, %v773_v46 }
 0x139   : > { %v1373_v51 = vsub.f32 %v1066_v0, %v773_v46  ;;  %v1377_v19 = vsub.f32 %v1067_v24, %v773_v46  ;;  %v1381_v16 = vsub.f32 %v1070_v25, %v773_v46  ;;  %v1385_v20 = vsub.f32 %v1071_v26, %v773_v46 }
 0x13a   : > { %v782_v17 = vmul.f32 %v1357_v47, %v1357_v47  ;;  %v783_v21 = vmul.f32 %v1361_v48, %v1361_v48  ;;  %v784_v22 = vmul.f32 %v1365_v49, %v1365_v49  ;;  %v785_v18 = vmul.f32 %v1369_v50, %v1369_v50 }
 0x13b   : > { %v786_v0 = vmul.f32 %v1373_v51, %v1373_v51  ;;  %v787_v23 = vmul.f32 %v1377_v19, %v1377_v19  ;;  %v788_v24 = vmul.f32 %v1381_v16, %v1381_v16  ;;  %v789_v25 = vmul.f32 %v1385_v20, %v1385_v20 }
 0x13c   : > { %v790_v26 = vsel %vm208_vm1, %v782_v17, 0.0  ;;  %v797_v52 = vsel %vm208_vm1, %v783_v21, 0.0  ;;  %v804_v53 = vsel %vm208_vm1, %v784_v22, 0.0  ;;  %v811_v54 = vsel %vm208_vm1, %v785_v18, 0.0 }
 0x13d   : > { %v791_v55 = vrot.slane %v790_v26, 4  ;;  %v798_v56 = vrot.slane %v797_v52, 4  ;;  %v805_v57 = vrot.slane %v804_v53, 4  ;;  %v812_v58 = vrot.slane %v811_v54, 4 }
 0x13e   : > { %v818_v59 = vsel %vm208_vm1, %v786_v0, 0.0  ;;  %v825_v60 = vsel %vm208_vm1, %v787_v23, 0.0  ;;  %v832_v61 = vsel %vm208_vm1, %v788_v24, 0.0  ;;  %v839_v62 = vsel %vm208_vm1, %v789_v25, 0.0 }
 0x13f   : > { %v792_v63 = vadd.f32 %v791_v55, %v790_v26  ;;  %v799_v1 = vadd.f32 %v798_v56, %v797_v52  ;;  %v806_v2 = vadd.f32 %v805_v57, %v804_v53  ;;  %v813_v3 = vadd.f32 %v812_v58, %v811_v54 }
 0x140   : > { %v819_v4 = vrot.slane %v818_v59, 4  ;;  %v826_v5 = vrot.slane %v825_v60, 4  ;;  %v833_v6 = vrot.slane %v832_v61, 4  ;;  %v840_v7 = vrot.slane %v839_v62, 4 }
 0x141   : > { %v793_v8 = vrot.slane %v792_v63, 2  ;;  %v800_v9 = vrot.slane %v799_v1, 2  ;;  %v807_v10 = vrot.slane %v806_v2, 2  ;;  %v814_v11 = vrot.slane %v813_v3, 2 }
 0x142   : > { %v820_v12 = vadd.f32 %v819_v4, %v818_v59  ;;  %v827_v13 = vadd.f32 %v826_v5, %v825_v60  ;;  %v834_v14 = vadd.f32 %v833_v6, %v832_v61  ;;  %v841_v15 = vadd.f32 %v840_v7, %v839_v62 }
 0x143   : > { %v794_v27 = vadd.f32 %v793_v8, %v792_v63  ;;  %v801_v28 = vadd.f32 %v800_v9, %v799_v1  ;;  %v808_v29 = vadd.f32 %v807_v10, %v806_v2  ;;  %v815_v30 = vadd.f32 %v814_v11, %v813_v3 }
 0x144   : > { %v821_v31 = vrot.slane %v820_v12, 2  ;;  %v828_v32 = vrot.slane %v827_v13, 2  ;;  %v835_v33 = vrot.slane %v834_v14, 2  ;;  %v842_v34 = vrot.slane %v841_v15, 2 }
 0x145   : > { %v795_v35 = vrot.slane %v794_v27, 1  ;;  %v802_v36 = vrot.slane %v801_v28, 1  ;;  %v809_v37 = vrot.slane %v808_v29, 1  ;;  %v816_v38 = vrot.slane %v815_v30, 1 }
 0x146   : > { %v822_v39 = vadd.f32 %v821_v31, %v820_v12  ;;  %v829_v40 = vadd.f32 %v828_v32, %v827_v13  ;;  %v836_v41 = vadd.f32 %v835_v33, %v834_v14  ;;  %v843_v21 = vadd.f32 %v842_v34, %v841_v15 }
 0x147   : > { %v796_v42 = vadd.f32 %v795_v35, %v794_v27  ;;  %v803_v43 = vadd.f32 %v802_v36, %v801_v28  ;;  %v810_v44 = vadd.f32 %v809_v37, %v808_v29  ;;  %v817_v45 = vadd.f32 %v816_v38, %v815_v30 }
 0x148   : > { %v823_v46 = vrot.slane %v822_v39, 1  ;;  %v830_v17 = vrot.slane %v829_v40, 1  ;;  %v837_v23 = vrot.slane %v836_v41, 1  ;;  %v844_v52 = vrot.slane %v843_v21, 1 }
 0x149   : > { %v846_v22 = vsel %vm208_vm1, %v796_v42, 0.0  ;;  %v847_v18 = vsel %vm208_vm1, %v803_v43, 0.0  ;;  %v849_v24 = vsel %vm208_vm1, %v810_v44, 0.0  ;;  %v851_v53 = vsel %vm208_vm1, %v817_v45, 0.0 }
 0x14a   : > { %v824_v0 = vadd.f32 %v823_v46, %v822_v39  ;;  %v848_v25 = vadd.f32 %v847_v18, %v846_v22  ;;  %v831_v26 = vadd.f32 %v830_v17, %v829_v40  ;;  %v838_v55 = vadd.f32 %v837_v23, %v836_v41 }
 0x14b   : > { %v845_v58 = vadd.f32 %v844_v52, %v843_v21 }
 0x14c   : > { %v850_v54 = vadd.f32 %v849_v24, %v848_v25  ;;  %v853_v56 = vsel %vm208_vm1, %v824_v0, 0.0  ;;  %v855_v59 = vsel %vm208_vm1, %v831_v26, 0.0  ;;  %v857_v61 = vsel %vm208_vm1, %v838_v55, 0.0 }
 0x14d   : > { %v859_v63 = vsel %vm208_vm1, %v845_v58, 0.0 }
 0x14e   : > { %v852_v57 = vadd.f32 %v851_v53, %v850_v54 }
 0x150   : > { %v854_v60 = vadd.f32 %v853_v56, %v852_v57 }
 0x152   : > { %v856_v62 = vadd.f32 %v855_v59, %v854_v60 }
 0x154   : > { %v858_v1 = vadd.f32 %v857_v61, %v856_v62 }
 0x156   : > { %v860_v2 = vadd.f32 %v859_v63, %v858_v1 }
 0x158   : > { %v861_v3 = vmul.f32 0.015625, %v860_v2 }
 0x15a   : > { %v862_v4 = vadd.f32 1e-05, %v861_v3 }
 0x15c   : > { %1170 = vrsqrt.f32 %v862_v4 }
 0x166   : > { %v1171_v5 = vpop.eup %1170 }
 0x167   : > { %v864_v6 = vmul.f32 %v1171_v5, %v1357_v47  ;;  %v865_v7 = vmul.f32 %v1171_v5, %v1361_v48  ;;  %v866_v8 = vmul.f32 %v1171_v5, %v1365_v49  ;;  %v867_v9 = vmul.f32 %v1171_v5, %v1369_v50 }
 0x168   : > { %v868_v10 = vmul.f32 %v1171_v5, %v1373_v51  ;;  %v869_v11 = vmul.f32 %v1171_v5, %v1377_v19  ;;  %v870_v12 = vmul.f32 %v1171_v5, %v1381_v16  ;;  %v871_v13 = vmul.f32 %v1171_v5, %v1385_v20 }
 0x169   : > { %vm872_vm3 = vcmp.ge.f32.partialorder %v864_v6, 0.0  ;;  %v880_v14 = vmul.f32 0.2, %v864_v6  ;;  %vm873_vm4 = vcmp.ge.f32.partialorder %v865_v7, 0.0  ;;  %v881_v15 = vmul.f32 0.2, %v865_v7 }
 0x16a   : > { %vm874_vm5 = vcmp.ge.f32.partialorder %v866_v8, 0.0  ;;  %v882_v47 = vmul.f32 0.2, %v866_v8  ;;  %vm875_vm6 = vcmp.ge.f32.partialorder %v867_v9, 0.0  ;;  %v883_v48 = vmul.f32 0.2, %v867_v9 }
 0x16b   : > { %v888_v49 = vsel %vm872_vm3, %v864_v6, %v880_v14  ;;  %v889_v50 = vsel %vm873_vm4, %v865_v7, %v881_v15  ;;  %vm876_vm7 = vcmp.ge.f32.partialorder %v868_v10, 0.0  ;;  %v884_v51 = vmul.f32 0.2, %v868_v10 }
 0x16c   : > { %v896_v19 = vpack.c.bf16 %v888_v49, %v888_v49  ;;  %v897_v16 = vpack.c.bf16 %v889_v50, %v889_v50  ;;  %v890_v27 = vsel %vm874_vm5, %v866_v8, %v882_v47  ;;  %v891_v20 = vsel %vm875_vm6, %v867_v9, %v883_v48 }
 0x16d   : > { %v898_v28 = vpack.c.bf16 %v890_v27, %v890_v27  ;;  %v899_v29 = vpack.c.bf16 %v891_v20, %v891_v20  ;;  %v892_v30 = vsel %vm876_vm7, %v868_v10, %v884_v51  ;;  %vm877_vm8 = vcmp.ge.f32.partialorder %v869_v11, 0.0 }
 0x16e   : > { %905 = vst.msk [vmem:[%s1226_s20] sm:$0xf] %vm683_vm2, %v896_v19  ;;  %906 = vst.msk [vmem:[%s1226_s20 + $0x4] sm:$0xf] %vm683_vm2, %v897_v16  ;;  %v900_v31 = vpack.c.bf16 %v892_v30, %v892_v30  ;;  %v885_v32 = vmul.f32 0.2, %v869_v11 }
 0x16f   : > { %vm878_vm9 = vcmp.ge.f32.partialorder %v870_v12, 0.0  ;;  %v886_v33 = vmul.f32 0.2, %v870_v12  ;;  %907 = vst.msk [vmem:[%s1226_s20 + $0x8] sm:$0xf] %vm683_vm2, %v898_v28  ;;  %vm879_vm10 = vcmp.ge.f32.partialorder %v871_v13, 0.0 }
 0x170   : > { %908 = vst.msk [vmem:[%s1226_s20 + $0xc] sm:$0xf] %vm683_vm2, %v899_v29  ;;  %v887_v34 = vmul.f32 0.2, %v871_v13  ;;  %909 = vst.msk [vmem:[%s1226_s20 + $0x10] sm:$0xf] %vm683_vm2, %v900_v31  ;;  %v893_v35 = vsel %vm877_vm8, %v869_v11, %v885_v32 }
 0x171   : > { %v894_v36 = vsel %vm878_vm9, %v870_v12, %v886_v33  ;;  %v901_v37 = vpack.c.bf16 %v893_v35, %v893_v35 }
 0x172   : > { %v902_v38 = vpack.c.bf16 %v894_v36, %v894_v36  ;;  %v895_v39 = vsel %vm879_vm10, %v871_v13, %v887_v34 }
 0x173   : > { %v903_v40 = vpack.c.bf16 %v895_v39, %v895_v39  ;;  %910 = vst.msk [vmem:[%s1226_s20 + $0x14] sm:$0xf] %vm683_vm2, %v901_v37 }
 0x174   : > { %911 = vst.msk [vmem:[%s1226_s20 + $0x18] sm:$0xf] %vm683_vm2, %v902_v38 }
 0x175   : > { %912 = vst.msk [vmem:[%s1226_s20 + $0x1c] sm:$0xf] %vm683_vm2, %v903_v40 }
 0x176 PF: > { %s13_s12 = sadd.s32 1, %s1182_s12  }
 0x177   : > { %p10_p5 = scmp.ge.s32.totalorder %s13_s12, 4  }
 0x179   :  { %12 = sbr.rel (!%p10_p5) target bundleno = 1 (0x1), region = 92 }

// kernel: discriminator_forward.7
= control target key start
LH: loop header
LB: loop body
LE: loop exit
PB: predicated region body
PF: predicated region fallthrough
CT: control target
= control target key end

     0   :  { %s1177_s12 = smov 0   ;;  %s1338_s0 = inlined_call_operand.vmem [shape: bf16[2,10,5,32], index: 0, kind: input, shape index: {}]   ;;  %s1339_s1 = inlined_call_operand.vmem [shape: bf16[8,32,32], index: 1, kind: input, shape index: {}]   ;;  %s1340_s2 = inlined_call_operand.vmem [shape: f32[1,32], index: 2, kind: input, shape index: {}]   ;;  %s1341_s3 = inlined_call_operand.vmem [shape: bf16[2,4,4,32], index: 3, kind: output, shape index: {}]  }
   0x1 LB: > { %s926_s13 = sadd.s32 4294967295, %s1149_s12   ;;  %p930_p0 = scmp.ge.s32.totalorder %s1149_s12, 1  ;;  %s1149_s12 = sphi %s1177_s12, %s13_s12  }
   0x2   : > { %p137_p1 = scmp.lt.s32.totalorder %s1149_s12, 3 }
   0x4   : > { %p138_p2 = pnand %p930_p0, %p137_p1 }
   0x5   : > { %p161_p3 = scmp.lt.s32.totalorder (!%p138_p2), %s926_s13, 1  ;;  %v1188_v0 = vld [vmem:[%s1340_s2] ss:$0 sm:$0xff] (!%p138_p2)  ;;  %s1200_s24 = smov (!%p138_p2), 0  }
   0x6   : > { %141 = sbr.rel (%p138_p2) target bundleno = 353 (0x161), region = 32 }
   0xd   : > { %s1343_s13 = smov (!%p161_p3, %s926_s13), 1 }
   0xe   : > { %s1098_s16 = smul.u32 40, %s1343_s13  ;;  %s1005_s17 = sshll.u32 %s1343_s13, 3 }
   0xf   : > { %s1193_s20 = scalar_lea.vmem %s1341_s3, %s1005_s17 }
  0x10   : > { %s1198_s23 = scalar_lea.vmem %s1338_s0, %s1098_s16 }
  0x11 LB: >> { %v1117_v1 = vld [vmem:[%s1339_s1 + $0x10] sm:$0xff]   ;;  %v1155_v2 = vmov 0.0   ;;  %v1118_v3 = vld [vmem:[%s1339_s1] sm:$0xff]   ;;  %v1119_v4 = vld [vmem:[%s1339_s1 + $0x18] sm:$0xff]   ;;  %vm1156_vm0 = vmmov 0   ;;  %s1006_s4 = sshll.u32 %s1153_s24, 3  ;;  %s1153_s24 = sphi %s1200_s24, %s178_s24  }
  0x12   : >> { %1034 = vmatprep.subr.bf16.mxu0 %v1155_v2  ;;  %1042 = vmatprep.subr.bf16.mxu1 %v1155_v2  ;;  %v1120_v5 = vld [vmem:[%s1339_s1 + $0x8] sm:$0xff]   ;;  %s181_s7 = scalar_lea.vmem %s1198_s23, %s1006_s4  ;;  %vm214_vm1 = vcmask 261120   ;;  %v1126_v13 = vld [vmem:[%s1339_s1 + $0x30] sm:$0xff]   ;;  %v1125_v17 = vld [vmem:[%s1339_s1 + $0x20] sm:$0xff]   ;;  %s1002_s9 = sshll.u32 %s1153_s24, 1  ;;  %vm731_vm2 = vcmask 254976  }
  0x13   : >> { %1035 = vmatpush3.bf16.msra.mxu0 %v1117_v1  ;;  %1046 = vmatprep.mubr.msk.bf16.mxu1 %vm1156_vm0, %v1155_v2  ;;  %v182_v6 = vld [vmem:[%s181_s7] sm:$0x7]  ;;  %v949_v7 = vld [vmem:[%s181_s7 + $0x4] sm:$0x7]  ;;  %v1227_v10 = vld [vmem:[%s181_s7 + $0x8] sm:$0x7]  ;;  %s730_s10 = scalar_lea.vmem %s1193_s20, %s1002_s9 }
  0x14   : >> { %1043 = vmatpush3.bf16.msra.mxu1 %v1118_v3  ;;  %1036 = vmatprep.subr.bf16.mxu0 %v1155_v2  ;;  %v940_v8 = vcombine.low %v182_v6, %v182_v6  ;;  %v961_v9 = vcombine.low %v949_v7, %v949_v7  ;;  %v979_v16 = vcombine.low %v1227_v10, %v1227_v10  ;;  %v1128_v20 = vld [vmem:[%s1339_s1 + $0x38] sm:$0xff]   ;;  %v985_v22 = vld [vmem:[%s181_s7 + $0xc] sm:$0x7]  ;;  %v1130_v26 = vld [vmem:[%s1339_s1 + $0x50] sm:$0xff]   ;;  %s178_s24 = sadd.s32 1, %s1153_s24  }
  0x15   : >> { %1044 = vmatprep.subr.bf16.mxu1 %v1155_v2  ;;  %1038 = vmatprep.mubr.msk.bf16.mxu0 %vm1156_vm0, %v1155_v2  ;;  %v1127_v23 = vld [vmem:[%s1339_s1 + $0x28] sm:$0xff]   ;;  %v997_v27 = vcombine.low %v985_v22, %v985_v22  ;;  %v1129_v28 = vld [vmem:[%s1339_s1 + $0x40] sm:$0xff]   ;;  %v1132_v31 = vld [vmem:[%s1339_s1 + $0x58] sm:$0xff]   ;;  %p175_p4 = scmp.ge.s32.totalorder %s178_s24, 4  }
  0x16   : >> { %v196_v11 = vshrl.u32 %v940_v8, 16  ;;  %v198_v12 = vshll.u32 %v940_v8, 16  ;;  %v389_v15 = vshll.u32 %v961_v9, 16  ;;  %v387_v18 = vshrl.u32 %v961_v9, 16  ;;  %v1131_v32 = vld [vmem:[%s1339_s1 + $0x48] sm:$0xff]   ;;  %v1134_v35 = vld [vmem:[%s1339_s1 + $0x70] sm:$0xff]  }
  0x17   : >> { %1037 = vmatpush3.bf16.msra.mxu0 %v1119_v4  ;;  %v525_v25 = vshll.u32 %v979_v16, 16  ;;  %v523_v29 = vshrl.u32 %v979_v16, 16  ;;  %v661_v34 = vshll.u32 %v997_v27, 16  ;;  %v1133_v36 = vld [vmem:[%s1339_s1 + $0x60] sm:$0xff]   ;;  %v659_v37 = vshrl.u32 %v997_v27, 16  ;;  %v1136_v39 = vld [vmem:[%s1339_s1 + $0x78] sm:$0xff]  }
  0x18   : >> { %1045 = vmatpush3.bf16.msra.mxu1 %v1120_v5  ;;  %1050 = vmatprep.subr.bf16.mxu0 %v1155_v2  ;;  %v200_v14 = vrot.slane %v198_v12, 1  ;;  %v391_v21 = vrot.slane %v389_v15, 1  ;;  %v1135_v40 = vld [vmem:[%s1339_s1 + $0x68] sm:$0xff]   ;;  %vm741_vm3 = vcmask (%p175_p4), 257024  }
  0x19   : >> { %1058 = vmatprep.subr.bf16.mxu1 %v1155_v2  ;;  %v527_v30 = vrot.slane %v525_v25, 1  ;;  %v663_v38 = vrot.slane %v661_v34, 1 }
  0x1a   : >> { %v201_v19 = vor.u32 %v200_v14, %v196_v11  ;;  %v392_v24 = vor.u32 %v391_v21, %v387_v18 }
  0x1b   : >> { %1047 = vmatmul.mubr.msk.bf16.vlgmr.msra.gmra.mrb[0].mxu1 %vm214_vm1, %v182_v6  ;;  %v528_v33 = vor.u32 %v527_v30, %v523_v29  ;;  %v664_v41 = vor.u32 %v663_v38, %v659_v37 }
  0x1c   : >> { %1059 = vmatpush3.bf16.msra.mxu1 %v1126_v13  ;;  %1062 = vmatprep.mubr.msk.bf16.mxu1 %vm1156_vm0, %v1155_v2 }
  0x1d   : >> { %1060 = vmatprep.subr.bf16.mxu1 %v1155_v2  ;;  %1039 = vmatmul.mubr.msk.bf16.vlgmr.msra.gmra.mrb[0].mxu0 %vm214_vm1, %v201_v19 }
  0x1e   : >> { %1051 = vmatpush3.bf16.msra.mxu0 %v1125_v17  ;;  %1054 = vmatprep.mubr.msk.bf16.mxu0 %vm1156_vm0, %v1155_v2 }
  0x1f   : >> { %1052 = vmatprep.subr.bf16.mxu0 %v1155_v2 }
  0x20   : >> { %1061 = vmatpush3.bf16.msra.mxu1 %v1128_v20 }
  0x21   : >> { %1074 = vmatprep.subr.bf16.mxu1 %v1155_v2 }
  0x22   : >> { %1053 = vmatpush3.bf16.msra.mxu0 %v1127_v23 }
  0x23   : >> { %1063 = vmatmul.mubr.msk.bf16.vlgmr.msra.gmra.mrb[4].mxu1 %vm214_vm1, %v392_v24  ;;  %1066 = vmatprep.subr.bf16.mxu0 %v1155_v2 }
  0x24   : >> { %1075 = vmatpush3.bf16.msra.mxu1 %v1130_v26  ;;  %1078 = vmatprep.mubr.msk.bf16.mxu1 %vm1156_vm0, %v1155_v2 }
  0x25   : >> { %1076 = vmatprep.subr.bf16.mxu1 %v1155_v2  ;;  %1055 = vmatmul.mubr.msk.bf16.vlgmr.msra.gmra.mrb[4].mxu0 %vm214_vm1, %v949_v7 }
  0x26   : >> { %1067 = vmatpush3.bf16.msra.mxu0 %v1129_v28  ;;  %1070 = vmatprep.mubr.msk.bf16.mxu0 %vm1156_vm0, %v1155_v2 }
  0x27   : >> { %1068 = vmatprep.subr.bf16.mxu0 %v1155_v2 }
  0x28   : >> { %1077 = vmatpush3.bf16.msra.mxu1 %v1132_v31 }
  0x29   : >> { %1090 = vmatprep.subr.bf16.mxu1 %v1155_v2 }
  0x2a   : >> { %1069 = vmatpush3.bf16.msra.mxu0 %v1131_v32 }
  0x2b   : >> { %1079 = vmatmul.mubr.msk.bf16.vlgmr.msra.gmra.mrb[8].mxu1 %vm214_vm1, %v528_v33  ;;  %1082 = vmatprep.subr.bf16.mxu0 %v1155_v2 }
  0x2c   : >> { %1091 = vmatpush3.bf16.msra.mxu1 %v1134_v35  ;;  %1094 = vmatprep.mubr.msk.bf16.mxu1 %vm1156_vm0, %v1155_v2 }
  0x2d   : >> { %1092 = vmatprep.subr.bf16.mxu1 %v1155_v2  ;;  %1071 = vmatmul.mubr.msk.bf16.vlgmr.msra.gmra.mrb[8].mxu0 %vm214_vm1, %v1227_v10 }
  0x2e   : >> { %1083 = vmatpush3.bf16.msra.mxu0 %v1133_v36  ;;  %1086 = vmatprep.mubr.msk.bf16.mxu0 %vm1156_vm0, %v1155_v2 }
  0x2f   : >> { %1084 = vmatprep.subr.bf16.mxu0 %v1155_v2 }
  0x30   : >> { %1093 = vmatpush3.bf16.msra.mxu1 %v1136_v39 }
  0x32   : >> { %1085 = vmatpush3.bf16.msra.mxu0 %v1135_v40 }
  0x33   : >> { %1095 = vmatmul.mubr.msk.bf16.vlgmr.msra.gmra.mrb[12].mxu1 %vm214_vm1, %v664_v41 }
  0x35   : >> { %1087 = vmatmul.mubr.msk.bf16.vlgmr.msra.gmra.mrb[12].mxu0 %vm214_vm1, %v985_v22 }
  0xee   : >> { %v307_v42 = vpop.f32.mrb[0].mxu1 }
  0xef   : >> { %v1048_v43 = vpop.f32.mrb[1].mxu1 }
  0xf0   : >> { %v310_v44 = vpop.f32.mrb[2].mxu1  ;;  %v252_v45 = vpop.f32.mrb[0].mxu0 }
  0xf1   : >> { %v1049_v46 = vpop.f32.mrb[3].mxu1  ;;  %v308_v47 = vadd.f32 %v307_v42, %v252_v45  ;;  %v1040_v48 = vpop.f32.mrb[1].mxu0 }
  0xf2   : >> { %v255_v49 = vpop.f32.mrb[2].mxu0 }
  0xf3   : >> { %v1041_v50 = vpop.f32.mrb[3].mxu0 }
  0xf6   : >> { %v442_v51 = vpop.f32.mrb[4].mxu1 }
  0xf7   : >> { %v1064_v52 = vpop.f32.mrb[5].mxu1 }
  0xf8   : >> { %v445_v53 = vpop.f32.mrb[6].mxu1  ;;  %v371_v54 = vpop.f32.mrb[4].mxu0 }
  0xf9   : >> { %v1065_v55 = vpop.f32.mrb[7].mxu1  ;;  %v377_v56 = vadd.f32 %v371_v54, %v308_v47  ;;  %v1056_v57 = vpop.f32.mrb[5].mxu0 }
  0xfa   : >> { %v374_v58 = vpop.f32.mrb[6].mxu0 }
  0xfb   : >> { %v1057_v59 = vpop.f32.mrb[7].mxu0  ;;  %v448_v60 = vadd.f32 %v442_v51, %v377_v56 }
  0xfe   : >> { %v578_v61 = vpop.f32.mrb[8].mxu1 }
  0xff   : >> { %v1080_v62 = vpop.f32.mrb[9].mxu1 }
 0x100   : >> { %v581_v63 = vpop.f32.mrb[10].mxu1  ;;  %v507_v1 = vpop.f32.mrb[8].mxu0 }
 0x101   : >> { %v1081_v2 = vpop.f32.mrb[11].mxu1  ;;  %v513_v3 = vadd.f32 %v507_v1, %v448_v60  ;;  %v1072_v4 = vpop.f32.mrb[9].mxu0 }
 0x102   : >> { %v510_v5 = vpop.f32.mrb[10].mxu0 }
 0x103   : >> { %v1073_v6 = vpop.f32.mrb[11].mxu0  ;;  %v584_v7 = vadd.f32 %v578_v61, %v513_v3 }
 0x106   : >> { %v714_v8 = vpop.f32.mrb[12].mxu1 }
 0x107   : >> { %v1096_v9 = vpop.f32.mrb[13].mxu1 }
 0x108   : >> { %v717_v10 = vpop.f32.mrb[14].mxu1  ;;  %v643_v11 = vpop.f32.mrb[12].mxu0 }
 0x109   : >> { %v1097_v12 = vpop.f32.mrb[15].mxu1  ;;  %v649_v13 = vadd.f32 %v643_v11, %v584_v7  ;;  %v1088_v14 = vpop.f32.mrb[13].mxu0 }
 0x10a   : >> { %v646_v15 = vpop.f32.mrb[14].mxu0 }
 0x10b   : >> { %v720_v16 = vadd.f32 %v714_v8, %v649_v13  ;;  %v1089_v17 = vpop.f32.mrb[15].mxu0  ;;  %177 = sbr.rel (!%p175_p4) target bundleno = 17 (0x11), region = 81 }
 0x10d   : >> { %v727_v18 = vadd.f32 %v1188_v0, %v720_v16 }
 0x10f   : >> { %v728_v19 = vpack.c.bf16 %v727_v18, %v727_v18 }
 0x111   : >> { %732 = vst.msk [vmem:[%s730_s10] sm:$0x3] %vm731_vm2, %v728_v19 }
 0x118   : > { %v733_v20 = vld [vmem:[%s1193_s20] sm:$0x3]  ;;  %v734_v21 = vld [vmem:[%s1193_s20 + $0x2] sm:$0x3]  ;;  %v735_v22 = vld [vmem:[%s1193_s20 + $0x4] sm:$0x3] }
 0x119   : > { %v736_v23 = vld [vmem:[%s1193_s20 + $0x6] sm:$0x3]  ;;  %v737_v24 = vunpack.c.l.bf16 %v733_v20  ;;  %v738_v25 = vunpack.c.l.bf16 %v734_v21  ;;  %v739_v26 = vunpack.c.l.bf16 %v735_v22 }
 0x11a   : > { %v740_v27 = vunpack.c.l.bf16 %v736_v23 }
 0x11b   : > { %v742_v28 = vsel %vm741_vm3, %v737_v24, 0.0  ;;  %v749_v29 = vsel %vm741_vm3, %v738_v25, 0.0  ;;  %v756_v30 = vsel %vm741_vm3, %v739_v26, 0.0 }
 0x11c   : > { %v743_v31 = vrot.slane %v742_v28, 4  ;;  %v750_v0 = vrot.slane %v749_v29, 4  ;;  %v757_v32 = vrot.slane %v756_v30, 4  ;;  %v763_v33 = vsel %vm741_vm3, %v740_v27, 0.0 }
 0x11d   : > { %v764_v34 = vrot.slane %v763_v33, 4 }
 0x11e   : > { %v744_v35 = vadd.f32 %v743_v31, %v742_v28  ;;  %v751_v36 = vadd.f32 %v750_v0, %v749_v29  ;;  %v758_v37 = vadd.f32 %v757_v32, %v756_v30 }
 0x11f   : > { %v765_v38 = vadd.f32 %v764_v34, %v763_v33 }
 0x120   : > { %v745_v39 = vrot.slane %v744_v35, 2  ;;  %v752_v40 = vrot.slane %v751_v36, 2  ;;  %v759_v41 = vrot.slane %v758_v37, 2 }
 0x121   : > { %v766_v42 = vrot.slane %v765_v38, 2 }
 0x122   : > { %v746_v43 = vadd.f32 %v745_v39, %v744_v35  ;;  %v753_v44 = vadd.f32 %v752_v40, %v751_v36  ;;  %v760_v45 = vadd.f32 %v759_v41, %v758_v37 }
 0x123   : > { %v767_v46 = vadd.f32 %v766_v42, %v765_v38 }
 0x124   : > { %v747_v47 = vrot.slane %v746_v43, 1  ;;  %v754_v48 = vrot.slane %v753_v44, 1  ;;  %v761_v49 = vrot.slane %v760_v45, 1 }
 0x125   : > { %v768_v50 = vrot.slane %v767_v46, 1 }
 0x126   : > { %v748_v51 = vadd.f32 %v747_v47, %v746_v43  ;;  %v755_v52 = vadd.f32 %v754_v48, %v753_v44  ;;  %v762_v53 = vadd.f32 %v761_v49, %v760_v45 }
 0x127   : > { %v769_v54 = vadd.f32 %v768_v50, %v767_v46 }
 0x128   : > { %v771_v55 = vsel %vm214_vm1, %v748_v51, 0.0  ;;  %v772_v56 = vsel %vm214_vm1, %v755_v52, 0.0  ;;  %v774_v57 = vsel %vm214_vm1, %v762_v53, 0.0 }
 0x129   : > { %v773_v58 = vadd.f32 %v772_v56, %v771_v55  ;;  %v776_v59 = vsel %vm214_vm1, %v769_v54, 0.0 }
 0x12b   : > { %v775_v60 = vadd.f32 %v774_v57, %v773_v58 }
 0x12d   : > { %v777_v61 = vadd.f32 %v776_v59, %v775_v60 }
 0x12f   : > { %v778_v62 = vmul.f32 0.0625, %v777_v61 }
 0x131   : > { %v779_v63 = vsub.f32 %v737_v24, %v778_v62  ;;  %v780_v1 = vsub.f32 %v738_v25, %v778_v62  ;;  %v781_v2 = vsub.f32 %v739_v26, %v778_v62  ;;  %v782_v3 = vsub.f32 %v740_v27, %v778_v62 }
 0x133   : > { %v783_v4 = vmul.f32 %v779_v63, %v779_v63  ;;  %v784_v5 = vmul.f32 %v780_v1, %v780_v1  ;;  %v785_v6 = vmul.f32 %v781_v2, %v781_v2  ;;  %v786_v7 = vmul.f32 %v782_v3, %v782_v3 }
 0x135   : > { %v787_v8 = vsel %vm741_vm3, %v783_v4, 0.0  ;;  %v794_v9 = vsel %vm741_vm3, %v784_v5, 0.0  ;;  %v801_v10 = vsel %vm741_vm3, %v785_v6, 0.0  ;;  %v808_v11 = vsel %vm741_vm3, %v786_v7, 0.0 }
 0x136   : > { %v788_v12 = vrot.slane %v787_v8, 4  ;;  %v795_v13 = vrot.slane %v794_v9, 4  ;;  %v802_v14 = vrot.slane %v801_v10, 4  ;;  %v809_v15 = vrot.slane %v808_v11, 4 }
 0x138   : > { %v789_v16 = vadd.f32 %v788_v12, %v787_v8  ;;  %v796_v17 = vadd.f32 %v795_v13, %v794_v9  ;;  %v803_v18 = vadd.f32 %v802_v14, %v801_v10  ;;  %v810_v19 = vadd.f32 %v809_v15, %v808_v11 }
 0x13a   : > { %v790_v20 = vrot.slane %v789_v16, 2  ;;  %v797_v21 = vrot.slane %v796_v17, 2  ;;  %v804_v22 = vrot.slane %v803_v18, 2  ;;  %v811_v23 = vrot.slane %v810_v19, 2 }
 0x13c   : > { %v791_v24 = vadd.f32 %v790_v20, %v789_v16  ;;  %v798_v25 = vadd.f32 %v797_v21, %v796_v17  ;;  %v805_v26 = vadd.f32 %v804_v22, %v803_v18  ;;  %v812_v27 = vadd.f32 %v811_v23, %v810_v19 }
 0x13e   : > { %v792_v28 = vrot.slane %v791_v24, 1  ;;  %v799_v29 = vrot.slane %v798_v25, 1  ;;  %v806_v30 = vrot.slane %v805_v26, 1  ;;  %v813_v31 = vrot.slane %v812_v27, 1 }
 0x140   : > { %v793_v0 = vadd.f32 %v792_v28, %v791_v24  ;;  %v800_v32 = vadd.f32 %v799_v29, %v798_v25  ;;  %v807_v33 = vadd.f32 %v806_v30, %v805_v26  ;;  %v814_v34 = vadd.f32 %v813_v31, %v812_v27 }
 0x142   : > { %v815_v35 = vsel %vm214_vm1, %v793_v0, 0.0  ;;  %v816_v36 = vsel %vm214_vm1, %v800_v32, 0.0  ;;  %v818_v37 = vsel %vm214_vm1, %v807_v33, 0.0  ;;  %v820_v39 = vsel %vm214_vm1, %v814_v34, 0.0 }
 0x143   : > { %v817_v38 = vadd.f32 %v816_v36, %v815_v35 }
 0x145   : > { %v819_v40 = vadd.f32 %v818_v37, %v817_v38 }
 0x147   : > { %v821_v41 = vadd.f32 %v820_v39, %v819_v40 }
 0x149   : > { %v822_v42 = vmul.f32 0.0625, %v821_v41 }
 0x14b   : > { %v823_v43 = vadd.f32 1e-05, %v822_v42 }
 0x14d   : > { %1137 = vrsqrt.f32 %v823_v43 }
 0x157   : > { %v1138_v44 = vpop.eup %1137 }
 0x158   : > { %v825_v45 = vmul.f32 %v1138_v44, %v779_v63  ;;  %v826_v46 = vmul.f32 %v1138_v44, %v780_v1  ;;  %v827_v47 = vmul.f32 %v1138_v44, %v781_v2  ;;  %v828_v48 = vmul.f32 %v1138_v44, %v782_v3 }
 0x15a   : > { %vm829_vm4 = vcmp.ge.f32.partialorder %v825_v45, 0.0  ;;  %v833_v49 = vmul.f32 0.2, %v825_v45  ;;  %vm830_vm5 = vcmp.ge.f32.partialorder %v826_v46, 0.0  ;;  %v834_v50 = vmul.f32 0.2, %v826_v46 }
 0x15b   : > { %vm831_vm6 = vcmp.ge.f32.partialorder %v827_v47, 0.0  ;;  %v835_v51 = vmul.f32 0.2, %v827_v47  ;;  %vm832_vm7 = vcmp.ge.f32.partialorder %v828_v48, 0.0  ;;  %v836_v52 = vmul.f32 0.2, %v828_v48 }
 0x15c   : > { %v837_v53 = vsel %vm829_vm4, %v825_v45, %v833_v49  ;;  %v838_v54 = vsel %vm830_vm5, %v826_v46, %v834_v50 }
 0x15d   : > { %v841_v55 = vpack.c.bf16 %v837_v53, %v837_v53  ;;  %v842_v56 = vpack.c.bf16 %v838_v54, %v838_v54  ;;  %v839_v57 = vsel %vm831_vm6, %v827_v47, %v835_v51  ;;  %v840_v58 = vsel %vm832_vm7, %v828_v48, %v836_v52 }
 0x15e   : > { %v843_v59 = vpack.c.bf16 %v839_v57, %v839_v57  ;;  %v844_v60 = vpack.c.bf16 %v840_v58, %v840_v58 }
 0x15f   : > { %846 = vst.msk [vmem:[%s1193_s20] sm:$0x3] %vm731_vm2, %v841_v55  ;;  %847 = vst.msk [vmem:[%s1193_s20 + $0x2] sm:$0x3] %vm731_vm2, %v842_v56 }
 0x160   : > { %848 = vst.msk [vmem:[%s1193_s20 + $0x4] sm:$0x3] %vm731_vm2, %v843_v59  ;;  %849 = vst.msk [vmem:[%s1193_s20 + $0x6] sm:$0x3] %vm731_vm2, %v844_v60 }
 0x161 PF: > { %s13_s12 = sadd.s32 1, %s1149_s12  }
 0x162   : > { %p10_p5 = scmp.ge.s32.totalorder %s13_s12, 4  }
 0x164   :  { %12 = sbr.rel (!%p10_p5) target bundleno = 1 (0x1), region = 92 }

// kernel: discriminator_forward.8
= control target key start
LH: loop header
LB: loop body
LE: loop exit
PB: predicated region body
PF: predicated region fallthrough
CT: control target
= control target key end

     0   :  { %s1811_s12 = smov 0   ;;  %s2086_s0 = inlined_call_operand.vmem [shape: bf16[2,6,8,32], index: 0, kind: input, shape index: {}]   ;;  %s2087_s1 = inlined_call_operand.vmem [shape: bf16[16,32,64], index: 1, kind: input, shape index: {}]   ;;  %s2088_s2 = inlined_call_operand.vmem [shape: f32[1,64], index: 2, kind: input, shape index: {}]   ;;  %s2089_s3 = inlined_call_operand.vmem [shape: bf16[2,3,5,64], index: 3, kind: output, shape index: {}]  }
   0x1 LB: > { %s1409_s13 = sadd.s32 4294967295, %s1783_s12   ;;  %p1413_p0 = scmp.ge.s32.totalorder %s1783_s12, 1  ;;  %s1783_s12 = sphi %s1811_s12, %s13_s12  }
   0x2   : > { %p137_p1 = scmp.lt.s32.totalorder %s1783_s12, 3 }
   0x4   : > { %p138_p2 = pnand %p1413_p0, %p137_p1 }
   0x5   : > { %p161_p3 = scmp.lt.s32.totalorder (!%p138_p2), %s1409_s13, 1  ;;  %v1822_v0 = vld [vmem:[%s2088_s2] ss:$0 sm:$0xff] (!%p138_p2)  ;;  %s1834_s24 = smov (!%p138_p2), 0  }
   0x6   : > { %141 = sbr.rel (%p138_p2) target bundleno = 384 (0x180), region = 32 }
   0xd   : > { %s2093_s13 = smov (!%p161_p3, %s1409_s13), 1 }
   0xe   : > { %s1715_s16 = smul.u32 24, %s2093_s13 }
   0xf   : > { %s1716_s17 = smul.u32 12, %s2093_s13 }
  0x10   : > { %s1827_s20 = scalar_lea.vmem %s2086_s0, %s1715_s16 }
  0x11   : > { %s1832_s23 = scalar_lea.vmem %s2089_s3, %s1716_s17 }
  0x12 LB: >> { %v1735_v1 = vld [vmem:[%s2087_s1 + $0x10] sm:$0xff]   ;;  %v1789_v2 = vmov 0.0   ;;  %v1736_v3 = vld [vmem:[%s2087_s1] sm:$0xff]   ;;  %v1737_v4 = vld [vmem:[%s2087_s1 + $0x18] sm:$0xff]   ;;  %vm1790_vm0 = vmmov 0   ;;  %s1416_s4 = sshll.u32 %s1787_s24, 2  ;;  %s1787_s24 = sphi %s1834_s24, %s178_s24  }
  0x13   : >> { %1587 = vmatprep.subr.bf16.mxu0 %v1789_v2  ;;  %1595 = vmatprep.subr.bf16.mxu1 %v1789_v2  ;;  %v1738_v5 = vld [vmem:[%s2087_s1 + $0x8] sm:$0xff]   ;;  %s1860_s7 = scalar_lea.vmem %s1827_s20, %s1416_s4  ;;  %vm213_vm1 = vcmask 261120   ;;  %v1744_v11 = vld [vmem:[%s2087_s1 + $0x30] sm:$0xff]   ;;  %v1743_v13 = vld [vmem:[%s2087_s1 + $0x20] sm:$0xff]   ;;  %s1233_s25 = scalar_lea.vmem %s1832_s23, %s1416_s4  ;;  %vm1234_vm2 = vcmask 518144  }
  0x14   : >> { %1588 = vmatpush3.bf16.msra.mxu0 %v1735_v1  ;;  %1599 = vmatprep.mubr.msk.bf16.mxu1 %vm1790_vm0, %v1789_v2  ;;  %v181_v6 = vld [vmem:[%s1860_s7] sm:$0xf]  ;;  %v1443_v8 = vld [vmem:[%s1860_s7 + $0x4] sm:$0xf]  ;;  %v1746_v18 = vld [vmem:[%s2087_s1 + $0x38] sm:$0xff]   ;;  %s178_s24 = sadd.s32 1, %s1787_s24  }
  0x15   : >> { %1596 = vmatpush3.bf16.msra.mxu1 %v1736_v3  ;;  %1589 = vmatprep.subr.bf16.mxu0 %v1789_v2  ;;  %v1421_v7 = vcombine.low %v181_v6, %v181_v6  ;;  %v1876_v16 = vcombine.low %v1443_v8, %v1443_v8  ;;  %v1745_v19 = vld [vmem:[%s2087_s1 + $0x28] sm:$0xff]   ;;  %v1748_v22 = vld [vmem:[%s2087_s1 + $0x50] sm:$0xff]   ;;  %v1747_v25 = vld [vmem:[%s2087_s1 + $0x40] sm:$0xff]   ;;  %vm1235_vm3 = vsmask.f32 2304  ;;  %p175_p4 = scmp.ge.s32.totalorder %s178_s24, 3  }
  0x16   : >> { %1597 = vmatprep.subr.bf16.mxu1 %v1789_v2  ;;  %1591 = vmatprep.mubr.msk.bf16.mxu0 %vm1790_vm0, %v1789_v2  ;;  %v1750_v27 = vld [vmem:[%s2087_s1 + $0x58] sm:$0xff]   ;;  %v1909_v28 = vld [vmem:[%s1860_s7 + $0x8] sm:$0xf]  ;;  %v1752_v31 = vld [vmem:[%s2087_s1 + $0x70] sm:$0xff]   ;;  %vm1246_vm5 = vcmask (%p175_p4), 520192   ;;  %vm1268_vm6 = vcmask (%p175_p4), 523264  }
  0x17   : >> { %v195_v9 = vshrl.u32 %v1421_v7, 16  ;;  %v197_v10 = vshll.u32 %v1421_v7, 16  ;;  %v514_v21 = vshll.u32 %v1876_v16, 16  ;;  %v317_v23 = vrot.slane %v1421_v7, 1  ;;  %v1749_v29 = vld [vmem:[%s2087_s1 + $0x48] sm:$0xff]   ;;  %v1751_v34 = vld [vmem:[%s2087_s1 + $0x60] sm:$0xff]   ;;  %vm2044_vm4 = vmand %vm1234_vm2, %vm1235_vm3 }
  0x18   : >> { %1590 = vmatpush3.bf16.msra.mxu0 %v1737_v4  ;;  %v512_v24 = vshrl.u32 %v1876_v16, 16  ;;  %v1924_v33 = vcombine.low %v1909_v28, %v1909_v28  ;;  %v1754_v36 = vld [vmem:[%s2087_s1 + $0x78] sm:$0xff]   ;;  %v1753_v37 = vld [vmem:[%s2087_s1 + $0x68] sm:$0xff]   ;;  %v1756_v40 = vld [vmem:[%s2087_s1 + $0x90] sm:$0xff]   ;;  %v579_v41 = vrot.slane %v1876_v16, 1 }
  0x19   : >> { %1598 = vmatpush3.bf16.msra.mxu1 %v1738_v5  ;;  %1603 = vmatprep.subr.bf16.mxu0 %v1789_v2  ;;  %v199_v12 = vrot.slane %v197_v10, 1  ;;  %v379_v14 = vrot.slane %v195_v9, 1  ;;  %v380_v15 = vrot.slane %v197_v10, 2  ;;  %v516_v26 = vrot.slane %v514_v21, 1  ;;  %v1755_v42 = vld [vmem:[%s2087_s1 + $0x80] sm:$0xff]   ;;  %v1758_v45 = vld [vmem:[%s2087_s1 + $0x98] sm:$0xff]  }
  0x1a   : >> { %1611 = vmatprep.subr.bf16.mxu1 %v1789_v2  ;;  %v641_v32 = vrot.slane %v512_v24, 1  ;;  %v642_v35 = vrot.slane %v514_v21, 2  ;;  %v776_v39 = vshll.u32 %v1924_v33, 16  ;;  %v774_v43 = vshrl.u32 %v1924_v33, 16  ;;  %v1757_v46 = vld [vmem:[%s2087_s1 + $0x88] sm:$0xff]   ;;  %v1760_v49 = vld [vmem:[%s2087_s1 + $0xb0] sm:$0xff]  }
  0x1b   : >> { %v200_v17 = vor.u32 %v199_v12, %v195_v9  ;;  %v381_v20 = vor.u32 %v380_v15, %v379_v14  ;;  %v517_v30 = vor.u32 %v516_v26, %v512_v24  ;;  %v1505_v48 = vld [vmem:[%s1860_s7 + $0xc] sm:$0xf]  ;;  %v1759_v51 = vld [vmem:[%s2087_s1 + $0xa0] sm:$0xff]   ;;  %v1762_v54 = vld [vmem:[%s2087_s1 + $0xb8] sm:$0xff]   ;;  %v841_v59 = vrot.slane %v1924_v33, 1 }
  0x1c   : >> { %1600 = vmatmul.mubr.msk.bf16.vlgmr.msra.gmra.mrb[0].mxu1 %vm213_vm1, %v181_v6  ;;  %v643_v38 = vor.u32 %v642_v35, %v641_v32  ;;  %v778_v44 = vrot.slane %v776_v39, 1  ;;  %v1517_v50 = vcombine.low %v1505_v48, %v1505_v48  ;;  %v903_v52 = vrot.slane %v774_v43, 1  ;;  %v1761_v55 = vld [vmem:[%s2087_s1 + $0xa8] sm:$0xff]   ;;  %v1764_v58 = vld [vmem:[%s2087_s1 + $0xd0] sm:$0xff]   ;;  %v1763_v60 = vld [vmem:[%s2087_s1 + $0xc0] sm:$0xff]  }
  0x1d   : >> { %1612 = vmatpush3.bf16.msra.mxu1 %v1744_v11  ;;  %1615 = vmatprep.mubr.msk.bf16.mxu1 %vm1790_vm0, %v1789_v2  ;;  %v904_v53 = vrot.slane %v776_v39, 2  ;;  %v1766_v63 = vld [vmem:[%s2087_s1 + $0xd8] sm:$0xff]   ;;  %v1765_v1 = vld [vmem:[%s2087_s1 + $0xc8] sm:$0xff]   ;;  %v1768_v4 = vld [vmem:[%s2087_s1 + $0xf0] sm:$0xff]  }
  0x1e   : >> { %1613 = vmatprep.subr.bf16.mxu1 %v1789_v2  ;;  %1592 = vmatmul.mubr.msk.bf16.vlgmr.msra.gmra.mrb[0].mxu0 %vm213_vm1, %v200_v17  ;;  %v779_v47 = vor.u32 %v778_v44, %v774_v43  ;;  %v1038_v57 = vshll.u32 %v1517_v50, 16  ;;  %v1036_v61 = vshrl.u32 %v1517_v50, 16  ;;  %v1767_v5 = vld [vmem:[%s2087_s1 + $0xe0] sm:$0xff]   ;;  %v1769_v9 = vld [vmem:[%s2087_s1 + $0xe8] sm:$0xff]   ;;  %v1103_v11 = vrot.slane %v1517_v50, 1 }
  0x1f   : >> { %1604 = vmatpush3.bf16.msra.mxu0 %v1743_v13  ;;  %1607 = vmatprep.mubr.msk.bf16.mxu0 %vm1790_vm0, %v1789_v2  ;;  %v905_v56 = vor.u32 %v904_v53, %v903_v52 }
  0x20   : >> { %1605 = vmatprep.subr.bf16.mxu0 %v1789_v2  ;;  %v1040_v62 = vrot.slane %v1038_v57, 1  ;;  %v1165_v6 = vrot.slane %v1036_v61, 1  ;;  %v1166_v7 = vrot.slane %v1038_v57, 2 }
  0x21   : >> { %1614 = vmatpush3.bf16.msra.mxu1 %v1746_v18 }
  0x22   : >> { %1627 = vmatprep.subr.bf16.mxu1 %v1789_v2  ;;  %v1041_v3 = vor.u32 %v1040_v62, %v1036_v61  ;;  %v1167_v10 = vor.u32 %v1166_v7, %v1165_v6 }
  0x23   : >> { %1606 = vmatpush3.bf16.msra.mxu0 %v1745_v19 }
  0x24   : >> { %1616 = vmatmul.mubr.msk.bf16.vlgmr.msra.gmra.mrb[4].mxu1 %vm213_vm1, %v381_v20  ;;  %1619 = vmatprep.subr.bf16.mxu0 %v1789_v2 }
  0x25   : >> { %1628 = vmatpush3.bf16.msra.mxu1 %v1748_v22  ;;  %1631 = vmatprep.mubr.msk.bf16.mxu1 %vm1790_vm0, %v1789_v2 }
  0x26   : >> { %1629 = vmatprep.subr.bf16.mxu1 %v1789_v2  ;;  %1608 = vmatmul.mubr.msk.bf16.vlgmr.msra.gmra.mrb[4].mxu0 %vm213_vm1, %v317_v23 }
  0x27   : >> { %1620 = vmatpush3.bf16.msra.mxu0 %v1747_v25  ;;  %1623 = vmatprep.mubr.msk.bf16.mxu0 %vm1790_vm0, %v1789_v2 }
  0x28   : >> { %1621 = vmatprep.subr.bf16.mxu0 %v1789_v2 }
  0x29   : >> { %1630 = vmatpush3.bf16.msra.mxu1 %v1750_v27 }
  0x2a   : >> { %1643 = vmatprep.subr.bf16.mxu1 %v1789_v2 }
  0x2b   : >> { %1622 = vmatpush3.bf16.msra.mxu0 %v1749_v29 }
  0x2c   : >> { %1632 = vmatmul.mubr.msk.bf16.vlgmr.msra.gmra.mrb[8].mxu1 %vm213_vm1, %v517_v30  ;;  %1635 = vmatprep.subr.bf16.mxu0 %v1789_v2 }
  0x2d   : >> { %1644 = vmatpush3.bf16.msra.mxu1 %v1752_v31  ;;  %1647 = vmatprep.mubr.msk.bf16.mxu1 %vm1790_vm0, %v1789_v2 }
  0x2e   : >> { %1645 = vmatprep.subr.bf16.mxu1 %v1789_v2  ;;  %1624 = vmatmul.mubr.msk.bf16.vlgmr.msra.gmra.mrb[8].mxu0 %vm213_vm1, %v1443_v8  ;;  %v1770_v8 = vld [vmem:[%s2087_s1 + $0xf8] sm:$0xff]  }
  0x2f   : >> { %1636 = vmatpush3.bf16.msra.mxu0 %v1751_v34  ;;  %1639 = vmatprep.mubr.msk.bf16.mxu0 %vm1790_vm0, %v1789_v2 }
  0x30   : >> { %1637 = vmatprep.subr.bf16.mxu0 %v1789_v2 }
  0x31   : >> { %1646 = vmatpush3.bf16.msra.mxu1 %v1754_v36 }
  0x32   : >> { %1659 = vmatprep.subr.bf16.mxu1 %v1789_v2 }
  0x33   : >> { %1638 = vmatpush3.bf16.msra.mxu0 %v1753_v37 }
  0x34   : >> { %1648 = vmatmul.mubr.msk.bf16.vlgmr.msra.gmra.mrb[12].mxu1 %vm213_vm1, %v643_v38  ;;  %1651 = vmatprep.subr.bf16.mxu0 %v1789_v2 }
  0x35   : >> { %1660 = vmatpush3.bf16.msra.mxu1 %v1756_v40  ;;  %1663 = vmatprep.mubr.msk.bf16.mxu1 %vm1790_vm0, %v1789_v2 }
  0x36   : >> { %1661 = vmatprep.subr.bf16.mxu1 %v1789_v2  ;;  %1640 = vmatmul.mubr.msk.bf16.vlgmr.msra.gmra.mrb[12].mxu0 %vm213_vm1, %v579_v41 }
  0x37   : >> { %1652 = vmatpush3.bf16.msra.mxu0 %v1755_v42  ;;  %1655 = vmatprep.mubr.msk.bf16.mxu0 %vm1790_vm0, %v1789_v2 }
  0x38   : >> { %1653 = vmatprep.subr.bf16.mxu0 %v1789_v2 }
  0x39   : >> { %1662 = vmatpush3.bf16.msra.mxu1 %v1758_v45 }
  0x3a   : >> { %1675 = vmatprep.subr.bf16.mxu1 %v1789_v2 }
  0x3b   : >> { %1654 = vmatpush3.bf16.msra.mxu0 %v1757_v46 }
  0x3c   : >> { %1664 = vmatmul.mubr.msk.bf16.vlgmr.msra.gmra.mrb[16].mxu1 %vm213_vm1, %v779_v47  ;;  %1667 = vmatprep.subr.bf16.mxu0 %v1789_v2 }
  0x3d   : >> { %1676 = vmatpush3.bf16.msra.mxu1 %v1760_v49  ;;  %1679 = vmatprep.mubr.msk.bf16.mxu1 %vm1790_vm0, %v1789_v2 }
  0x3e   : >> { %1677 = vmatprep.subr.bf16.mxu1 %v1789_v2  ;;  %1656 = vmatmul.mubr.msk.bf16.vlgmr.msra.gmra.mrb[16].mxu0 %vm213_vm1, %v1909_v28 }
  0x3f   : >> { %1668 = vmatpush3.bf16.msra.mxu0 %v1759_v51  ;;  %1671 = vmatprep.mubr.msk.bf16.mxu0 %vm1790_vm0, %v1789_v2 }
  0x40   : >> { %1669 = vmatprep.subr.bf16.mxu0 %v1789_v2 }
  0x41   : >> { %1678 = vmatpush3.bf16.msra.mxu1 %v1762_v54 }
  0x42   : >> { %1691 = vmatprep.subr.bf16.mxu1 %v1789_v2 }
  0x43   : >> { %1670 = vmatpush3.bf16.msra.mxu0 %v1761_v55 }
  0x44   : >> { %1680 = vmatmul.mubr.msk.bf16.vlgmr.msra.gmra.mrb[20].mxu1 %vm213_vm1, %v905_v56  ;;  %1683 = vmatprep.subr.bf16.mxu0 %v1789_v2 }
  0x45   : >> { %1692 = vmatpush3.bf16.msra.mxu1 %v1764_v58  ;;  %1695 = vmatprep.mubr.msk.bf16.mxu1 %vm1790_vm0, %v1789_v2 }
  0x46   : >> { %1693 = vmatprep.subr.bf16.mxu1 %v1789_v2  ;;  %1672 = vmatmul.mubr.msk.bf16.vlgmr.msra.gmra.mrb[20].mxu0 %vm213_vm1, %v841_v59 }
  0x47   : >> { %1684 = vmatpush3.bf16.msra.mxu0 %v1763_v60  ;;  %1687 = vmatprep.mubr.msk.bf16.mxu0 %vm1790_vm0, %v1789_v2 }
  0x48   : >> { %1685 = vmatprep.subr.bf16.mxu0 %v1789_v2 }
  0x49   : >> { %1694 = vmatpush3.bf16.msra.mxu1 %v1766_v63 }
  0x4a   : >> { %1707 = vmatprep.subr.bf16.mxu1 %v1789_v2 }
  0x4b   : >> { %1686 = vmatpush3.bf16.msra.mxu0 %v1765_v1 }
  0x4c   : >> { %1696 = vmatmul.mubr.msk.bf16.vlgmr.msra.gmra.mrb[24].mxu1 %vm213_vm1, %v1041_v3  ;;  %1699 = vmatprep.subr.bf16.mxu0 %v1789_v2 }
  0x4d   : >> { %1708 = vmatpush3.bf16.msra.mxu1 %v1768_v4  ;;  %1711 = vmatprep.mubr.msk.bf16.mxu1 %vm1790_vm0, %v1789_v2 }
  0x4e   : >> { %1709 = vmatprep.subr.bf16.mxu1 %v1789_v2  ;;  %1688 = vmatmul.mubr.msk.bf16.vlgmr.msra.gmra.mrb[24].mxu0 %vm213_vm1, %v1505_v48 }
  0x4f   : >> { %1700 = vmatpush3.bf16.msra.mxu0 %v1767_v5  ;;  %1703 = vmatprep.mubr.msk.bf16.mxu0 %vm1790_vm0, %v1789_v2 }
  0x50   : >> { %1701 = vmatprep.subr.bf16.mxu0 %v1789_v2 }
  0x51   : >> { %1710 = vmatpush3.bf16.msra.mxu1 %v1770_v8 }
  0x53   : >> { %1702 = vmatpush3.bf16.msra.mxu0 %v1769_v9 }
  0x54   : >> { %1712 = vmatmul.mubr.msk.bf16.vlgmr.msra.gmra.mrb[28].mxu1 %vm213_vm1, %v1167_v10 }
  0x56   : >> { %1704 = vmatmul.mubr.msk.bf16.vlgmr.msra.gmra.mrb[28].mxu0 %vm213_vm1, %v1103_v11 }
  0xef   : >> { %v306_v12 = vpop.f32.mrb[0].mxu1 }
  0xf0   : >> { %v1601_v13 = vpop.f32.mrb[1].mxu1 }
  0xf1   : >> { %v309_v14 = vpop.f32.mrb[2].mxu1  ;;  %v251_v15 = vpop.f32.mrb[0].mxu0 }
  0xf2   : >> { %v1602_v16 = vpop.f32.mrb[3].mxu1  ;;  %v307_v17 = vadd.f32 %v306_v12, %v251_v15  ;;  %v1593_v18 = vpop.f32.mrb[1].mxu0 }
  0xf3   : >> { %v254_v19 = vpop.f32.mrb[2].mxu0 }
  0xf4   : >> { %v1594_v20 = vpop.f32.mrb[3].mxu0 }
  0xf7   : >> { %v431_v21 = vpop.f32.mrb[4].mxu1 }
  0xf8   : >> { %v1617_v22 = vpop.f32.mrb[5].mxu1 }
  0xf9   : >> { %v434_v23 = vpop.f32.mrb[6].mxu1  ;;  %v367_v2 = vpop.f32.mrb[4].mxu0 }
  0xfa   : >> { %v1618_v24 = vpop.f32.mrb[7].mxu1  ;;  %v373_v25 = vadd.f32 %v367_v2, %v307_v17  ;;  %v1609_v26 = vpop.f32.mrb[5].mxu0 }
  0xfb   : >> { %v370_v27 = vpop.f32.mrb[6].mxu0 }
  0xfc   : >> { %v1610_v28 = vpop.f32.mrb[7].mxu0  ;;  %v437_v29 = vadd.f32 %v431_v21, %v373_v25 }
  0xff   : >> { %v567_v30 = vpop.f32.mrb[8].mxu1 }
 0x100   : >> { %v1633_v31 = vpop.f32.mrb[9].mxu1 }
 0x101   : >> { %v570_v32 = vpop.f32.mrb[10].mxu1  ;;  %v496_v33 = vpop.f32.mrb[8].mxu0 }
 0x102   : >> { %v1634_v34 = vpop.f32.mrb[11].mxu1  ;;  %v502_v35 = vadd.f32 %v496_v33, %v437_v29  ;;  %v1625_v36 = vpop.f32.mrb[9].mxu0  ;;  %v1237_v29 = vld [vmem:[%s1233_s25] sm:$0x7] }
 0x103   : >> { %v499_v37 = vpop.f32.mrb[10].mxu0 }
 0x104   : >> { %v1626_v38 = vpop.f32.mrb[11].mxu0  ;;  %v573_v39 = vadd.f32 %v567_v30, %v502_v35 }
 0x107   : >> { %v693_v40 = vpop.f32.mrb[12].mxu1 }
 0x108   : >> { %v1649_v41 = vpop.f32.mrb[13].mxu1 }
 0x109   : >> { %v696_v42 = vpop.f32.mrb[14].mxu1  ;;  %v629_v43 = vpop.f32.mrb[12].mxu0 }
 0x10a   : >> { %v1650_v44 = vpop.f32.mrb[15].mxu1  ;;  %v635_v45 = vadd.f32 %v629_v43, %v573_v39  ;;  %v1641_v46 = vpop.f32.mrb[13].mxu0 }
 0x10b   : >> { %v632_v47 = vpop.f32.mrb[14].mxu0 }
 0x10c   : >> { %v1642_v48 = vpop.f32.mrb[15].mxu0  ;;  %v699_v49 = vadd.f32 %v693_v40, %v635_v45 }
 0x10f   : >> { %v829_v50 = vpop.f32.mrb[16].mxu1 }
 0x110   : >> { %v1665_v51 = vpop.f32.mrb[17].mxu1 }
 0x111   : >> { %v832_v52 = vpop.f32.mrb[18].mxu1  ;;  %v758_v53 = vpop.f32.mrb[16].mxu0 }
 0x112   : >> { %v1666_v54 = vpop.f32.mrb[19].mxu1  ;;  %v764_v55 = vadd.f32 %v758_v53, %v699_v49  ;;  %v1657_v56 = vpop.f32.mrb[17].mxu0 }
 0x113   : >> { %v761_v57 = vpop.f32.mrb[18].mxu0 }
 0x114   : >> { %v1658_v58 = vpop.f32.mrb[19].mxu0  ;;  %v835_v59 = vadd.f32 %v829_v50, %v764_v55 }
 0x117   : >> { %v955_v60 = vpop.f32.mrb[20].mxu1 }
 0x118   : >> { %v1681_v61 = vpop.f32.mrb[21].mxu1 }
 0x119   : >> { %v958_v62 = vpop.f32.mrb[22].mxu1  ;;  %v891_v63 = vpop.f32.mrb[20].mxu0 }
 0x11a   : >> { %v1682_v1 = vpop.f32.mrb[23].mxu1  ;;  %v897_v3 = vadd.f32 %v891_v63, %v835_v59  ;;  %v1673_v4 = vpop.f32.mrb[21].mxu0 }
 0x11b   : >> { %v894_v5 = vpop.f32.mrb[22].mxu0 }
 0x11c   : >> { %v1674_v6 = vpop.f32.mrb[23].mxu0  ;;  %v961_v7 = vadd.f32 %v955_v60, %v897_v3 }
 0x11f   : >> { %v1091_v8 = vpop.f32.mrb[24].mxu1 }
 0x120   : >> { %v1697_v9 = vpop.f32.mrb[25].mxu1 }
 0x121   : >> { %v1094_v10 = vpop.f32.mrb[26].mxu1  ;;  %v1020_v11 = vpop.f32.mrb[24].mxu0 }
 0x122   : >> { %v1698_v12 = vpop.f32.mrb[27].mxu1  ;;  %v1026_v13 = vadd.f32 %v1020_v11, %v961_v7  ;;  %v1689_v14 = vpop.f32.mrb[25].mxu0 }
 0x123   : >> { %v1023_v15 = vpop.f32.mrb[26].mxu0 }
 0x124   : >> { %v1690_v16 = vpop.f32.mrb[27].mxu0  ;;  %v1097_v17 = vadd.f32 %v1091_v8, %v1026_v13 }
 0x127   : >> { %v1217_v18 = vpop.f32.mrb[28].mxu1 }
 0x128   : >> { %v1713_v19 = vpop.f32.mrb[29].mxu1 }
 0x129   : >> { %v1220_v20 = vpop.f32.mrb[30].mxu1  ;;  %v1153_v21 = vpop.f32.mrb[28].mxu0 }
 0x12a   : >> { %v1714_v22 = vpop.f32.mrb[31].mxu1  ;;  %v1159_v23 = vadd.f32 %v1153_v21, %v1097_v17  ;;  %v1705_v2 = vpop.f32.mrb[29].mxu0 }
 0x12b   : >> { %v1156_v24 = vpop.f32.mrb[30].mxu0 }
 0x12c   : >> { %v1223_v25 = vadd.f32 %v1217_v18, %v1159_v23  ;;  %v1706_v26 = vpop.f32.mrb[31].mxu0 }
 0x12d   : > { %177 = sbr.rel (!%p175_p4) target bundleno = 18 (0x12), region = 89 }
 0x12e   : >> { %v1230_v27 = vadd.f32 %v1822_v0, %v1223_v25 }
 0x130   : >> { %v1231_v30 = vpack.c.bf16 %v1230_v27, %v1230_v27 }
 0x132   : >> { %v1238_v31 = vsel %vm2044_vm4, %v1231_v30, %v1237_v29 }
 0x133   : >> { %1239 = vst [vmem:[%s1233_s25] sm:$0x7] %v1238_v31 }
 0x13a   : > { %v2054_v32 = vld [vmem:[%s1832_s23] sm:$0x7]  ;;  %v1241_v33 = vld [vmem:[%s1832_s23 + $0x4] sm:$0x7]  ;;  %v1242_v34 = vld [vmem:[%s1832_s23 + $0x8] sm:$0x7] }
 0x13b   : > { %v1243_v35 = vunpack.c.l.bf16 %v2054_v32  ;;  %v1244_v36 = vunpack.c.l.bf16 %v1241_v33  ;;  %v1245_v37 = vunpack.c.l.bf16 %v1242_v34 }
 0x13d   : > { %v1247_v38 = vsel %vm1246_vm5, %v1243_v35, 0.0  ;;  %v1254_v39 = vsel %vm1246_vm5, %v1244_v36, 0.0  ;;  %v1261_v40 = vsel %vm1246_vm5, %v1245_v37, 0.0 }
 0x13e   : > { %v1248_v41 = vrot.slane %v1247_v38, 4  ;;  %v1255_v42 = vrot.slane %v1254_v39, 4  ;;  %v1262_v0 = vrot.slane %v1261_v40, 4 }
 0x140   : > { %v1249_v43 = vadd.f32 %v1248_v41, %v1247_v38  ;;  %v1256_v44 = vadd.f32 %v1255_v42, %v1254_v39  ;;  %v1263_v45 = vadd.f32 %v1262_v0, %v1261_v40 }
 0x142   : > { %v1250_v46 = vrot.slane %v1249_v43, 2  ;;  %v1257_v47 = vrot.slane %v1256_v44, 2  ;;  %v1264_v48 = vrot.slane %v1263_v45, 2 }
 0x144   : > { %v1251_v49 = vadd.f32 %v1250_v46, %v1249_v43  ;;  %v1258_v50 = vadd.f32 %v1257_v47, %v1256_v44  ;;  %v1265_v51 = vadd.f32 %v1264_v48, %v1263_v45  ;;  %v1330_v45 = vld [vmem:[%s1832_s23 + $0x4] sm:$0x7] }
 0x146   : > { %v1252_v52 = vrot.slane %v1251_v49, 1  ;;  %v1259_v53 = vrot.slane %v1258_v50, 1  ;;  %v1266_v54 = vrot.slane %v1265_v51, 1 }
 0x148   : > { %v1253_v55 = vadd.f32 %v1252_v52, %v1251_v49  ;;  %v1260_v56 = vadd.f32 %v1259_v53, %v1258_v50  ;;  %v1267_v57 = vadd.f32 %v1266_v54, %v1265_v51  ;;  %v1333_v49 = vld [vmem:[%s1832_s23 + $0x8] sm:$0x7] }
 0x14a   : > { %v1269_v58 = vsel %vm1268_vm6, %v1253_v55, 0.0  ;;  %v1270_v59 = vsel %vm1268_vm6, %v1260_v56, 0.0  ;;  %v1272_v60 = vsel %vm1268_vm6, %v1267_v57, 0.0 }
 0x14b   : > { %v1271_v61 = vadd.f32 %v1270_v59, %v1269_v58 }
 0x14d   : > { %v1273_v62 = vadd.f32 %v1272_v60, %v1271_v61 }
 0x14f   : > { %v1274_v63 = vmul.f32 0.06666667, %v1273_v62 }
 0x151   : > { %v1275_v1 = vsub.f32 %v1243_v35, %v1274_v63  ;;  %v1276_v3 = vsub.f32 %v1244_v36, %v1274_v63  ;;  %v1277_v4 = vsub.f32 %v1245_v37, %v1274_v63 }
 0x153   : > { %v1278_v5 = vmul.f32 %v1275_v1, %v1275_v1  ;;  %v1279_v6 = vmul.f32 %v1276_v3, %v1276_v3  ;;  %v1280_v7 = vmul.f32 %v1277_v4, %v1277_v4 }
 0x155   : > { %v1281_v8 = vsel %vm1246_vm5, %v1278_v5, 0.0  ;;  %v1288_v9 = vsel %vm1246_vm5, %v1279_v6, 0.0  ;;  %v1295_v10 = vsel %vm1246_vm5, %v1280_v7, 0.0 }
 0x156   : > { %v1282_v11 = vrot.slane %v1281_v8, 4  ;;  %v1289_v12 = vrot.slane %v1288_v9, 4  ;;  %v1296_v13 = vrot.slane %v1295_v10, 4 }
 0x158   : > { %v1283_v14 = vadd.f32 %v1282_v11, %v1281_v8  ;;  %v1290_v15 = vadd.f32 %v1289_v12, %v1288_v9  ;;  %v1297_v16 = vadd.f32 %v1296_v13, %v1295_v10 }
 0x15a   : > { %v1284_v17 = vrot.slane %v1283_v14, 2  ;;  %v1291_v18 = vrot.slane %v1290_v15, 2  ;;  %v1298_v19 = vrot.slane %v1297_v16, 2 }
 0x15c   : > { %v1285_v20 = vadd.f32 %v1284_v17, %v1283_v14  ;;  %v1292_v21 = vadd.f32 %v1291_v18, %v1290_v15  ;;  %v1299_v22 = vadd.f32 %v1298_v19, %v1297_v16 }
 0x15e   : > { %v1286_v23 = vrot.slane %v1285_v20, 1  ;;  %v1293_v2 = vrot.slane %v1292_v21, 1  ;;  %v1300_v24 = vrot.slane %v1299_v22, 1 }
 0x160   : > { %v1287_v25 = vadd.f32 %v1286_v23, %v1285_v20  ;;  %v1294_v26 = vadd.f32 %v1293_v2, %v1292_v21  ;;  %v1301_v27 = vadd.f32 %v1300_v24, %v1299_v22 }
 0x162   : > { %v1302_v29 = vsel %vm1268_vm6, %v1287_v25, 0.0  ;;  %v1303_v30 = vsel %vm1268_vm6, %v1294_v26, 0.0  ;;  %v1305_v31 = vsel %vm1268_vm6, %v1301_v27, 0.0 }
 0x163   : > { %v1304_v33 = vadd.f32 %v1303_v30, %v1302_v29 }
 0x165   : > { %v1306_v34 = vadd.f32 %v1305_v31, %v1304_v33 }
 0x167   : > { %v1307_v35 = vmul.f32 0.06666667, %v1306_v34 }
 0x169   : > { %v1308_v36 = vadd.f32 1e-05, %v1307_v35 }
 0x16b   : > { %1771 = vrsqrt.f32 %v1308_v36 }
 0x175   : > { %v1772_v37 = vpop.eup %1771 }
 0x176   : > { %v1310_v38 = vmul.f32 %v1772_v37, %v1275_v1  ;;  %v1311_v39 = vmul.f32 %v1772_v37, %v1276_v3  ;;  %v1312_v40 = vmul.f32 %v1772_v37, %v1277_v4 }
 0x178   : > { %vm1313_vm7 = vcmp.ge.f32.partialorder %v1310_v38, 0.0  ;;  %v1316_v41 = vmul.f32 0.2, %v1310_v38  ;;  %vm1314_vm8 = vcmp.ge.f32.partialorder %v1311_v39, 0.0  ;;  %v1317_v42 = vmul.f32 0.2, %v1311_v39 }
 0x179   : > { %vm1315_vm9 = vcmp.ge.f32.partialorder %v1312_v40, 0.0  ;;  %v1318_v0 = vmul.f32 0.2, %v1312_v40 }
 0x17a   : > { %v1319_v43 = vsel %vm1313_vm7, %v1310_v38, %v1316_v41  ;;  %v1320_v44 = vsel %vm1314_vm8, %v1311_v39, %v1317_v42 }
 0x17b   : > { %v1322_v46 = vpack.c.bf16 %v1319_v43, %v1319_v43  ;;  %v1323_v47 = vpack.c.bf16 %v1320_v44, %v1320_v44  ;;  %v1321_v48 = vsel %vm1315_vm9, %v1312_v40, %v1318_v0 }
 0x17c   : > { %v1324_v50 = vpack.c.bf16 %v1321_v48, %v1321_v48 }
 0x17d   : > { %v1328_v51 = vsel %vm2044_vm4, %v1322_v46, %v2054_v32  ;;  %v1331_v52 = vsel %vm2044_vm4, %v1323_v47, %v1330_v45 }
 0x17e   : > { %1329 = vst [vmem:[%s1832_s23] sm:$0x7] %v1328_v51  ;;  %1332 = vst [vmem:[%s1832_s23 + $0x4] sm:$0x7] %v1331_v52  ;;  %v1334_v53 = vsel %vm2044_vm4, %v1324_v50, %v1333_v49 }
 0x17f   : > { %1335 = vst [vmem:[%s1832_s23 + $0x8] sm:$0x7] %v1334_v53 }
 0x180 PF: > { %s13_s12 = sadd.s32 1, %s1783_s12  }
 0x181   : > { %p10_p5 = scmp.ge.s32.totalorder %s13_s12, 4  }
 0x183   :  { %12 = sbr.rel (!%p10_p5) target bundleno = 1 (0x1), region = 100 }

// kernel: discriminator_forward.9
= control target key start
LH: loop header
LB: loop body
LE: loop exit
PB: predicated region body
PF: predicated region fallthrough
CT: control target
= control target key end

     0   :  { %s2185_s12 = smov 0   ;;  %s2547_s0 = inlined_call_operand.vmem [shape: bf16[2,7,7,64], index: 0, kind: input, shape index: {}]   ;;  %s2548_s1 = inlined_call_operand.vmem [shape: bf16[16,64,8], index: 1, kind: input, shape index: {}]   ;;  %s2549_s2 = inlined_call_operand.vmem [shape: f32[1,8], index: 2, kind: input, shape index: {}]   ;;  %s2550_s3 = inlined_call_operand.vmem [shape: f32[2,4,4,8], index: 3, kind: output, shape index: {}]  }
   0x1 LB: > { %s1564_s13 = sadd.s32 4294967295, %s2157_s12   ;;  %p1568_p0 = scmp.ge.s32.totalorder %s2157_s12, 1  ;;  %s2157_s12 = sphi %s2185_s12, %s13_s12  }
   0x2   : > { %p137_p1 = scmp.lt.s32.totalorder %s2157_s12, 3 }
   0x4   : > { %p138_p2 = pnand %p1568_p0, %p137_p1 }
   0x5   : > { %p161_p3 = scmp.lt.s32.totalorder (!%p138_p2), %s1564_s13, 1  ;;  %v2196_v0 = vld [vmem:[%s2549_s2] ss:$0 sm:$0xff] (!%p138_p2)  ;;  %s2208_s24 = smov (!%p138_p2), 0  }
   0x6   : > { %141 = sbr.rel (%p138_p2) target bundleno = 365 (0x16d), region = 32 }
   0xd   : > { %s2552_s13 = smov (!%p161_p3, %s1564_s13), 1 }
   0xe   : > { %s2060_s16 = smul.u32 28, %s2552_s13  ;;  %s1787_s17 = sshll.u32 %s2552_s13, 4 }
   0xf   : > { %s2201_s20 = scalar_lea.vmem %s2550_s3, %s1787_s17 }
  0x10   : > { %s2206_s23 = scalar_lea.vmem %s2547_s0, %s2060_s16 }
  0x11 LB: >> { %v2079_v1 = vld [vmem:[%s2548_s1 + $0x20] sm:$0xff]   ;;  %v2163_v2 = vmov 0.0   ;;  %v2081_v4 = vld [vmem:[%s2548_s1 + $0x28] sm:$0xff]   ;;  %vm2164_vm0 = vmmov 0   ;;  %s1572_s4 = sshll.u32 %s2161_s24, 2  ;;  %v2083_v6 = vld [vmem:[%s2548_s1 + $0x30] sm:$0xff]   ;;  %s2161_s24 = sphi %s2208_s24, %s178_s24  }
  0x12   : >> { %1868 = vmatprep.subr.bf16.mxu0 %v2163_v2  ;;  %1880 = vmatprep.subr.bf16.mxu1 %v2163_v2  ;;  %v2080_v3 = vld [vmem:[%s2548_s1] sm:$0xff]   ;;  %v2082_v5 = vld [vmem:[%s2548_s1 + $0x8] sm:$0xff]   ;;  %s2237_s7 = scalar_lea.vmem %s2206_s23, %s1572_s4  ;;  %v2084_v7 = vld [vmem:[%s2548_s1 + $0x10] sm:$0xff]   ;;  %vm233_vm1 = vcmask 523264   ;;  %s1488_s25 = scalar_lea.vmem %s2201_s20, %s1572_s4  ;;  %vm1489_vm2 = vcmask 60416  }
  0x13   : >> { %1869 = vmatpush3.bf16.msra.mxu0 %v2079_v1  ;;  %1876 = vmatprep.mubr.msk.bf16.mxu0 %vm2164_vm0, %v2163_v2  ;;  %v181_v8 = vld [vmem:[%s2237_s7] sm:$0xf]  ;;  %v2085_v10 = vld [vmem:[%s2548_s1 + $0x38] sm:$0xff]   ;;  %v2090_v18 = vld [vmem:[%s2548_s1 + $0x48] sm:$0xff]   ;;  %s178_s24 = sadd.s32 1, %s2161_s24  }
  0x14   : >> { %1881 = vmatpush3.bf16.msra.mxu1 %v2080_v3  ;;  %1870 = vmatprep.subr.bf16.mxu0 %v2163_v2  ;;  %v1581_v9 = vcombine.low %v181_v8, %v181_v8  ;;  %v2086_v11 = vld [vmem:[%s2548_s1 + $0x18] sm:$0xff]   ;;  %v2088_v15 = vld [vmem:[%s2548_s1 + $0x40] sm:$0xff]   ;;  %v2091_v19 = vld [vmem:[%s2548_s1 + $0x68] sm:$0xff]   ;;  %p175_p4 = scmp.ge.s32.totalorder %s178_s24, 4  }
  0x15   : >> { %1882 = vmatprep.subr.bf16.mxu1 %v2163_v2  ;;  %1888 = vmatprep.mubr.msk.bf16.mxu1 %vm2164_vm0, %v2163_v2  ;;  %v2089_v17 = vld [vmem:[%s2548_s1 + $0x60] sm:$0xff]   ;;  %v2092_v20 = vld [vmem:[%s2548_s1 + $0x50] sm:$0xff]   ;;  %v2094_v24 = vld [vmem:[%s2548_s1 + $0x58] sm:$0xff]  }
  0x16   : >> { %v203_v12 = vshrl.u32 %v1581_v9, 16  ;;  %v205_v13 = vshll.u32 %v1581_v9, 16  ;;  %v2093_v21 = vld [vmem:[%s2548_s1 + $0x70] sm:$0xff]   ;;  %v2095_v25 = vld [vmem:[%s2548_s1 + $0x78] sm:$0xff]   ;;  %v353_v26 = vrot.slane %v1581_v9, 1  ;;  %v2096_v27 = vld [vmem:[%s2548_s1 + $0x80] sm:$0xff]  }
  0x17   : >> { %1871 = vmatpush3.bf16.msra.mxu0 %v2081_v4  ;;  %v2097_v29 = vld [vmem:[%s2548_s1 + $0xa0] sm:$0xff]   ;;  %v2098_v31 = vld [vmem:[%s2548_s1 + $0x88] sm:$0xff]   ;;  %v2100_v34 = vld [vmem:[%s2548_s1 + $0x90] sm:$0xff]  }
  0x18   : >> { %1883 = vmatpush3.bf16.msra.mxu1 %v2082_v5  ;;  %1872 = vmatprep.subr.bf16.mxu0 %v2163_v2  ;;  %v207_v14 = vrot.slane %v205_v13, 1  ;;  %v431_v22 = vrot.slane %v203_v12, 1  ;;  %v432_v23 = vrot.slane %v205_v13, 2  ;;  %v1619_v30 = vld [vmem:[%s2237_s7 + $0x4] sm:$0xf]  ;;  %v2099_v33 = vld [vmem:[%s2548_s1 + $0xa8] sm:$0xff]  }
  0x19   : >> { %1884 = vmatprep.subr.bf16.mxu1 %v2163_v2  ;;  %v2308_v32 = vcombine.low %v1619_v30, %v1619_v30  ;;  %v2101_v36 = vld [vmem:[%s2548_s1 + $0xb0] sm:$0xff]   ;;  %v2102_v37 = vld [vmem:[%s2548_s1 + $0x98] sm:$0xff]   ;;  %v2105_v42 = vld [vmem:[%s2548_s1 + $0xc0] sm:$0xff]  }
  0x1a   : >> { %v208_v16 = vor.u32 %v207_v14, %v203_v12  ;;  %v433_v28 = vor.u32 %v432_v23, %v431_v22  ;;  %v2103_v40 = vld [vmem:[%s2548_s1 + $0xb8] sm:$0xff]   ;;  %v2106_v43 = vld [vmem:[%s2548_s1 + $0xe0] sm:$0xff]   ;;  %v2107_v44 = vld [vmem:[%s2548_s1 + $0xc8] sm:$0xff]  }
  0x1b   : >> { %1873 = vmatpush3.bf16.msra.mxu0 %v2083_v6  ;;  %v598_v35 = vshll.u32 %v2308_v32, 16  ;;  %v596_v38 = vshrl.u32 %v2308_v32, 16  ;;  %v2108_v45 = vld [vmem:[%s2548_s1 + $0xe8] sm:$0xff]   ;;  %v2109_v46 = vld [vmem:[%s2548_s1 + $0xd0] sm:$0xff]   ;;  %v2111_v50 = vld [vmem:[%s2548_s1 + $0xd8] sm:$0xff]   ;;  %v679_v52 = vrot.slane %v2308_v32, 1 }
  0x1c   : >> { %1885 = vmatpush3.bf16.msra.mxu1 %v2084_v7  ;;  %1874 = vmatprep.subr.bf16.mxu0 %v2163_v2  ;;  %v2110_v47 = vld [vmem:[%s2548_s1 + $0xf0] sm:$0xff]   ;;  %v2112_v51 = vld [vmem:[%s2548_s1 + $0xf8] sm:$0xff]   ;;  %v2113_v53 = vld [vmem:[%s2548_s1 + $0x100] sm:$0xff]  }
  0x1d   : >> { %1886 = vmatprep.subr.bf16.mxu1 %v2163_v2  ;;  %v600_v39 = vrot.slane %v598_v35, 1  ;;  %v757_v48 = vrot.slane %v596_v38, 1  ;;  %v758_v49 = vrot.slane %v598_v35, 2  ;;  %v2114_v55 = vld [vmem:[%s2548_s1 + $0x120] sm:$0xff]   ;;  %v1674_v56 = vld [vmem:[%s2237_s7 + $0x8] sm:$0xf] }
  0x1e   : >> { %v2115_v57 = vld [vmem:[%s2548_s1 + $0x108] sm:$0xff]   ;;  %v2390_v58 = vcombine.low %v1674_v56, %v1674_v56  ;;  %v2117_v60 = vld [vmem:[%s2548_s1 + $0x110] sm:$0xff]   ;;  %v2119_v63 = vld [vmem:[%s2548_s1 + $0x118] sm:$0xff]  }
  0x1f   : >> { %1875 = vmatpush3.bf16.msra.mxu0 %v2085_v10  ;;  %v601_v41 = vor.u32 %v600_v39, %v596_v38  ;;  %v759_v54 = vor.u32 %v758_v49, %v757_v48  ;;  %v2116_v59 = vld [vmem:[%s2548_s1 + $0x128] sm:$0xff]   ;;  %v2118_v62 = vld [vmem:[%s2548_s1 + $0x130] sm:$0xff]   ;;  %v2120_v4 = vld [vmem:[%s2548_s1 + $0x138] sm:$0xff]  }
  0x20   : >> { %1887 = vmatpush3.bf16.msra.mxu1 %v2086_v11  ;;  %1892 = vmatprep.subr.bf16.mxu0 %v2163_v2  ;;  %v924_v61 = vshll.u32 %v2390_v58, 16  ;;  %v922_v1 = vshrl.u32 %v2390_v58, 16  ;;  %v2122_v6 = vld [vmem:[%s2548_s1 + $0x140] sm:$0xff]   ;;  %v2125_v9 = vld [vmem:[%s2548_s1 + $0x168] sm:$0xff]   ;;  %v2126_v10 = vld [vmem:[%s2548_s1 + $0x150] sm:$0xff]  }
  0x21   : >> { %1904 = vmatprep.subr.bf16.mxu1 %v2163_v2  ;;  %v2123_v7 = vld [vmem:[%s2548_s1 + $0x160] sm:$0xff]   ;;  %v2127_v11 = vld [vmem:[%s2548_s1 + $0x170] sm:$0xff]   ;;  %v2128_v14 = vld [vmem:[%s2548_s1 + $0x158] sm:$0xff]  }
  0x22   : >> { %1877 = vmatmul.mubr.msk.bf16.vlgmr.msra.gmra.mrb[0].mxu0 %vm233_vm1, %v208_v16  ;;  %v926_v3 = vrot.slane %v924_v61, 1  ;;  %v1083_v12 = vrot.slane %v922_v1, 1  ;;  %v1084_v13 = vrot.slane %v924_v61, 2  ;;  %v1005_v16 = vrot.slane %v2390_v58, 1  ;;  %v2133_v23 = vld [vmem:[%s2548_s1 + $0x1a8] sm:$0xff]   ;;  %v2139_v32 = vld [vmem:[%s2548_s1 + $0x1c0] sm:$0xff]  }
  0x23   : >> { %1889 = vmatmul.mubr.msk.bf16.vlgmr.msra.gmra.mrb[0].mxu1 %vm233_vm1, %v181_v8  ;;  %1893 = vmatpush3.bf16.msra.mxu0 %v2088_v15  ;;  %v2124_v8 = vld [vmem:[%s2548_s1 + $0x148] sm:$0xff]   ;;  %v2129_v15 = vld [vmem:[%s2548_s1 + $0x178] sm:$0xff]  }
  0x24   : >> { %1905 = vmatpush3.bf16.msra.mxu1 %v2089_v17  ;;  %1894 = vmatprep.subr.bf16.mxu0 %v2163_v2  ;;  %v927_v5 = vor.u32 %v926_v3, %v922_v1  ;;  %v1085_v17 = vor.u32 %v1084_v13, %v1083_v12  ;;  %v2142_v35 = vld [vmem:[%s2548_s1 + $0x1e8] sm:$0xff]  }
  0x25   : >> { %1906 = vmatprep.subr.bf16.mxu1 %v2163_v2  ;;  %1900 = vmatprep.mubr.msk.bf16.mxu0 %vm2164_vm0, %v2163_v2 }
  0x26   : >> { %1912 = vmatprep.mubr.msk.bf16.mxu1 %vm2164_vm0, %v2163_v2 }
  0x27   : >> { %1895 = vmatpush3.bf16.msra.mxu0 %v2090_v18  ;;  %v2130_v18 = vld [vmem:[%s2548_s1 + $0x180] sm:$0xff]  }
  0x28   : >> { %1907 = vmatpush3.bf16.msra.mxu1 %v2091_v19  ;;  %1896 = vmatprep.subr.bf16.mxu0 %v2163_v2  ;;  %v2131_v19 = vld [vmem:[%s2548_s1 + $0x1a0] sm:$0xff]  }
  0x29   : >> { %1908 = vmatprep.subr.bf16.mxu1 %v2163_v2 }
  0x2b   : >> { %1897 = vmatpush3.bf16.msra.mxu0 %v2092_v20  ;;  %v1729_v20 = vld [vmem:[%s2237_s7 + $0xc] sm:$0xf] }
  0x2c   : >> { %1909 = vmatpush3.bf16.msra.mxu1 %v2093_v21  ;;  %1898 = vmatprep.subr.bf16.mxu0 %v2163_v2  ;;  %v2132_v21 = vld [vmem:[%s2548_s1 + $0x188] sm:$0xff]   ;;  %v1751_v22 = vcombine.low %v1729_v20, %v1729_v20 }
  0x2d   : >> { %1910 = vmatprep.subr.bf16.mxu1 %v2163_v2 }
  0x2f   : >> { %1899 = vmatpush3.bf16.msra.mxu0 %v2094_v24  ;;  %v2134_v24 = vld [vmem:[%s2548_s1 + $0x190] sm:$0xff]  }
  0x30   : >> { %1911 = vmatpush3.bf16.msra.mxu1 %v2095_v25  ;;  %1916 = vmatprep.subr.bf16.mxu0 %v2163_v2  ;;  %v1250_v25 = vshll.u32 %v1751_v22, 16 }
  0x31   : >> { %1928 = vmatprep.subr.bf16.mxu1 %v2163_v2 }
  0x32   : >> { %1901 = vmatmul.mubr.msk.bf16.vlgmr.msra.gmra.mrb[4].mxu0 %vm233_vm1, %v353_v26  ;;  %v2135_v26 = vld [vmem:[%s2548_s1 + $0x1b0] sm:$0xff]   ;;  %v1410_v39 = vrot.slane %v1250_v25, 2 }
  0x33   : >> { %1913 = vmatmul.mubr.msk.bf16.vlgmr.msra.gmra.mrb[4].mxu1 %vm233_vm1, %v433_v28  ;;  %1917 = vmatpush3.bf16.msra.mxu0 %v2096_v27  ;;  %v2136_v27 = vld [vmem:[%s2548_s1 + $0x198] sm:$0xff]   ;;  %v1248_v28 = vshrl.u32 %v1751_v22, 16 }
  0x34   : >> { %1929 = vmatpush3.bf16.msra.mxu1 %v2097_v29  ;;  %1918 = vmatprep.subr.bf16.mxu0 %v2163_v2  ;;  %v1252_v29 = vrot.slane %v1250_v25, 1 }
  0x35   : >> { %1930 = vmatprep.subr.bf16.mxu1 %v2163_v2  ;;  %1924 = vmatprep.mubr.msk.bf16.mxu0 %vm2164_vm0, %v2163_v2  ;;  %v1409_v38 = vrot.slane %v1248_v28, 1 }
  0x36   : >> { %1936 = vmatprep.mubr.msk.bf16.mxu1 %vm2164_vm0, %v2163_v2 }
  0x37   : >> { %1919 = vmatpush3.bf16.msra.mxu0 %v2098_v31  ;;  %v1253_v31 = vor.u32 %v1252_v29, %v1248_v28 }
  0x38   : >> { %1931 = vmatpush3.bf16.msra.mxu1 %v2099_v33  ;;  %1920 = vmatprep.subr.bf16.mxu0 %v2163_v2  ;;  %v2140_v33 = vld [vmem:[%s2548_s1 + $0x1e0] sm:$0xff]  }
  0x39   : >> { %1932 = vmatprep.subr.bf16.mxu1 %v2163_v2 }
  0x3b   : >> { %1921 = vmatpush3.bf16.msra.mxu0 %v2100_v34  ;;  %v2141_v34 = vld [vmem:[%s2548_s1 + $0x1c8] sm:$0xff]  }
  0x3c   : >> { %1933 = vmatpush3.bf16.msra.mxu1 %v2101_v36  ;;  %1922 = vmatprep.subr.bf16.mxu0 %v2163_v2  ;;  %v2143_v36 = vld [vmem:[%s2548_s1 + $0x1d0] sm:$0xff]  }
  0x3d   : >> { %1934 = vmatprep.subr.bf16.mxu1 %v2163_v2 }
  0x3f   : >> { %1923 = vmatpush3.bf16.msra.mxu0 %v2102_v37  ;;  %v2144_v37 = vld [vmem:[%s2548_s1 + $0x1f0] sm:$0xff]  }
  0x40   : >> { %1935 = vmatpush3.bf16.msra.mxu1 %v2103_v40  ;;  %1940 = vmatprep.subr.bf16.mxu0 %v2163_v2  ;;  %v2145_v40 = vld [vmem:[%s2548_s1 + $0x1d8] sm:$0xff]  }
  0x41   : >> { %1952 = vmatprep.subr.bf16.mxu1 %v2163_v2 }
  0x42   : >> { %1925 = vmatmul.mubr.msk.bf16.vlgmr.msra.gmra.mrb[8].mxu0 %vm233_vm1, %v1619_v30  ;;  %v2137_v30 = vld [vmem:[%s2548_s1 + $0x1b8] sm:$0xff]  }
  0x43   : >> { %1937 = vmatmul.mubr.msk.bf16.vlgmr.msra.gmra.mrb[8].mxu1 %vm233_vm1, %v601_v41  ;;  %1941 = vmatpush3.bf16.msra.mxu0 %v2105_v42  ;;  %v2146_v41 = vld [vmem:[%s2548_s1 + $0x1f8] sm:$0xff]   ;;  %v1331_v42 = vrot.slane %v1751_v22, 1 }
  0x44   : >> { %1953 = vmatpush3.bf16.msra.mxu1 %v2106_v43  ;;  %1942 = vmatprep.subr.bf16.mxu0 %v2163_v2  ;;  %v1411_v43 = vor.u32 %v1410_v39, %v1409_v38 }
  0x45   : >> { %1954 = vmatprep.subr.bf16.mxu1 %v2163_v2  ;;  %1948 = vmatprep.mubr.msk.bf16.mxu0 %vm2164_vm0, %v2163_v2 }
  0x46   : >> { %1960 = vmatprep.mubr.msk.bf16.mxu1 %vm2164_vm0, %v2163_v2 }
  0x47   : >> { %1943 = vmatpush3.bf16.msra.mxu0 %v2107_v44 }
  0x48   : >> { %1955 = vmatpush3.bf16.msra.mxu1 %v2108_v45  ;;  %1944 = vmatprep.subr.bf16.mxu0 %v2163_v2 }
  0x49   : >> { %1956 = vmatprep.subr.bf16.mxu1 %v2163_v2 }
  0x4b   : >> { %1945 = vmatpush3.bf16.msra.mxu0 %v2109_v46 }
  0x4c   : >> { %1957 = vmatpush3.bf16.msra.mxu1 %v2110_v47  ;;  %1946 = vmatprep.subr.bf16.mxu0 %v2163_v2 }
  0x4d   : >> { %1958 = vmatprep.subr.bf16.mxu1 %v2163_v2 }
  0x4f   : >> { %1947 = vmatpush3.bf16.msra.mxu0 %v2111_v50 }
  0x50   : >> { %1959 = vmatpush3.bf16.msra.mxu1 %v2112_v51  ;;  %1964 = vmatprep.subr.bf16.mxu0 %v2163_v2 }
  0x51   : >> { %1976 = vmatprep.subr.bf16.mxu1 %v2163_v2 }
  0x52   : >> { %1949 = vmatmul.mubr.msk.bf16.vlgmr.msra.gmra.mrb[12].mxu0 %vm233_vm1, %v679_v52 }
  0x53   : >> { %1961 = vmatmul.mubr.msk.bf16.vlgmr.msra.gmra.mrb[12].mxu1 %vm233_vm1, %v759_v54  ;;  %1965 = vmatpush3.bf16.msra.mxu0 %v2113_v53 }
  0x54   : >> { %1977 = vmatpush3.bf16.msra.mxu1 %v2114_v55  ;;  %1966 = vmatprep.subr.bf16.mxu0 %v2163_v2 }
  0x55   : >> { %1978 = vmatprep.subr.bf16.mxu1 %v2163_v2  ;;  %1972 = vmatprep.mubr.msk.bf16.mxu0 %vm2164_vm0, %v2163_v2 }
  0x56   : >> { %1984 = vmatprep.mubr.msk.bf16.mxu1 %vm2164_vm0, %v2163_v2 }
  0x57   : >> { %1967 = vmatpush3.bf16.msra.mxu0 %v2115_v57 }
  0x58   : >> { %1979 = vmatpush3.bf16.msra.mxu1 %v2116_v59  ;;  %1968 = vmatprep.subr.bf16.mxu0 %v2163_v2 }
  0x59   : >> { %1980 = vmatprep.subr.bf16.mxu1 %v2163_v2 }
  0x5b   : >> { %1969 = vmatpush3.bf16.msra.mxu0 %v2117_v60 }
  0x5c   : >> { %1981 = vmatpush3.bf16.msra.mxu1 %v2118_v62  ;;  %1970 = vmatprep.subr.bf16.mxu0 %v2163_v2 }
  0x5d   : >> { %1982 = vmatprep.subr.bf16.mxu1 %v2163_v2 }
  0x5f   : >> { %1971 = vmatpush3.bf16.msra.mxu0 %v2119_v63 }
  0x60   : >> { %1983 = vmatpush3.bf16.msra.mxu1 %v2120_v4  ;;  %1988 = vmatprep.subr.bf16.mxu0 %v2163_v2 }
  0x61   : >> { %2000 = vmatprep.subr.bf16.mxu1 %v2163_v2 }
  0x62   : >> { %1973 = vmatmul.mubr.msk.bf16.vlgmr.msra.gmra.mrb[16].mxu0 %vm233_vm1, %v1674_v56 }
  0x63   : >> { %1985 = vmatmul.mubr.msk.bf16.vlgmr.msra.gmra.mrb[16].mxu1 %vm233_vm1, %v927_v5  ;;  %1989 = vmatpush3.bf16.msra.mxu0 %v2122_v6 }
  0x64   : >> { %2001 = vmatpush3.bf16.msra.mxu1 %v2123_v7  ;;  %1990 = vmatprep.subr.bf16.mxu0 %v2163_v2 }
  0x65   : >> { %2002 = vmatprep.subr.bf16.mxu1 %v2163_v2  ;;  %1996 = vmatprep.mubr.msk.bf16.mxu0 %vm2164_vm0, %v2163_v2 }
  0x66   : >> { %2008 = vmatprep.mubr.msk.bf16.mxu1 %vm2164_vm0, %v2163_v2 }
  0x67   : >> { %1991 = vmatpush3.bf16.msra.mxu0 %v2124_v8 }
  0x68   : >> { %2003 = vmatpush3.bf16.msra.mxu1 %v2125_v9  ;;  %1992 = vmatprep.subr.bf16.mxu0 %v2163_v2 }
  0x69   : >> { %2004 = vmatprep.subr.bf16.mxu1 %v2163_v2 }
  0x6b   : >> { %1993 = vmatpush3.bf16.msra.mxu0 %v2126_v10 }
  0x6c   : >> { %2005 = vmatpush3.bf16.msra.mxu1 %v2127_v11  ;;  %1994 = vmatprep.subr.bf16.mxu0 %v2163_v2 }
  0x6d   : >> { %2006 = vmatprep.subr.bf16.mxu1 %v2163_v2 }
  0x6f   : >> { %1995 = vmatpush3.bf16.msra.mxu0 %v2128_v14 }
  0x70   : >> { %2007 = vmatpush3.bf16.msra.mxu1 %v2129_v15  ;;  %2012 = vmatprep.subr.bf16.mxu0 %v2163_v2 }
  0x71   : >> { %2024 = vmatprep.subr.bf16.mxu1 %v2163_v2 }
  0x72   : >> { %1997 = vmatmul.mubr.msk.bf16.vlgmr.msra.gmra.mrb[20].mxu0 %vm233_vm1, %v1005_v16 }
  0x73   : >> { %2009 = vmatmul.mubr.msk.bf16.vlgmr.msra.gmra.mrb[20].mxu1 %vm233_vm1, %v1085_v17  ;;  %2013 = vmatpush3.bf16.msra.mxu0 %v2130_v18 }
  0x74   : >> { %2025 = vmatpush3.bf16.msra.mxu1 %v2131_v19  ;;  %2014 = vmatprep.subr.bf16.mxu0 %v2163_v2 }
  0x75   : >> { %2026 = vmatprep.subr.bf16.mxu1 %v2163_v2  ;;  %2020 = vmatprep.mubr.msk.bf16.mxu0 %vm2164_vm0, %v2163_v2 }
  0x76   : >> { %2032 = vmatprep.mubr.msk.bf16.mxu1 %vm2164_vm0, %v2163_v2 }
  0x77   : >> { %2015 = vmatpush3.bf16.msra.mxu0 %v2132_v21 }
  0x78   : >> { %2027 = vmatpush3.bf16.msra.mxu1 %v2133_v23  ;;  %2016 = vmatprep.subr.bf16.mxu0 %v2163_v2 }
  0x79   : >> { %2028 = vmatprep.subr.bf16.mxu1 %v2163_v2 }
  0x7b   : >> { %2017 = vmatpush3.bf16.msra.mxu0 %v2134_v24 }
  0x7c   : >> { %2029 = vmatpush3.bf16.msra.mxu1 %v2135_v26  ;;  %2018 = vmatprep.subr.bf16.mxu0 %v2163_v2 }
  0x7d   : >> { %2030 = vmatprep.subr.bf16.mxu1 %v2163_v2 }
  0x7f   : >> { %2019 = vmatpush3.bf16.msra.mxu0 %v2136_v27 }
  0x80   : >> { %2031 = vmatpush3.bf16.msra.mxu1 %v2137_v30  ;;  %2036 = vmatprep.subr.bf16.mxu0 %v2163_v2 }
  0x81   : >> { %2048 = vmatprep.subr.bf16.mxu1 %v2163_v2 }
  0x82   : >> { %2021 = vmatmul.mubr.msk.bf16.vlgmr.msra.gmra.mrb[24].mxu0 %vm233_vm1, %v1729_v20 }
  0x83   : >> { %2033 = vmatmul.mubr.msk.bf16.vlgmr.msra.gmra.mrb[24].mxu1 %vm233_vm1, %v1253_v31  ;;  %2037 = vmatpush3.bf16.msra.mxu0 %v2139_v32 }
  0x84   : >> { %2049 = vmatpush3.bf16.msra.mxu1 %v2140_v33  ;;  %2038 = vmatprep.subr.bf16.mxu0 %v2163_v2 }
  0x85   : >> { %2050 = vmatprep.subr.bf16.mxu1 %v2163_v2  ;;  %2044 = vmatprep.mubr.msk.bf16.mxu0 %vm2164_vm0, %v2163_v2 }
  0x86   : >> { %2056 = vmatprep.mubr.msk.bf16.mxu1 %vm2164_vm0, %v2163_v2 }
  0x87   : >> { %2039 = vmatpush3.bf16.msra.mxu0 %v2141_v34 }
  0x88   : >> { %2051 = vmatpush3.bf16.msra.mxu1 %v2142_v35  ;;  %2040 = vmatprep.subr.bf16.mxu0 %v2163_v2 }
  0x89   : >> { %2052 = vmatprep.subr.bf16.mxu1 %v2163_v2 }
  0x8b   : >> { %2041 = vmatpush3.bf16.msra.mxu0 %v2143_v36 }
  0x8c   : >> { %2053 = vmatpush3.bf16.msra.mxu1 %v2144_v37  ;;  %2042 = vmatprep.subr.bf16.mxu0 %v2163_v2 }
  0x8d   : >> { %2054 = vmatprep.subr.bf16.mxu1 %v2163_v2 }
  0x8f   : >> { %2043 = vmatpush3.bf16.msra.mxu0 %v2145_v40 }
  0x90   : >> { %2055 = vmatpush3.bf16.msra.mxu1 %v2146_v41 }
  0x92   : >> { %2045 = vmatmul.mubr.msk.bf16.vlgmr.msra.gmra.mrb[28].mxu0 %vm233_vm1, %v1331_v42 }
  0x93   : >> { %2057 = vmatmul.mubr.msk.bf16.vlgmr.msra.gmra.mrb[28].mxu1 %vm233_vm1, %v1411_v43 }
  0xf5   : >> { %v271_v44 = vpop.f32.mrb[0].mxu0 }
  0xf6   : >> { %v338_v45 = vpop.f32.mrb[0].mxu1  ;;  %v1878_v46 = vpop.f32.mrb[1].mxu0 }
  0xf7   : >> { %v339_v47 = vadd.f32 %v338_v45, %v271_v44  ;;  %v1890_v48 = vpop.f32.mrb[1].mxu1  ;;  %v274_v49 = vpop.f32.mrb[2].mxu0 }
  0xf8   : >> { %v341_v50 = vpop.f32.mrb[2].mxu1  ;;  %v1879_v51 = vpop.f32.mrb[3].mxu0 }
  0xf9   : >> { %v1891_v52 = vpop.f32.mrb[3].mxu1 }
 0x105   : >> { %v415_v53 = vpop.f32.mrb[4].mxu0 }
 0x106   : >> { %v421_v54 = vadd.f32 %v415_v53, %v339_v47  ;;  %v495_v2 = vpop.f32.mrb[4].mxu1  ;;  %v1902_v55 = vpop.f32.mrb[5].mxu0 }
 0x107   : >> { %v1914_v56 = vpop.f32.mrb[5].mxu1  ;;  %v418_v57 = vpop.f32.mrb[6].mxu0 }
 0x108   : >> { %v501_v58 = vadd.f32 %v495_v2, %v421_v54  ;;  %v498_v59 = vpop.f32.mrb[6].mxu1  ;;  %v1903_v60 = vpop.f32.mrb[7].mxu0 }
 0x109   : >> { %v1915_v61 = vpop.f32.mrb[7].mxu1 }
 0x115   : >> { %v576_v62 = vpop.f32.mrb[8].mxu0 }
 0x116   : >> { %v582_v63 = vadd.f32 %v576_v62, %v501_v58  ;;  %v663_v1 = vpop.f32.mrb[8].mxu1  ;;  %v1926_v3 = vpop.f32.mrb[9].mxu0 }
 0x117   : >> { %v1938_v4 = vpop.f32.mrb[9].mxu1  ;;  %v579_v5 = vpop.f32.mrb[10].mxu0 }
 0x118   : >> { %v669_v6 = vadd.f32 %v663_v1, %v582_v63  ;;  %v666_v7 = vpop.f32.mrb[10].mxu1  ;;  %v1927_v8 = vpop.f32.mrb[11].mxu0 }
 0x119   : >> { %v1939_v9 = vpop.f32.mrb[11].mxu1 }
 0x125   : >> { %v741_v10 = vpop.f32.mrb[12].mxu0 }
 0x126   : >> { %v747_v11 = vadd.f32 %v741_v10, %v669_v6  ;;  %v821_v12 = vpop.f32.mrb[12].mxu1  ;;  %v1950_v13 = vpop.f32.mrb[13].mxu0 }
 0x127   : >> { %v1962_v14 = vpop.f32.mrb[13].mxu1  ;;  %v744_v15 = vpop.f32.mrb[14].mxu0 }
 0x128   : >> { %v827_v16 = vadd.f32 %v821_v12, %v747_v11  ;;  %v824_v17 = vpop.f32.mrb[14].mxu1  ;;  %v1951_v18 = vpop.f32.mrb[15].mxu0 }
 0x129   : >> { %v1963_v19 = vpop.f32.mrb[15].mxu1 }
 0x135   : >> { %v902_v20 = vpop.f32.mrb[16].mxu0 }
 0x136   : >> { %v908_v21 = vadd.f32 %v902_v20, %v827_v16  ;;  %v989_v22 = vpop.f32.mrb[16].mxu1  ;;  %v1974_v23 = vpop.f32.mrb[17].mxu0 }
 0x137   : >> { %v1986_v24 = vpop.f32.mrb[17].mxu1  ;;  %v905_v25 = vpop.f32.mrb[18].mxu0 }
 0x138   : >> { %v995_v26 = vadd.f32 %v989_v22, %v908_v21  ;;  %v992_v27 = vpop.f32.mrb[18].mxu1  ;;  %v1975_v28 = vpop.f32.mrb[19].mxu0 }
 0x139   : >> { %v1987_v29 = vpop.f32.mrb[19].mxu1 }
 0x145   : >> { %v1067_v30 = vpop.f32.mrb[20].mxu0 }
 0x146   : >> { %v1073_v31 = vadd.f32 %v1067_v30, %v995_v26  ;;  %v1147_v32 = vpop.f32.mrb[20].mxu1  ;;  %v1998_v33 = vpop.f32.mrb[21].mxu0 }
 0x147   : >> { %v2010_v34 = vpop.f32.mrb[21].mxu1  ;;  %v1070_v35 = vpop.f32.mrb[22].mxu0 }
 0x148   : >> { %v1153_v36 = vadd.f32 %v1147_v32, %v1073_v31  ;;  %v1150_v37 = vpop.f32.mrb[22].mxu1  ;;  %v1999_v38 = vpop.f32.mrb[23].mxu0 }
 0x149   : >> { %v2011_v39 = vpop.f32.mrb[23].mxu1 }
 0x155   : >> { %v1228_v40 = vpop.f32.mrb[24].mxu0 }
 0x156   : >> { %v1234_v41 = vadd.f32 %v1228_v40, %v1153_v36  ;;  %v1315_v42 = vpop.f32.mrb[24].mxu1  ;;  %v2022_v43 = vpop.f32.mrb[25].mxu0 }
 0x157   : >> { %v2034_v44 = vpop.f32.mrb[25].mxu1  ;;  %v1231_v45 = vpop.f32.mrb[26].mxu0 }
 0x158   : >> { %v1321_v46 = vadd.f32 %v1315_v42, %v1234_v41  ;;  %v1318_v47 = vpop.f32.mrb[26].mxu1  ;;  %v2023_v48 = vpop.f32.mrb[27].mxu0 }
 0x159   : >> { %v2035_v49 = vpop.f32.mrb[27].mxu1 }
 0x165   : >> { %v1393_v50 = vpop.f32.mrb[28].mxu0 }
 0x166   : >> { %v1399_v51 = vadd.f32 %v1393_v50, %v1321_v46  ;;  %v1473_v52 = vpop.f32.mrb[28].mxu1  ;;  %v2046_v53 = vpop.f32.mrb[29].mxu0  ;;  %177 = sbr.rel (!%p175_p4) target bundleno = 17 (0x11), region = 89 }
 0x167   : >> { %v2058_v54 = vpop.f32.mrb[29].mxu1  ;;  %v1396_v2 = vpop.f32.mrb[30].mxu0 }
 0x168   : >> { %v1479_v55 = vadd.f32 %v1473_v52, %v1399_v51  ;;  %v1476_v56 = vpop.f32.mrb[30].mxu1  ;;  %v2047_v57 = vpop.f32.mrb[31].mxu0 }
 0x169   : >> { %v2059_v58 = vpop.f32.mrb[31].mxu1 }
 0x16a   : >> { %v1486_v59 = vadd.f32 %v2196_v0, %v1479_v55 }
 0x16c   : >> { %1490 = vst.msk [vmem:[%s1488_s25] sm:$0xf] %vm1489_vm2, %v1486_v59 }
 0x16d PF: > { %s13_s12 = sadd.s32 1, %s2157_s12  }
 0x16e   : > { %p10_p5 = scmp.ge.s32.totalorder %s13_s12, 4  }
 0x170   :  { %12 = sbr.rel (!%p10_p5) target bundleno = 1 (0x1), region = 100 }

</bundles_post_ra>
